<compile_context>
chip_gen: v7x
topology: tpu7x:2x2x1
jax: 0.10.0
libtpu: 0.0.40
codegen_flags: <defaults>
</compile_context>

<pallas_src>
import functools
import math

import jax
import jax.numpy as jnp
from jax.experimental import pallas as pl
from jax.experimental.pallas import tpu as pltpu


# Hidden layer widths are fixed by the module.
_H1, _H2, _H3, _H4 = 128, 256, 512, 1024
_BN_EPS = 0.8          # nn.BatchNorm1d(out_feat, 0.8): 0.8 is eps
_LEAKY_SLOPE = 0.2


def _round_up(x, m):
    return (x + m - 1) // m * m


# ----------------------------- Pallas kernel --------------------------------

def _generator_kernel(batch,
                      z_ref,
                      w1_ref, b1_ref,
                      w2_ref, b2_ref, g2_ref, be2_ref,
                      w3_ref, b3_ref, g3_ref, be3_ref,
                      w4_ref, b4_ref, g4_ref, be4_ref,
                      w5_ref, b5_ref,
                      out_ref):
    """Whole generator MLP fused on one VMEM-resident batch tile.

    `batch` (the true, unpadded batch size) is bound statically via
    functools.partial.  Rows >= batch in z_ref are zero padding and are
    excluded from the BatchNorm statistics via a row mask.
    """
    padded_batch = z_ref.shape[0]
    needs_mask = padded_batch != batch            # static Python bool
    eps = jnp.float32(_BN_EPS)
    slope = jnp.float32(_LEAKY_SLOPE)
    inv_n = jnp.float32(1.0 / batch)

    if needs_mask:
        row_mask = (
            jax.lax.broadcasted_iota(jnp.int32, (padded_batch, 1), 0) < batch
        )

    def leaky(x):
        # slope in (0, 1)  =>  LeakyReLU(x) == max(x, slope*x)
        return jnp.maximum(x, slope * x)

    def linear(x, w_ref, b_ref):
        return jnp.dot(x, w_ref[...], preferred_element_type=jnp.float32) + b_ref[...]

    def batchnorm(x, g_ref, b_ref):
        # Training-mode BatchNorm1d: biased stats over the REAL batch only.
        # Single-pass moments (E[x], E[x^2]); affine folded into one per-feature
        # scale/shift so the (B, F) epilogue is a single mul + add.
        xm = jnp.where(row_mask, x, 0.0) if needs_mask else x
        mu = jnp.sum(xm, axis=0, keepdims=True) * inv_n
        ex2 = jnp.sum(xm * x, axis=0, keepdims=True) * inv_n
        var = ex2 - mu * mu
        scale = g_ref[...] * jax.lax.rsqrt(var + eps)   # (1, F) on EUP/VPU
        shift = b_ref[...] - mu * scale                 # (1, F)
        return x * scale + shift

    z = z_ref[...]
    # block(latent_dim, 128, normalize=False)
    h = leaky(linear(z, w1_ref, b1_ref))
    # block(128, 256)
    h = leaky(batchnorm(linear(h, w2_ref, b2_ref), g2_ref, be2_ref))
    # block(256, 512)
    h = leaky(batchnorm(linear(h, w3_ref, b3_ref), g3_ref, be3_ref))
    # block(512, 1024)
    h = leaky(batchnorm(linear(h, w4_ref, b4_ref), g4_ref, be4_ref))
    # Linear(1024, prod(img_shape)) + Tanh   (lane-padded output columns are
    # driven by zero weights/zero bias -> tanh(0)=0, sliced off in the wrapper)
    out_ref[...] = jnp.tanh(linear(h, w5_ref, b5_ref))


# ------------------------------ parameters ----------------------------------

def init_linear(key, in_feat, out_feat):
    """torch.nn.Linear default init: U[-1/sqrt(in), 1/sqrt(in)]."""
    kw, kb = jax.random.split(key)
    bound = 1.0 / math.sqrt(in_feat)
    # Stored as (in_feat, out_feat) so the kernel computes x @ W + b.
    w = jax.random.uniform(kw, (in_feat, out_feat), jnp.float32, -bound, bound)
    b = jax.random.uniform(kb, (1, out_feat), jnp.float32, -bound, bound)
    return w, b


def make_generator_params(key, latent_dim, img_shape):
    c, h, w = img_shape
    out_dim = c * h * w
    keys = jax.random.split(key, 5)
    w1, b1 = init_linear(keys[0], latent_dim, _H1)
    w2, b2 = init_linear(keys[1], _H1, _H2)
    w3, b3 = init_linear(keys[2], _H2, _H3)
    w4, b4 = init_linear(keys[3], _H3, _H4)
    w5, b5 = init_linear(keys[4], _H4, out_dim)
    # BatchNorm affine params: gamma = 1, beta = 0 (PyTorch default init).
    g2, be2 = jnp.ones((1, _H2), jnp.float32), jnp.zeros((1, _H2), jnp.float32)
    g3, be3 = jnp.ones((1, _H3), jnp.float32), jnp.zeros((1, _H3), jnp.float32)
    g4, be4 = jnp.ones((1, _H4), jnp.float32), jnp.zeros((1, _H4), jnp.float32)
    return dict(
        w1=w1, b1=b1,
        w2=w2, b2=b2, g2=g2, be2=be2,
        w3=w3, b3=b3, g3=g3, be3=be3,
        w4=w4, b4=b4, g4=g4, be4=be4,
        w5=w5, b5=b5,
    )


# ------------------------------ JAX wrapper ----------------------------------

def generator_forward(z, params, img_shape):
    """z: (B, latent_dim) f32  ->  img: (B, C, H, W) f32 in [-1, 1]."""
    c, h, w = img_shape
    batch, latent_dim = z.shape
    out_dim = c * h * w

    # Layout padding:
    #  * batch   -> multiple of 8 (f32 sublane); padded rows masked out of BN stats
    #  * latent  -> multiple of 128 (lanes) with zero weight rows (math unchanged)
    #  * out_dim -> multiple of 128 so the final store is lane-dense (no vst.msk)
    pad_b = _round_up(batch, 8)
    pad_latent = _round_up(latent_dim, 128)
    pad_out = _round_up(out_dim, 128)

    z_p = (jnp.zeros((pad_b, pad_latent), jnp.float32)
           .at[:batch, :latent_dim].set(z.astype(jnp.float32)))
    w1_p = (jnp.zeros((pad_latent, _H1), jnp.float32)
            .at[:latent_dim, :].set(params["w1"]))
    w5_p = (jnp.zeros((_H4, pad_out), jnp.float32)
            .at[:, :out_dim].set(params["w5"]))
    b5_p = (jnp.zeros((1, pad_out), jnp.float32)
            .at[:, :out_dim].set(params["b5"]))

    args = (
        z_p,
        w1_p, params["b1"],
        params["w2"], params["b2"], params["g2"], params["be2"],
        params["w3"], params["b3"], params["g3"], params["be3"],
        params["w4"], params["b4"], params["g4"], params["be4"],
        w5_p, b5_p,
    )

    # Scoped-VMEM request sized from the real footprint (weights + I/O tiles +
    # headroom for a few live f32 activation temps), capped well below v7x's
    # 64 MiB physical VMEM.
    arg_bytes = sum(int(a.size) * a.dtype.itemsize for a in args)
    out_bytes = 4 * pad_b * pad_out
    act_bytes = 4 * pad_b * _H4 * 4
    vmem_limit = int(min(48 << 20,
                         max(16 << 20, arg_bytes + out_bytes + act_bytes + (2 << 20))))

    flops = 2 * batch * (latent_dim * _H1 + _H1 * _H2 + _H2 * _H3
                         + _H3 * _H4 + _H4 * out_dim)
    transcendentals = batch * out_dim + (_H2 + _H3 + _H4)   # tanh + BN rsqrt
    bytes_accessed = arg_bytes + out_bytes

    vmem_spec = pl.BlockSpec(memory_space=pltpu.MemorySpace.VMEM)
    kernel = functools.partial(_generator_kernel, batch)

    flat = pl.pallas_call(
        kernel,
        out_shape=jax.ShapeDtypeStruct((pad_b, pad_out), jnp.float32),
        in_specs=[vmem_spec] * len(args),
        out_specs=vmem_spec,
        compiler_params=pltpu.CompilerParams(vmem_limit_bytes=vmem_limit),
        cost_estimate=pl.CostEstimate(flops=flops,
                                      transcendentals=transcendentals,
                                      bytes_accessed=bytes_accessed),
    )(*args)

    # img = img.view(img.shape[0], *img_shape): drop padding, reshape to NCHW.
    return flat[:batch, :out_dim].reshape(batch, c, h, w)


# ------------------------- pure-JAX reference check --------------------------

def generator_ref(z, p, img_shape):
    def leaky(x):
        return jnp.where(x > 0, x, 0.2 * x)

    def bn(x, g, b):
        mu = x.mean(0, keepdims=True)
        var = ((x - mu) ** 2).mean(0, keepdims=True)     # biased variance
        return (x - mu) / jnp.sqrt(var + 0.8) * g + b

    h = leaky(z @ p["w1"] + p["b1"])
    h = leaky(bn(h @ p["w2"] + p["b2"], p["g2"], p["be2"]))
    h = leaky(bn(h @ p["w3"] + p["b3"], p["g3"], p["be3"]))
    h = leaky(bn(h @ p["w4"] + p["b4"], p["g4"], p["be4"]))
    out = jnp.tanh(h @ p["w5"] + p["b5"])
    return out.reshape(z.shape[0], *img_shape)


if __name__ == "__main__":
    # Small, module-consistent shapes: latent_dim=16, img_shape=(1, 8, 8).
    latent_dim = 16
    img_shape = (1, 8, 8)

    key = jax.random.PRNGKey(0)
    k_param, k_z1, k_z2 = jax.random.split(key, 3)
    params = make_generator_params(k_param, latent_dim, img_shape)

    fwd = jax.jit(generator_forward, static_argnums=2)

    # batch=6 exercises the masked-BN (padded batch) path; batch=16 the
    # unmasked fast path.
    for batch, kz in ((6, k_z1), (16, k_z2)):
        z = jax.random.normal(kz, (batch, latent_dim), jnp.float32)
        img = jax.block_until_ready(fwd(z, params, img_shape))
        ref = generator_ref(z, params, img_shape)
        assert img.shape == (batch,) + img_shape
        assert jnp.allclose(img, ref, atol=1e-4, rtol=1e-4), \
            f"mismatch vs. reference (batch={batch})"

    print("KERNEL_OK")
</pallas_src>

<mosaic_0001>
module attributes {stable_mosaic.version = 11 : i64} {
  func.func @_generator_kernel(%arg0: memref<8x128xf32, #tpu.memory_space<vmem>>, %arg1: memref<128x128xf32, #tpu.memory_space<vmem>>, %arg2: memref<1x128xf32, #tpu.memory_space<vmem>>, %arg3: memref<128x256xf32, #tpu.memory_space<vmem>>, %arg4: memref<1x256xf32, #tpu.memory_space<vmem>>, %arg5: memref<1x256xf32, #tpu.memory_space<vmem>>, %arg6: memref<1x256xf32, #tpu.memory_space<vmem>>, %arg7: memref<256x512xf32, #tpu.memory_space<vmem>>, %arg8: memref<1x512xf32, #tpu.memory_space<vmem>>, %arg9: memref<1x512xf32, #tpu.memory_space<vmem>>, %arg10: memref<1x512xf32, #tpu.memory_space<vmem>>, %arg11: memref<512x1024xf32, #tpu.memory_space<vmem>>, %arg12: memref<1x1024xf32, #tpu.memory_space<vmem>>, %arg13: memref<1x1024xf32, #tpu.memory_space<vmem>>, %arg14: memref<1x1024xf32, #tpu.memory_space<vmem>>, %arg15: memref<1024x128xf32, #tpu.memory_space<vmem>>, %arg16: memref<1x128xf32, #tpu.memory_space<vmem>>, %arg17: memref<8x128xf32, #tpu.memory_space<vmem>>) attributes {dimension_semantics = [], scalar_prefetch = 0 : i64, scratch_operands = 0 : i64, tpu.core_type = #tpu.core_type<tc>} {
    %0 = tpu.iota {dimensions = array<i32: 0>} : vector<8x1xi32>
    %c6_i32 = arith.constant 6 : i32
    %1 = vector.broadcast %c6_i32 : i32 to vector<8x1xi32>
    %2 = arith.cmpi slt, %0, %1 : vector<8x1xi32>
    %c0 = arith.constant 0 : index
    %c0_0 = arith.constant 0 : index
    %3 = vector.load %arg0[%c0, %c0_0] : memref<8x128xf32, #tpu.memory_space<vmem>>, vector<8x128xf32>
    %c0_1 = arith.constant 0 : index
    %c0_2 = arith.constant 0 : index
    %4 = vector.load %arg1[%c0_1, %c0_2] : memref<128x128xf32, #tpu.memory_space<vmem>>, vector<128x128xf32>
    %cst = arith.constant dense<0.000000e+00> : vector<8x128xf32>
    %5 = tpu.matmul %3, %4, %cst {dimension_numbers = #tpu.dot_dimension_numbers<[1], [0], [0], [1], [0, 0, 1, 1], [], []>} : vector<8x128xf32>, vector<128x128xf32>, vector<8x128xf32> -> vector<8x128xf32>
    %c0_3 = arith.constant 0 : index
    %c0_4 = arith.constant 0 : index
    %6 = vector.load %arg2[%c0_3, %c0_4] : memref<1x128xf32, #tpu.memory_space<vmem>>, vector<1x128xf32>
    %7 = vector.broadcast %6 : vector<1x128xf32> to vector<8x128xf32>
    %8 = arith.addf %5, %7 : vector<8x128xf32>
    %cst_5 = arith.constant 2.000000e-01 : f32
    %9 = vector.broadcast %cst_5 : f32 to vector<8x128xf32>
    %10 = arith.mulf %9, %8 : vector<8x128xf32>
    %11 = arith.maximumf %8, %10 : vector<8x128xf32>
    %c0_6 = arith.constant 0 : index
    %c0_7 = arith.constant 0 : index
    %12 = vector.load %arg3[%c0_6, %c0_7] : memref<128x256xf32, #tpu.memory_space<vmem>>, vector<128x256xf32>
    %cst_8 = arith.constant dense<0.000000e+00> : vector<8x256xf32>
    %13 = tpu.matmul %11, %12, %cst_8 {dimension_numbers = #tpu.dot_dimension_numbers<[1], [0], [0], [1], [0, 0, 1, 1], [], []>} : vector<8x128xf32>, vector<128x256xf32>, vector<8x256xf32> -> vector<8x256xf32>
    %c0_9 = arith.constant 0 : index
    %c0_10 = arith.constant 0 : index
    %14 = vector.load %arg4[%c0_9, %c0_10] : memref<1x256xf32, #tpu.memory_space<vmem>>, vector<1x256xf32>
    %15 = vector.broadcast %14 : vector<1x256xf32> to vector<8x256xf32>
    %16 = arith.addf %13, %15 : vector<8x256xf32>
    %cst_11 = arith.constant 0.000000e+00 : f32
    %17 = vector.shape_cast %2 : vector<8x1xi1> to vector<8x1xi1>
    %18 = vector.broadcast %17 : vector<8x1xi1> to vector<8x256xi1>
    %19 = vector.broadcast %cst_11 : f32 to vector<8x256xf32>
    %20 = arith.select %18, %16, %19 : vector<8x256xi1>, vector<8x256xf32>
    %cst_12 = arith.constant dense<0.000000e+00> : vector<256xf32>
    %21 = vector.multi_reduction <add>, %20, %cst_12 [0] : vector<8x256xf32> to vector<256xf32>
    %22 = vector.shape_cast %21 : vector<256xf32> to vector<1x256xf32>
    %cst_13 = arith.constant 0.166666672 : f32
    %23 = vector.broadcast %cst_13 : f32 to vector<1x256xf32>
    %24 = arith.mulf %22, %23 : vector<1x256xf32>
    %25 = arith.mulf %20, %16 : vector<8x256xf32>
    %cst_14 = arith.constant dense<0.000000e+00> : vector<256xf32>
    %26 = vector.multi_reduction <add>, %25, %cst_14 [0] : vector<8x256xf32> to vector<256xf32>
    %27 = vector.shape_cast %26 : vector<256xf32> to vector<1x256xf32>
    %cst_15 = arith.constant 0.166666672 : f32
    %28 = vector.broadcast %cst_15 : f32 to vector<1x256xf32>
    %29 = arith.mulf %27, %28 : vector<1x256xf32>
    %30 = arith.mulf %24, %24 : vector<1x256xf32>
    %31 = arith.subf %29, %30 : vector<1x256xf32>
    %c0_16 = arith.constant 0 : index
    %c0_17 = arith.constant 0 : index
    %32 = vector.load %arg5[%c0_16, %c0_17] : memref<1x256xf32, #tpu.memory_space<vmem>>, vector<1x256xf32>
    %cst_18 = arith.constant 8.000000e-01 : f32
    %33 = vector.broadcast %cst_18 : f32 to vector<1x256xf32>
    %34 = arith.addf %31, %33 : vector<1x256xf32>
    %35 = math.rsqrt %34 : vector<1x256xf32>
    %36 = arith.mulf %32, %35 : vector<1x256xf32>
    %c0_19 = arith.constant 0 : index
    %c0_20 = arith.constant 0 : index
    %37 = vector.load %arg6[%c0_19, %c0_20] : memref<1x256xf32, #tpu.memory_space<vmem>>, vector<1x256xf32>
    %38 = arith.mulf %24, %36 : vector<1x256xf32>
    %39 = arith.subf %37, %38 : vector<1x256xf32>
    %40 = vector.broadcast %36 : vector<1x256xf32> to vector<8x256xf32>
    %41 = arith.mulf %16, %40 : vector<8x256xf32>
    %42 = vector.broadcast %39 : vector<1x256xf32> to vector<8x256xf32>
    %43 = arith.addf %41, %42 : vector<8x256xf32>
    %cst_21 = arith.constant 2.000000e-01 : f32
    %44 = vector.broadcast %cst_21 : f32 to vector<8x256xf32>
    %45 = arith.mulf %44, %43 : vector<8x256xf32>
    %46 = arith.maximumf %43, %45 : vector<8x256xf32>
    %c0_22 = arith.constant 0 : index
    %c0_23 = arith.constant 0 : index
    %47 = vector.load %arg7[%c0_22, %c0_23] : memref<256x512xf32, #tpu.memory_space<vmem>>, vector<256x512xf32>
    %cst_24 = arith.constant dense<0.000000e+00> : vector<8x512xf32>
    %48 = tpu.matmul %46, %47, %cst_24 {dimension_numbers = #tpu.dot_dimension_numbers<[1], [0], [0], [1], [0, 0, 1, 1], [], []>} : vector<8x256xf32>, vector<256x512xf32>, vector<8x512xf32> -> vector<8x512xf32>
    %c0_25 = arith.constant 0 : index
    %c0_26 = arith.constant 0 : index
    %49 = vector.load %arg8[%c0_25, %c0_26] : memref<1x512xf32, #tpu.memory_space<vmem>>, vector<1x512xf32>
    %50 = vector.broadcast %49 : vector<1x512xf32> to vector<8x512xf32>
    %51 = arith.addf %48, %50 : vector<8x512xf32>
    %cst_27 = arith.constant 0.000000e+00 : f32
    %52 = vector.shape_cast %2 : vector<8x1xi1> to vector<8x1xi1>
    %53 = vector.broadcast %52 : vector<8x1xi1> to vector<8x512xi1>
    %54 = vector.broadcast %cst_27 : f32 to vector<8x512xf32>
    %55 = arith.select %53, %51, %54 : vector<8x512xi1>, vector<8x512xf32>
    %cst_28 = arith.constant dense<0.000000e+00> : vector<512xf32>
    %56 = vector.multi_reduction <add>, %55, %cst_28 [0] : vector<8x512xf32> to vector<512xf32>
    %57 = vector.shape_cast %56 : vector<512xf32> to vector<1x512xf32>
    %cst_29 = arith.constant 0.166666672 : f32
    %58 = vector.broadcast %cst_29 : f32 to vector<1x512xf32>
    %59 = arith.mulf %57, %58 : vector<1x512xf32>
    %60 = arith.mulf %55, %51 : vector<8x512xf32>
    %cst_30 = arith.constant dense<0.000000e+00> : vector<512xf32>
    %61 = vector.multi_reduction <add>, %60, %cst_30 [0] : vector<8x512xf32> to vector<512xf32>
    %62 = vector.shape_cast %61 : vector<512xf32> to vector<1x512xf32>
    %cst_31 = arith.constant 0.166666672 : f32
    %63 = vector.broadcast %cst_31 : f32 to vector<1x512xf32>
    %64 = arith.mulf %62, %63 : vector<1x512xf32>
    %65 = arith.mulf %59, %59 : vector<1x512xf32>
    %66 = arith.subf %64, %65 : vector<1x512xf32>
    %c0_32 = arith.constant 0 : index
    %c0_33 = arith.constant 0 : index
    %67 = vector.load %arg9[%c0_32, %c0_33] : memref<1x512xf32, #tpu.memory_space<vmem>>, vector<1x512xf32>
    %cst_34 = arith.constant 8.000000e-01 : f32
    %68 = vector.broadcast %cst_34 : f32 to vector<1x512xf32>
    %69 = arith.addf %66, %68 : vector<1x512xf32>
    %70 = math.rsqrt %69 : vector<1x512xf32>
    %71 = arith.mulf %67, %70 : vector<1x512xf32>
    %c0_35 = arith.constant 0 : index
    %c0_36 = arith.constant 0 : index
    %72 = vector.load %arg10[%c0_35, %c0_36] : memref<1x512xf32, #tpu.memory_space<vmem>>, vector<1x512xf32>
    %73 = arith.mulf %59, %71 : vector<1x512xf32>
    %74 = arith.subf %72, %73 : vector<1x512xf32>
    %75 = vector.broadcast %71 : vector<1x512xf32> to vector<8x512xf32>
    %76 = arith.mulf %51, %75 : vector<8x512xf32>
    %77 = vector.broadcast %74 : vector<1x512xf32> to vector<8x512xf32>
    %78 = arith.addf %76, %77 : vector<8x512xf32>
    %cst_37 = arith.constant 2.000000e-01 : f32
    %79 = vector.broadcast %cst_37 : f32 to vector<8x512xf32>
    %80 = arith.mulf %79, %78 : vector<8x512xf32>
    %81 = arith.maximumf %78, %80 : vector<8x512xf32>
    %c0_38 = arith.constant 0 : index
    %c0_39 = arith.constant 0 : index
    %82 = vector.load %arg11[%c0_38, %c0_39] : memref<512x1024xf32, #tpu.memory_space<vmem>>, vector<512x1024xf32>
    %cst_40 = arith.constant dense<0.000000e+00> : vector<8x1024xf32>
    %83 = tpu.matmul %81, %82, %cst_40 {dimension_numbers = #tpu.dot_dimension_numbers<[1], [0], [0], [1], [0, 0, 1, 1], [], []>} : vector<8x512xf32>, vector<512x1024xf32>, vector<8x1024xf32> -> vector<8x1024xf32>
    %c0_41 = arith.constant 0 : index
    %c0_42 = arith.constant 0 : index
    %84 = vector.load %arg12[%c0_41, %c0_42] : memref<1x1024xf32, #tpu.memory_space<vmem>>, vector<1x1024xf32>
    %85 = vector.broadcast %84 : vector<1x1024xf32> to vector<8x1024xf32>
    %86 = arith.addf %83, %85 : vector<8x1024xf32>
    %cst_43 = arith.constant 0.000000e+00 : f32
    %87 = vector.shape_cast %2 : vector<8x1xi1> to vector<8x1xi1>
    %88 = vector.broadcast %87 : vector<8x1xi1> to vector<8x1024xi1>
    %89 = vector.broadcast %cst_43 : f32 to vector<8x1024xf32>
    %90 = arith.select %88, %86, %89 : vector<8x1024xi1>, vector<8x1024xf32>
    %cst_44 = arith.constant dense<0.000000e+00> : vector<1024xf32>
    %91 = vector.multi_reduction <add>, %90, %cst_44 [0] : vector<8x1024xf32> to vector<1024xf32>
    %92 = vector.shape_cast %91 : vector<1024xf32> to vector<1x1024xf32>
    %cst_45 = arith.constant 0.166666672 : f32
    %93 = vector.broadcast %cst_45 : f32 to vector<1x1024xf32>
    %94 = arith.mulf %92, %93 : vector<1x1024xf32>
    %95 = arith.mulf %90, %86 : vector<8x1024xf32>
    %cst_46 = arith.constant dense<0.000000e+00> : vector<1024xf32>
    %96 = vector.multi_reduction <add>, %95, %cst_46 [0] : vector<8x1024xf32> to vector<1024xf32>
    %97 = vector.shape_cast %96 : vector<1024xf32> to vector<1x1024xf32>
    %cst_47 = arith.constant 0.166666672 : f32
    %98 = vector.broadcast %cst_47 : f32 to vector<1x1024xf32>
    %99 = arith.mulf %97, %98 : vector<1x1024xf32>
    %100 = arith.mulf %94, %94 : vector<1x1024xf32>
    %101 = arith.subf %99, %100 : vector<1x1024xf32>
    %c0_48 = arith.constant 0 : index
    %c0_49 = arith.constant 0 : index
    %102 = vector.load %arg13[%c0_48, %c0_49] : memref<1x1024xf32, #tpu.memory_space<vmem>>, vector<1x1024xf32>
    %cst_50 = arith.constant 8.000000e-01 : f32
    %103 = vector.broadcast %cst_50 : f32 to vector<1x1024xf32>
    %104 = arith.addf %101, %103 : vector<1x1024xf32>
    %105 = math.rsqrt %104 : vector<1x1024xf32>
    %106 = arith.mulf %102, %105 : vector<1x1024xf32>
    %c0_51 = arith.constant 0 : index
    %c0_52 = arith.constant 0 : index
    %107 = vector.load %arg14[%c0_51, %c0_52] : memref<1x1024xf32, #tpu.memory_space<vmem>>, vector<1x1024xf32>
    %108 = arith.mulf %94, %106 : vector<1x1024xf32>
    %109 = arith.subf %107, %108 : vector<1x1024xf32>
    %110 = vector.broadcast %106 : vector<1x1024xf32> to vector<8x1024xf32>
    %111 = arith.mulf %86, %110 : vector<8x1024xf32>
    %112 = vector.broadcast %109 : vector<1x1024xf32> to vector<8x1024xf32>
    %113 = arith.addf %111, %112 : vector<8x1024xf32>
    %cst_53 = arith.constant 2.000000e-01 : f32
    %114 = vector.broadcast %cst_53 : f32 to vector<8x1024xf32>
    %115 = arith.mulf %114, %113 : vector<8x1024xf32>
    %116 = arith.maximumf %113, %115 : vector<8x1024xf32>
    %c0_54 = arith.constant 0 : index
    %c0_55 = arith.constant 0 : index
    %117 = vector.load %arg15[%c0_54, %c0_55] : memref<1024x128xf32, #tpu.memory_space<vmem>>, vector<1024x128xf32>
    %cst_56 = arith.constant dense<0.000000e+00> : vector<8x128xf32>
    %118 = tpu.matmul %116, %117, %cst_56 {dimension_numbers = #tpu.dot_dimension_numbers<[1], [0], [0], [1], [0, 0, 1, 1], [], []>} : vector<8x1024xf32>, vector<1024x128xf32>, vector<8x128xf32> -> vector<8x128xf32>
    %c0_57 = arith.constant 0 : index
    %c0_58 = arith.constant 0 : index
    %119 = vector.load %arg16[%c0_57, %c0_58] : memref<1x128xf32, #tpu.memory_space<vmem>>, vector<1x128xf32>
    %120 = vector.broadcast %119 : vector<1x128xf32> to vector<8x128xf32>
    %121 = arith.addf %118, %120 : vector<8x128xf32>
    %122 = math.tanh %121 : vector<8x128xf32>
    %c0_59 = arith.constant 0 : index
    %c0_60 = arith.constant 0 : index
    %123 = vector.load %arg17[%c0_59, %c0_60] : memref<8x128xf32, #tpu.memory_space<vmem>>, vector<8x128xf32>
    tpu.vector_store %arg17[%c0_59, %c0_60], %122 {strides = array<i32>} : memref<8x128xf32, #tpu.memory_space<vmem>>, vector<8x128xf32>,
    return
  }
}

</mosaic_0001>

<bundles_post_ra>
// kernel: generator_forward.1
= control target key start
LH: loop header
LB: loop body
LE: loop exit
PB: predicated region body
PF: predicated region fallthrough
CT: control target
= control target key end

     0   :  { %v3893_v0 = vmov 0.0|0.0   ;;  %vm3894_vm0 = vmmov 0   ;;  %v3895_v4 = vmov 0.0   ;;  %s6739_s1 = inlined_call_operand.vmem [shape: f32[128,128], index: 1, kind: input, shape index: {}]   ;;  %s6740_s3 = inlined_call_operand.vmem [shape: f32[128,256], index: 3, kind: input, shape index: {}]   ;;  %s6741_s0 = inlined_call_operand.vmem [shape: f32[8,128], index: 0, kind: input, shape index: {}]   ;;  %s6742_s2 = inlined_call_operand.vmem [shape: f32[1,128], index: 2, kind: input, shape index: {}]   ;;  %s6743_s7 = inlined_call_operand.vmem [shape: f32[256,512], index: 7, kind: input, shape index: {}]   ;;  %s6744_s4 = inlined_call_operand.vmem [shape: f32[1,256], index: 4, kind: input, shape index: {}]   ;;  %s6745_s5 = inlined_call_operand.vmem [shape: f32[1,256], index: 5, kind: input, shape index: {}]   ;;  %s6746_s6 = inlined_call_operand.vmem [shape: f32[1,256], index: 6, kind: input, shape index: {}]   ;;  %s6747_s11 = inlined_call_operand.vmem [shape: f32[512,1024], index: 11, kind: input, shape index: {}]   ;;  %s6748_s8 = inlined_call_operand.vmem [shape: f32[1,512], index: 8, kind: input, shape index: {}]   ;;  %s6749_s9 = inlined_call_operand.vmem [shape: f32[1,512], index: 9, kind: input, shape index: {}]   ;;  %s6750_s10 = inlined_call_operand.vmem [shape: f32[1,512], index: 10, kind: input, shape index: {}]   ;;  %s6751_s12 = inlined_call_operand.vmem [shape: f32[1,1024], index: 12, kind: input, shape index: {}]   ;;  %s6752_s15 = inlined_call_operand.vmem [shape: f32[1024,128], index: 15, kind: input, shape index: {}]   ;;  %s6753_s13 = inlined_call_operand.vmem [shape: f32[1,1024], index: 13, kind: input, shape index: {}]   ;;  %s6754_s14 = inlined_call_operand.vmem [shape: f32[1,1024], index: 14, kind: input, shape index: {}]   ;;  %s6755_s16 = inlined_call_operand.vmem [shape: f32[1,128], index: 16, kind: input, shape index: {}]   ;;  %s6756_s17 = inlined_call_operand.vmem [shape: f32[8,128], index: 17, kind: output, shape index: {}]  }
   0x1   :  { %6759 = sst [smem:[#allocation2_spill]] %s6739_s1  ;;  %3019 = vmatprep.subr.bf16.mxu0 %v3893_v0  ;;  %3016 = vmatprep.mubr.msk.f32.mxu0 %vm3894_vm0, %v3895_v4 }
   0x2   :  { %6760 = sst [smem:[#allocation3_spill]] %s6740_s3  ;;  %s6761_s26 = sld [smem:[#allocation2_spill]]  ;;  %263 = vmatprep.mubr.f32.mxu1 %v3895_v4 }
   0x3   :  { %s6762_s24 = sld [smem:[#allocation3_spill]] }
   0x8   :  { %v60_v1 = vld [vmem:[%s6761_s26] sm:$0xff]  ;;  %v61_v2 = vld [vmem:[%s6761_s26 + $0x8] sm:$0xff]  ;;  %v62_v3 = vld [vmem:[%s6761_s26 + $0x10] sm:$0xff] }
   0x9   :  { %v3020_v5 = vpack.c.bf16 %v61_v2, %v60_v1  ;;  %v63_v6 = vld [vmem:[%s6761_s26 + $0x18] sm:$0xff]  ;;  %v64_v8 = vld [vmem:[%s6761_s26 + $0x20] sm:$0xff]  ;;  %v65_v9 = vld [vmem:[%s6761_s26 + $0x28] sm:$0xff] }
   0xa   :  { %v3023_v7 = vpack.c.bf16 %v63_v6, %v62_v3  ;;  %v156_v10 = vld [vmem:[%s6762_s24 + $0x8] sm:$0xff]  ;;  %v66_v11 = vld [vmem:[%s6761_s26 + $0x30] sm:$0xff]  ;;  %v67_v12 = vld [vmem:[%s6761_s26 + $0x38] sm:$0xff]  ;;  %v3026_v16 = vpack.c.bf16 %v65_v9, %v64_v8 }
   0xb   :  { %3021 = vmatpush3.bf16.msra.mxu0 %v3020_v5  ;;  %v158_v13 = vld [vmem:[%s6762_s24 + $0x18] sm:$0xff]  ;;  %v155_v14 = vld [vmem:[%s6762_s24] sm:$0xff]  ;;  %v157_v15 = vld [vmem:[%s6762_s24 + $0x10] sm:$0xff]  ;;  %v3029_v27 = vpack.c.bf16 %v67_v12, %v66_v11 }
   0xc   :  { %3022 = vmatprep.subr.bf16.mxu0 %v3893_v0  ;;  %v3043_v17 = vpack.c.bf16 %v158_v13, %v156_v10  ;;  %v3045_v18 = vpack.c.bf16 %v157_v15, %v155_v14  ;;  %v160_v19 = vld [vmem:[%s6762_s24 + $0x28] sm:$0xff]  ;;  %v162_v20 = vld [vmem:[%s6762_s24 + $0x38] sm:$0xff]  ;;  %v159_v21 = vld [vmem:[%s6762_s24 + $0x20] sm:$0xff] }
   0xd   :  { %v3047_v22 = vpack.c.bf16 %v162_v20, %v160_v19  ;;  %v161_v23 = vld [vmem:[%s6762_s24 + $0x30] sm:$0xff]  ;;  %v164_v24 = vld [vmem:[%s6762_s24 + $0x48] sm:$0xff]  ;;  %v166_v25 = vld [vmem:[%s6762_s24 + $0x58] sm:$0xff] }
   0xe   :  { %3044 = vmatprep.subr.bf16.mxu1 %v3043_v17  ;;  %v3049_v26 = vpack.c.bf16 %v161_v23, %v159_v21  ;;  %v68_v28 = vld [vmem:[%s6761_s26 + $0x40] sm:$0xff]  ;;  %v3051_v29 = vpack.c.bf16 %v166_v25, %v164_v24  ;;  %v165_v31 = vld [vmem:[%s6762_s24 + $0x50] sm:$0xff]  ;;  %v69_v32 = vld [vmem:[%s6761_s26 + $0x48] sm:$0xff] }
   0xf   :  { %3024 = vmatpush3.bf16.msra.mxu0 %v3023_v7  ;;  %3046 = vmatpush1.bf16.msra.mxu1 %v3045_v18  ;;  %v163_v30 = vld [vmem:[%s6762_s24 + $0x40] sm:$0xff]  ;;  %v168_v33 = vld [vmem:[%s6762_s24 + $0x68] sm:$0xff]  ;;  %v170_v34 = vld [vmem:[%s6762_s24 + $0x78] sm:$0xff]  ;;  %v3032_v36 = vpack.c.bf16 %v69_v32, %v68_v28 }
  0x10   :  { %3025 = vmatprep.subr.bf16.mxu0 %v3893_v0  ;;  %3048 = vmatprep.subr.bf16.mxu1 %v3047_v22  ;;  %v3053_v35 = vpack.c.bf16 %v165_v31, %v163_v30  ;;  %v70_v37 = vld [vmem:[%s6761_s26 + $0x50] sm:$0xff]  ;;  %v3055_v38 = vpack.c.bf16 %v170_v34, %v168_v33  ;;  %v167_v39 = vld [vmem:[%s6762_s24 + $0x60] sm:$0xff]  ;;  %v71_v41 = vld [vmem:[%s6761_s26 + $0x58] sm:$0xff] }
  0x11   :  { %v169_v40 = vld [vmem:[%s6762_s24 + $0x70] sm:$0xff]  ;;  %v172_v42 = vld [vmem:[%s6762_s24 + $0x88] sm:$0xff]  ;;  %v174_v43 = vld [vmem:[%s6762_s24 + $0x98] sm:$0xff]  ;;  %v3035_v45 = vpack.c.bf16 %v71_v41, %v70_v37 }
  0x12   :  { %v3057_v44 = vpack.c.bf16 %v169_v40, %v167_v39  ;;  %v72_v46 = vld [vmem:[%s6761_s26 + $0x60] sm:$0xff]  ;;  %v3059_v47 = vpack.c.bf16 %v174_v43, %v172_v42  ;;  %v173_v49 = vld [vmem:[%s6762_s24 + $0x90] sm:$0xff]  ;;  %v73_v50 = vld [vmem:[%s6761_s26 + $0x68] sm:$0xff] }
  0x13   :  { %3027 = vmatpush3.bf16.msra.mxu0 %v3026_v16  ;;  %3050 = vmatpush1.bf16.msra.mxu1 %v3049_v26  ;;  %v171_v48 = vld [vmem:[%s6762_s24 + $0x80] sm:$0xff]  ;;  %v176_v51 = vld [vmem:[%s6762_s24 + $0xa8] sm:$0xff]  ;;  %v178_v52 = vld [vmem:[%s6762_s24 + $0xb8] sm:$0xff]  ;;  %v3038_v54 = vpack.c.bf16 %v73_v50, %v72_v46 }
  0x14   :  { %3028 = vmatprep.subr.bf16.mxu0 %v3893_v0  ;;  %3052 = vmatprep.subr.bf16.mxu1 %v3051_v29  ;;  %v3061_v53 = vpack.c.bf16 %v173_v49, %v171_v48  ;;  %v74_v55 = vld [vmem:[%s6761_s26 + $0x70] sm:$0xff]  ;;  %v3063_v56 = vpack.c.bf16 %v178_v52, %v176_v51  ;;  %v175_v57 = vld [vmem:[%s6762_s24 + $0xa0] sm:$0xff]  ;;  %v75_v59 = vld [vmem:[%s6761_s26 + $0x78] sm:$0xff] }
  0x15   :  { %v177_v58 = vld [vmem:[%s6762_s24 + $0xb0] sm:$0xff]  ;;  %v180_v60 = vld [vmem:[%s6762_s24 + $0xc8] sm:$0xff]  ;;  %v182_v61 = vld [vmem:[%s6762_s24 + $0xd8] sm:$0xff]  ;;  %v3041_v63 = vpack.c.bf16 %v75_v59, %v74_v55 }
  0x16   :  { %v3065_v62 = vpack.c.bf16 %v177_v58, %v175_v57  ;;  %v3067_v1 = vpack.c.bf16 %v182_v61, %v180_v60  ;;  %v59_v2 = vld [vmem:[%s6741_s0] sm:$0xff]  ;;  %v181_v4 = vld [vmem:[%s6762_s24 + $0xd0] sm:$0xff]  ;;  %v186_v6 = vld [vmem:[%s6762_s24 + $0xf8] sm:$0xff] }
  0x17   :  { %3030 = vmatpush3.bf16.msra.mxu0 %v3029_v27  ;;  %3054 = vmatpush1.bf16.msra.mxu1 %v3053_v35  ;;  %v179_v3 = vld [vmem:[%s6762_s24 + $0xc0] sm:$0xff]  ;;  %v185_v9 = vld [vmem:[%s6762_s24 + $0xf0] sm:$0xff]  ;;  %v385_v17 = vld [vmem:[%s6743_s7 + $0x8] sm:$0xff] }
  0x18   :  { %3031 = vmatprep.subr.bf16.mxu0 %v3893_v0  ;;  %3056 = vmatprep.subr.bf16.mxu1 %v3055_v38  ;;  %v3069_v5 = vpack.c.bf16 %v181_v4, %v179_v3  ;;  %v183_v8 = vld [vmem:[%s6762_s24 + $0xe0] sm:$0xff]  ;;  %v389_v18 = vld [vmem:[%s6743_s7 + $0x28] sm:$0xff]  ;;  %v387_v19 = vld [vmem:[%s6743_s7 + $0x18] sm:$0xff] }
  0x19   :  { %v3073_v10 = vpack.c.bf16 %v185_v9, %v183_v8  ;;  %v2825_v11 = vld [vmem:[%s6742_s2] ss:$0 sm:$0xff]  ;;  %v3075_v20 = vpack.c.bf16 %v389_v18, %v385_v17  ;;  %v391_v21 = vld [vmem:[%s6743_s7 + $0x38] sm:$0xff]  ;;  %v386_v26 = vld [vmem:[%s6743_s7 + $0x10] sm:$0xff] }
  0x1a   :  { %v384_v22 = vld [vmem:[%s6743_s7] sm:$0xff]  ;;  %v3139_v24 = vpack.c.bf16 %v391_v21, %v387_v19  ;;  %v390_v27 = vld [vmem:[%s6743_s7 + $0x30] sm:$0xff]  ;;  %v393_v29 = vld [vmem:[%s6743_s7 + $0x48] sm:$0xff] }
  0x1b   :  { %3033 = vmatpush3.bf16.msra.mxu0 %v3032_v36  ;;  %3058 = vmatpush1.bf16.msra.mxu1 %v3057_v44  ;;  %v388_v23 = vld [vmem:[%s6743_s7 + $0x20] sm:$0xff]  ;;  %v3141_v28 = vpack.c.bf16 %v390_v27, %v386_v26  ;;  %v397_v30 = vld [vmem:[%s6743_s7 + $0x68] sm:$0xff]  ;;  %v395_v31 = vld [vmem:[%s6743_s7 + $0x58] sm:$0xff] }
  0x1c   :  { %3034 = vmatprep.subr.bf16.mxu0 %v3893_v0  ;;  %3060 = vmatprep.subr.bf16.mxu1 %v3059_v47  ;;  %v3077_v25 = vpack.c.bf16 %v388_v23, %v384_v22  ;;  %v3079_v32 = vpack.c.bf16 %v397_v30, %v393_v29  ;;  %v399_v33 = vld [vmem:[%s6743_s7 + $0x78] sm:$0xff]  ;;  %v392_v34 = vld [vmem:[%s6743_s7 + $0x40] sm:$0xff]  ;;  %v394_v38 = vld [vmem:[%s6743_s7 + $0x50] sm:$0xff] }
  0x1d   :  { %v396_v35 = vld [vmem:[%s6743_s7 + $0x60] sm:$0xff]  ;;  %v3143_v36 = vpack.c.bf16 %v399_v33, %v395_v31  ;;  %v398_v39 = vld [vmem:[%s6743_s7 + $0x70] sm:$0xff]  ;;  %v401_v41 = vld [vmem:[%s6743_s7 + $0x88] sm:$0xff] }
  0x1e   :  { %v3081_v37 = vpack.c.bf16 %v396_v35, %v392_v34  ;;  %v3145_v40 = vpack.c.bf16 %v398_v39, %v394_v38  ;;  %v405_v42 = vld [vmem:[%s6743_s7 + $0xa8] sm:$0xff]  ;;  %v403_v43 = vld [vmem:[%s6743_s7 + $0x98] sm:$0xff]  ;;  %v400_v46 = vld [vmem:[%s6743_s7 + $0x80] sm:$0xff] }
  0x1f   :  { %3036 = vmatpush3.bf16.msra.mxu0 %v3035_v45  ;;  %3062 = vmatpush1.bf16.msra.mxu1 %v3061_v53  ;;  %v3083_v44 = vpack.c.bf16 %v405_v42, %v401_v41  ;;  %v407_v45 = vld [vmem:[%s6743_s7 + $0xb8] sm:$0xff]  ;;  %v404_v47 = vld [vmem:[%s6743_s7 + $0xa0] sm:$0xff]  ;;  %v402_v50 = vld [vmem:[%s6743_s7 + $0x90] sm:$0xff] }
  0x20   :  { %3037 = vmatprep.subr.bf16.mxu0 %v3893_v0  ;;  %3064 = vmatprep.subr.bf16.mxu1 %v3063_v56  ;;  %v3147_v48 = vpack.c.bf16 %v407_v45, %v403_v43  ;;  %v3085_v49 = vpack.c.bf16 %v404_v47, %v400_v46  ;;  %v406_v51 = vld [vmem:[%s6743_s7 + $0xb0] sm:$0xff]  ;;  %v409_v53 = vld [vmem:[%s6743_s7 + $0xc8] sm:$0xff]  ;;  %v411_v55 = vld [vmem:[%s6743_s7 + $0xd8] sm:$0xff] }
  0x21   :  { %v3149_v52 = vpack.c.bf16 %v406_v51, %v402_v50  ;;  %v415_v57 = vld [vmem:[%s6743_s7 + $0xf8] sm:$0xff]  ;;  %v408_v58 = vld [vmem:[%s6743_s7 + $0xc0] sm:$0xff]  ;;  %v421_v3 = vld [vmem:[%s6743_s7 + $0x128] sm:$0xff] }
  0x22   :  { %v412_v59 = vld [vmem:[%s6743_s7 + $0xe0] sm:$0xff]  ;;  %v3151_v60 = vpack.c.bf16 %v415_v57, %v411_v55  ;;  %v419_v4 = vld [vmem:[%s6743_s7 + $0x118] sm:$0xff]  ;;  %v426_v22 = vld [vmem:[%s6743_s7 + $0x150] sm:$0xff] }
  0x23   :  { %3039 = vmatpush3.bf16.msra.mxu0 %v3038_v54  ;;  %3066 = vmatpush1.bf16.msra.mxu1 %v3065_v62  ;;  %v413_v54 = vld [vmem:[%s6743_s7 + $0xe8] sm:$0xff]  ;;  %v3089_v61 = vpack.c.bf16 %v412_v59, %v408_v58  ;;  %v410_v62 = vld [vmem:[%s6743_s7 + $0xd0] sm:$0xff]  ;;  %v431_v17 = vld [vmem:[%s6743_s7 + $0x178] sm:$0xff] }
  0x24   :  { %3040 = vmatprep.subr.bf16.mxu0 %v3893_v0  ;;  %3068 = vmatprep.subr.bf16.mxu1 %v3067_v1  ;;  %v184_v0 = vld [vmem:[%s6762_s24 + $0xe8] sm:$0xff]  ;;  %v3087_v56 = vpack.c.bf16 %v413_v54, %v409_v53  ;;  %v424_v18 = vld [vmem:[%s6743_s7 + $0x140] sm:$0xff]  ;;  %v430_v23 = vld [vmem:[%s6743_s7 + $0x170] sm:$0xff] }
  0x25   :  { %v3071_v7 = vpack.c.bf16 %v186_v6, %v184_v0  ;;  %v423_v0 = vld [vmem:[%s6743_s7 + $0x138] sm:$0xff]  ;;  %v416_v6 = vld [vmem:[%s6743_s7 + $0x100] sm:$0xff]  ;;  %v437_v26 = vld [vmem:[%s6743_s7 + $0x1a8] sm:$0xff] }
  0x26   :  { %v3155_v8 = vpack.c.bf16 %v423_v0, %v419_v4  ;;  %v428_v19 = vld [vmem:[%s6743_s7 + $0x160] sm:$0xff]  ;;  %v435_v27 = vld [vmem:[%s6743_s7 + $0x198] sm:$0xff]  ;;  %v434_v34 = vld [vmem:[%s6743_s7 + $0x190] sm:$0xff] }
  0x27   :  { %3042 = vmatpush3.bf16.msra.mxu0 %v3041_v63  ;;  %3070 = vmatpush1.bf16.msra.mxu1 %v3069_v5  ;;  %v414_v63 = vld [vmem:[%s6743_s7 + $0xf0] sm:$0xff]  ;;  %v3097_v21 = vpack.c.bf16 %v428_v19, %v424_v18  ;;  %v439_v29 = vld [vmem:[%s6743_s7 + $0x1b8] sm:$0xff]  ;;  %v432_v30 = vld [vmem:[%s6743_s7 + $0x180] sm:$0xff] }
  0x28   :  { %3072 = vmatprep.subr.bf16.mxu1 %v3071_v7  ;;  %3076 = vmatprep.subr.bf16.mxu0 %v3075_v20  ;;  %v3153_v1 = vpack.c.bf16 %v414_v63, %v410_v62  ;;  %v420_v7 = vld [vmem:[%s6743_s7 + $0x120] sm:$0xff]  ;;  %v438_v35 = vld [vmem:[%s6743_s7 + $0x1b0] sm:$0xff]  ;;  %v445_v38 = vld [vmem:[%s6743_s7 + $0x1e8] sm:$0xff] }
  0x29   :  { %v3093_v9 = vpack.c.bf16 %v420_v7, %v416_v6  ;;  %v436_v31 = vld [vmem:[%s6743_s7 + $0x1a0] sm:$0xff]  ;;  %v443_v39 = vld [vmem:[%s6743_s7 + $0x1d8] sm:$0xff]  ;;  %v442_v46 = vld [vmem:[%s6743_s7 + $0x1d0] sm:$0xff] }
  0x2a   :  { %3017 = vmatmul.mubr.f32.vlgmr.msra.gmra.mrb[0].mxu0 %v59_v2  ;;  %v417_v2 = vld [vmem:[%s6743_s7 + $0x108] sm:$0xff]  ;;  %v3101_v33 = vpack.c.bf16 %v436_v31, %v432_v30  ;;  %v447_v41 = vld [vmem:[%s6743_s7 + $0x1f8] sm:$0xff]  ;;  %v440_v42 = vld [vmem:[%s6743_s7 + $0x1c0] sm:$0xff] }
  0x2b   :  { %3074 = vmatpush1.bf16.msra.mxu1 %v3073_v10  ;;  %3078 = vmatpush1.bf16.msra.mxu0 %v3077_v25  ;;  %v3091_v5 = vpack.c.bf16 %v421_v3, %v417_v2  ;;  %v418_v10 = vld [vmem:[%s6743_s7 + $0x110] sm:$0xff]  ;;  %v433_v25 = vld [vmem:[%s6743_s7 + $0x188] sm:$0xff]  ;;  %v444_v43 = vld [vmem:[%s6743_s7 + $0x1e0] sm:$0xff] }
  0x2c   :  { %3140 = vmatprep.subr.bf16.mxu1 %v3139_v24  ;;  %3080 = vmatprep.subr.bf16.mxu0 %v3079_v32  ;;  %v3161_v24 = vpack.c.bf16 %v430_v23, %v426_v22  ;;  %v3163_v32 = vpack.c.bf16 %v439_v29, %v435_v27  ;;  %v3105_v45 = vpack.c.bf16 %v444_v43, %v440_v42  ;;  %v446_v47 = vld [vmem:[%s6743_s7 + $0x1f0] sm:$0xff]  ;;  %v453_v50 = vld [vmem:[%s6743_s7 + $0x228] sm:$0xff]  ;;  %v451_v51 = vld [vmem:[%s6743_s7 + $0x218] sm:$0xff] }
  0x2d   :  { %v455_v53 = vld [vmem:[%s6743_s7 + $0x238] sm:$0xff]  ;;  %v448_v54 = vld [vmem:[%s6743_s7 + $0x200] sm:$0xff]  ;;  %v450_v58 = vld [vmem:[%s6743_s7 + $0x210] sm:$0xff] }
  0x2e   :  { %v452_v55 = vld [vmem:[%s6743_s7 + $0x220] sm:$0xff]  ;;  %v454_v59 = vld [vmem:[%s6743_s7 + $0x230] sm:$0xff]  ;;  %v461_v62 = vld [vmem:[%s6743_s7 + $0x268] sm:$0xff] }
  0x2f   :  { %3082 = vmatpush1.bf16.msra.mxu0 %v3081_v37  ;;  %v441_v37 = vld [vmem:[%s6743_s7 + $0x1c8] sm:$0xff]  ;;  %v3109_v57 = vpack.c.bf16 %v452_v55, %v448_v54  ;;  %v459_v63 = vld [vmem:[%s6743_s7 + $0x258] sm:$0xff]  ;;  %v456_v3 = vld [vmem:[%s6743_s7 + $0x240] sm:$0xff] }
  0x30   :  { %3084 = vmatprep.subr.bf16.mxu0 %v3083_v44  ;;  %v3167_v44 = vpack.c.bf16 %v447_v41, %v443_v39  ;;  %v463_v2 = vld [vmem:[%s6743_s7 + $0x278] sm:$0xff]  ;;  %v460_v4 = vld [vmem:[%s6743_s7 + $0x260] sm:$0xff]  ;;  %v458_v6 = vld [vmem:[%s6743_s7 + $0x250] sm:$0xff] }
  0x31   :  { %v3113_v0 = vpack.c.bf16 %v460_v4, %v456_v3  ;;  %v462_v7 = vld [vmem:[%s6743_s7 + $0x270] sm:$0xff]  ;;  %v477_v22 = vld [vmem:[%s6743_s7 + $0x2e8] sm:$0xff]  ;;  %v475_v23 = vld [vmem:[%s6743_s7 + $0x2d8] sm:$0xff] }
  0x32   :  { %v466_v18 = vld [vmem:[%s6743_s7 + $0x290] sm:$0xff]  ;;  %v476_v27 = vld [vmem:[%s6743_s7 + $0x2e0] sm:$0xff] }
  0x33   :  { %3086 = vmatpush1.bf16.msra.mxu0 %v3085_v49  ;;  %v449_v49 = vld [vmem:[%s6743_s7 + $0x208] sm:$0xff]  ;;  %v470_v19 = vld [vmem:[%s6743_s7 + $0x2b0] sm:$0xff]  ;;  %v484_v39 = vld [vmem:[%s6743_s7 + $0x320] sm:$0xff] }
  0x34   :  { %3088 = vmatprep.subr.bf16.mxu0 %v3087_v56  ;;  %v3171_v56 = vpack.c.bf16 %v455_v53, %v451_v51  ;;  %v474_v30 = vld [vmem:[%s6743_s7 + $0x2d0] sm:$0xff]  ;;  %v492_v51 = vld [vmem:[%s6743_s7 + $0x360] sm:$0xff] }
  0x35   :  { %v478_v31 = vld [vmem:[%s6743_s7 + $0x2f0] sm:$0xff] }
  0x36   :  { %v482_v42 = vld [vmem:[%s6743_s7 + $0x310] sm:$0xff] }
  0x37   :  { %3090 = vmatpush1.bf16.msra.mxu0 %v3089_v61  ;;  %v457_v61 = vld [vmem:[%s6743_s7 + $0x248] sm:$0xff]  ;;  %v486_v43 = vld [vmem:[%s6743_s7 + $0x330] sm:$0xff] }
  0x38   :  { %3092 = vmatprep.subr.bf16.mxu0 %v3091_v5  ;;  %v3175_v5 = vpack.c.bf16 %v463_v2, %v459_v63  ;;  %v490_v54 = vld [vmem:[%s6743_s7 + $0x350] sm:$0xff]  ;;  %v496_v63 = vld [vmem:[%s6743_s7 + $0x380] sm:$0xff] }
  0x39   :  { %v494_v55 = vld [vmem:[%s6743_s7 + $0x370] sm:$0xff] }
  0x3a   :  { %v498_v2 = vld [vmem:[%s6743_s7 + $0x390] sm:$0xff] }
  0x3b   :  { %3094 = vmatpush1.bf16.msra.mxu0 %v3093_v9  ;;  %v465_v9 = vld [vmem:[%s6743_s7 + $0x288] sm:$0xff]  ;;  %v502_v4 = vld [vmem:[%s6743_s7 + $0x3b0] sm:$0xff] }
  0xfd   :  { %v149_v12 = vpop.f32.mrb[0].mxu0 }
  0xfe   :  { %v150_v13 = vadd.f32 %v2825_v11, %v149_v12  ;;  %v3018_v14 = vpop.f32.mrb[1].mxu0  ;;  %v422_v11 = vld [vmem:[%s6743_s7 + $0x130] sm:$0xff] }
  0xff   :  { %v3157_v12 = vpack.c.bf16 %v422_v11, %v418_v10  ;;  %v429_v14 = vld [vmem:[%s6743_s7 + $0x168] sm:$0xff]  ;;  %v467_v11 = vld [vmem:[%s6743_s7 + $0x298] sm:$0xff] }
 0x100   :  { %v153_v15 = vmul.f32 0.2, %v150_v13  ;;  %v469_v10 = vld [vmem:[%s6743_s7 + $0x2a8] sm:$0xff] }
 0x102   :  { %v154_v16 = vmax.f32 %v150_v13, %v153_v15  ;;  %v425_v13 = vld [vmem:[%s6743_s7 + $0x148] sm:$0xff]  ;;  %v427_v15 = vld [vmem:[%s6743_s7 + $0x158] sm:$0xff] }
 0x103   :  { %v3159_v20 = vpack.c.bf16 %v431_v17, %v427_v15  ;;  %v468_v15 = vld [vmem:[%s6743_s7 + $0x2a0] sm:$0xff] }
 0x104   :  { %264 = vmatmul.mubr.f32.vlgmr.msra.gmra.mrb[0].mxu1 %v154_v16  ;;  %v3095_v16 = vpack.c.bf16 %v429_v14, %v425_v13  ;;  %v471_v13 = vld [vmem:[%s6743_s7 + $0x2b8] sm:$0xff]  ;;  %v464_v14 = vld [vmem:[%s6743_s7 + $0x280] sm:$0xff] }
 0x105   :  { %3142 = vmatpush1.bf16.msra.mxu1 %v3141_v28  ;;  %v3099_v28 = vpack.c.bf16 %v437_v26, %v433_v25  ;;  %v3117_v17 = vpack.c.bf16 %v468_v15, %v464_v14  ;;  %v479_v25 = vld [vmem:[%s6743_s7 + $0x2f8] sm:$0xff]  ;;  %v472_v26 = vld [vmem:[%s6743_s7 + $0x2c0] sm:$0xff]  ;;  %v510_v14 = vld [vmem:[%s6743_s7 + $0x3f0] sm:$0xff] }
 0x106   :  { %3144 = vmatprep.subr.bf16.mxu1 %v3143_v36  ;;  %3096 = vmatprep.subr.bf16.mxu0 %v3095_v16  ;;  %v3165_v36 = vpack.c.bf16 %v438_v35, %v434_v34  ;;  %v3179_v16 = vpack.c.bf16 %v471_v13, %v467_v11  ;;  %v3121_v29 = vpack.c.bf16 %v476_v27, %v472_v26  ;;  %v485_v34 = vld [vmem:[%s6743_s7 + $0x328] sm:$0xff]  ;;  %v483_v35 = vld [vmem:[%s6743_s7 + $0x318] sm:$0xff]  ;;  %v506_v13 = vld [vmem:[%s6743_s7 + $0x3d0] sm:$0xff] }
 0x107   :  { %3098 = vmatpush1.bf16.msra.mxu0 %v3097_v21  ;;  %v473_v21 = vld [vmem:[%s6743_s7 + $0x2c8] sm:$0xff] }
 0x108   :  { %3100 = vmatprep.subr.bf16.mxu0 %v3099_v28  ;;  %v3183_v28 = vpack.c.bf16 %v479_v25, %v475_v23 }
 0x109   :  { %3146 = vmatpush1.bf16.msra.mxu1 %v3145_v40  ;;  %v3103_v40 = vpack.c.bf16 %v445_v38, %v441_v37  ;;  %v487_v37 = vld [vmem:[%s6743_s7 + $0x338] sm:$0xff]  ;;  %v480_v38 = vld [vmem:[%s6743_s7 + $0x300] sm:$0xff] }
 0x10a   :  { %3148 = vmatprep.subr.bf16.mxu1 %v3147_v48  ;;  %v3169_v48 = vpack.c.bf16 %v446_v47, %v442_v46  ;;  %v3125_v41 = vpack.c.bf16 %v484_v39, %v480_v38  ;;  %v493_v46 = vld [vmem:[%s6743_s7 + $0x368] sm:$0xff]  ;;  %v491_v47 = vld [vmem:[%s6743_s7 + $0x358] sm:$0xff] }
 0x10b   :  { %3102 = vmatpush1.bf16.msra.mxu0 %v3101_v33  ;;  %v481_v33 = vld [vmem:[%s6743_s7 + $0x308] sm:$0xff] }
 0x10c   :  { %3104 = vmatprep.subr.bf16.mxu0 %v3103_v40  ;;  %v3187_v40 = vpack.c.bf16 %v487_v37, %v483_v35 }
 0x10d   :  { %3150 = vmatpush1.bf16.msra.mxu1 %v3149_v52  ;;  %v3107_v52 = vpack.c.bf16 %v453_v50, %v449_v49  ;;  %v495_v49 = vld [vmem:[%s6743_s7 + $0x378] sm:$0xff]  ;;  %v488_v50 = vld [vmem:[%s6743_s7 + $0x340] sm:$0xff] }
 0x10e   :  { %3152 = vmatprep.subr.bf16.mxu1 %v3151_v60  ;;  %v3173_v60 = vpack.c.bf16 %v454_v59, %v450_v58  ;;  %v3129_v53 = vpack.c.bf16 %v492_v51, %v488_v50  ;;  %v501_v58 = vld [vmem:[%s6743_s7 + $0x3a8] sm:$0xff]  ;;  %v499_v59 = vld [vmem:[%s6743_s7 + $0x398] sm:$0xff] }
 0x10f   :  { %3106 = vmatpush1.bf16.msra.mxu0 %v3105_v45  ;;  %v489_v45 = vld [vmem:[%s6743_s7 + $0x348] sm:$0xff] }
 0x110   :  { %3108 = vmatprep.subr.bf16.mxu0 %v3107_v52  ;;  %v3191_v52 = vpack.c.bf16 %v495_v49, %v491_v47 }
 0x111   :  { %3154 = vmatpush1.bf16.msra.mxu1 %v3153_v1  ;;  %v3111_v1 = vpack.c.bf16 %v461_v62, %v457_v61 }
 0x112   :  { %3156 = vmatprep.subr.bf16.mxu1 %v3155_v8  ;;  %v3177_v8 = vpack.c.bf16 %v462_v7, %v458_v6  ;;  %v3197_v6 = vpack.c.bf16 %v502_v4, %v498_v2 }
 0x113   :  { %3110 = vmatpush1.bf16.msra.mxu0 %v3109_v57  ;;  %v3193_v57 = vpack.c.bf16 %v494_v55, %v490_v54 }
 0x114   :  { %3112 = vmatprep.subr.bf16.mxu0 %v3111_v1  ;;  %v500_v1 = vld [vmem:[%s6743_s7 + $0x3a0] sm:$0xff] }
 0x115   :  { %3158 = vmatpush1.bf16.msra.mxu1 %v3157_v12  ;;  %v3115_v12 = vpack.c.bf16 %v469_v10, %v465_v9  ;;  %v3133_v3 = vpack.c.bf16 %v500_v1, %v496_v63  ;;  %v511_v9 = vld [vmem:[%s6743_s7 + $0x3f8] sm:$0xff]  ;;  %v504_v10 = vld [vmem:[%s6743_s7 + $0x3c0] sm:$0xff] }
 0x116   :  { %3160 = vmatprep.subr.bf16.mxu1 %v3159_v20  ;;  %v3181_v20 = vpack.c.bf16 %v470_v19, %v466_v18 }
 0x117   :  { %3114 = vmatpush1.bf16.msra.mxu0 %v3113_v0  ;;  %v509_v0 = vld [vmem:[%s6743_s7 + $0x3e8] sm:$0xff] }
 0x118   :  { %3116 = vmatprep.subr.bf16.mxu0 %v3115_v12  ;;  %v508_v12 = vld [vmem:[%s6743_s7 + $0x3e0] sm:$0xff] }
 0x119   :  { %3162 = vmatpush1.bf16.msra.mxu1 %v3161_v24  ;;  %v3119_v24 = vpack.c.bf16 %v477_v22, %v473_v21  ;;  %v3137_v15 = vpack.c.bf16 %v508_v12, %v504_v10  ;;  %v308_v10 = vld [vmem:[%s6745_s5] sm:$0x3] }
 0x11a   :  { %3164 = vmatprep.subr.bf16.mxu1 %v3163_v32  ;;  %v3185_v32 = vpack.c.bf16 %v478_v31, %v474_v30 }
 0x11b   :  { %3118 = vmatpush1.bf16.msra.mxu0 %v3117_v17  ;;  %v56_v17 = vlaneseq }
 0x11c   :  { %3120 = vmatprep.subr.bf16.mxu0 %v3119_v24 }
 0x11d   :  { %3166 = vmatpush1.bf16.msra.mxu1 %v3165_v36  ;;  %v3123_v36 = vpack.c.bf16 %v485_v34, %v481_v33  ;;  %v4529_v18 = vshrl.u32 %v56_v17, 7 }
 0x11e   :  { %3168 = vmatprep.subr.bf16.mxu1 %v3167_v44  ;;  %v3189_v44 = vpack.c.bf16 %v486_v43, %v482_v42 }
 0x11f   :  { %3122 = vmatpush1.bf16.msra.mxu0 %v3121_v29  ;;  %v4532_v19 = vsub.s32 0, %v4529_v18  ;;  %v4538_v21 = vsub.s32 1, %v4529_v18  ;;  %vm58_vm1 = vcmp.lt.s32.totalorder %v4529_v18, 6 }
 0x120   :  { %3124 = vmatprep.subr.bf16.mxu0 %v3123_v36 }
 0x121   :  { %3170 = vmatpush1.bf16.msra.mxu1 %v3169_v48  ;;  %v3127_v48 = vpack.c.bf16 %v493_v46, %v489_v45 }
 0x122   :  { %3172 = vmatprep.subr.bf16.mxu1 %v3171_v56  ;;  %v497_v56 = vld [vmem:[%s6743_s7 + $0x388] sm:$0xff] }
 0x123   :  { %3126 = vmatpush1.bf16.msra.mxu0 %v3125_v41  ;;  %v3131_v61 = vpack.c.bf16 %v501_v58, %v497_v56 }
 0x124   :  { %3128 = vmatprep.subr.bf16.mxu0 %v3127_v48 }
 0x125   :  { %3174 = vmatpush1.bf16.msra.mxu1 %v3173_v60  ;;  %v503_v60 = vld [vmem:[%s6743_s7 + $0x3b8] sm:$0xff] }
 0x126   :  { %3176 = vmatprep.subr.bf16.mxu1 %v3175_v5  ;;  %v3195_v62 = vpack.c.bf16 %v503_v60, %v499_v59  ;;  %v505_v5 = vld [vmem:[%s6743_s7 + $0x3c8] sm:$0xff] }
 0x127   :  { %3130 = vmatpush1.bf16.msra.mxu0 %v3129_v53  ;;  %v3135_v7 = vpack.c.bf16 %v509_v0, %v505_v5 }
 0x128   :  { %3132 = vmatprep.subr.bf16.mxu0 %v3131_v61 }
 0x129   :  { %3178 = vmatpush1.bf16.msra.mxu1 %v3177_v8  ;;  %v507_v8 = vld [vmem:[%s6743_s7 + $0x3d8] sm:$0xff] }
 0x12a   :  { %3180 = vmatprep.subr.bf16.mxu1 %v3179_v16  ;;  %v3199_v11 = vpack.c.bf16 %v511_v9, %v507_v8  ;;  %v3201_v16 = vpack.c.bf16 %v510_v14, %v506_v13 }
 0x12b   :  { %3134 = vmatpush1.bf16.msra.mxu0 %v3133_v3  ;;  %v3896_v3 = vmov 1966171168  }
 0x12c   :  { %3136 = vmatprep.subr.bf16.mxu0 %v3135_v7  ;;  %v317_v4 = vunpack.c.l.s4 %v3896_v3 }
 0x12d   :  { %3182 = vmatpush1.bf16.msra.mxu1 %v3181_v20  ;;  %v187_v20 = vld [vmem:[%s6744_s4] sm:$0x3] }
 0x12e   :  { %3184 = vmatprep.subr.bf16.mxu1 %v3183_v28  ;;  %v192_v22 = vrot.slane %v187_v20, %v4532_v19  ;;  %v196_v23 = vrot.slane %v187_v20, %v4538_v21  ;;  %v318_v5 = vunpack.c.0.s8 %v317_v4 }
 0x12f   :  { %3138 = vmatpush1.bf16.msra.mxu0 %v3137_v15 }
 0x131   :  { %3186 = vmatpush1.bf16.msra.mxu1 %v3185_v32 }
 0x132   :  { %3188 = vmatprep.subr.bf16.mxu1 %v3187_v40 }
 0x135   :  { %3190 = vmatpush1.bf16.msra.mxu1 %v3189_v44 }
 0x136   :  { %3192 = vmatprep.subr.bf16.mxu1 %v3191_v52 }
 0x139   :  { %3194 = vmatpush1.bf16.msra.mxu1 %v3193_v57 }
 0x13a   :  { %3196 = vmatprep.subr.bf16.mxu1 %v3195_v62 }
 0x13d   :  { %3198 = vmatpush1.bf16.msra.mxu1 %v3197_v6  ;;  %v4548_v6 = vsub.s32 %v318_v5, %v4529_v18  ;;  %v914_v5 = vld [vmem:[%s6747_s11 + $0x110] sm:$0xff] }
 0x13e   :  { %3200 = vmatprep.subr.bf16.mxu1 %v3199_v11 }
 0x141   :  { %3202 = vmatpush1.bf16.msra.mxu1 %v3201_v16 }
 0x1d7   :  { %v265_v24 = vpop.f32.mrb[0].mxu1 }
 0x1d8   :  { %v266_v25 = vadd.f32 %v265_v24, %v192_v22  ;;  %v267_v26 = vpop.f32.mrb[1].mxu1  ;;  %v332_v24 = vld [vmem:[%s6746_s6] sm:$0x3] }
 0x1d9   :  { %v268_v27 = vadd.f32 %v267_v26, %v196_v23 }
 0x1da   :  { %v272_v28 = vsel %vm58_vm1, %v266_v25, 0.0 }
 0x1db   :  { %v274_v29 = vrot.slane %v272_v28, 4  ;;  %v288_v30 = vmul.f32 %v272_v28, %v266_v25  ;;  %v273_v31 = vsel %vm58_vm1, %v268_v27, 0.0 }
 0x1dc   :  { %v280_v32 = vrot.slane %v273_v31, 4  ;;  %v289_v33 = vmul.f32 %v273_v31, %v268_v27 }
 0x1dd   :  { %v275_v34 = vadd.f32 %v274_v29, %v272_v28  ;;  %v290_v35 = vrot.slane %v288_v30, 4 }
 0x1de   :  { %v281_v36 = vadd.f32 %v280_v32, %v273_v31  ;;  %v296_v37 = vrot.slane %v289_v33, 4 }
 0x1df   :  { %v276_v38 = vrot.slane %v275_v34, 2  ;;  %v291_v39 = vadd.f32 %v290_v35, %v288_v30  ;;  %v881_v35 = vld [vmem:[%s6747_s11 + $0x8] sm:$0xff] }
 0x1e0   :  { %v282_v40 = vrot.slane %v281_v36, 2  ;;  %v297_v41 = vadd.f32 %v296_v37, %v289_v33  ;;  %v883_v37 = vld [vmem:[%s6747_s11 + $0x18] sm:$0xff] }
 0x1e1   :  { %v277_v42 = vadd.f32 %v276_v38, %v275_v34  ;;  %v292_v43 = vrot.slane %v291_v39, 2 }
 0x1e2   :  { %v283_v44 = vadd.f32 %v282_v40, %v281_v36  ;;  %v298_v45 = vrot.slane %v297_v41, 2  ;;  %v889_v36 = vld [vmem:[%s6747_s11 + $0x48] sm:$0xff]  ;;  %v880_v40 = vld [vmem:[%s6747_s11] sm:$0xff] }
 0x1e3   :  { %v278_v46 = vrot.slane %v277_v42, 1  ;;  %v293_v47 = vadd.f32 %v292_v43, %v291_v39  ;;  %v3203_v38 = vpack.c.bf16 %v889_v36, %v881_v35  ;;  %v891_v39 = vld [vmem:[%s6747_s11 + $0x58] sm:$0xff]  ;;  %v961_v35 = vld [vmem:[%s6747_s11 + $0x288] sm:$0xff] }
 0x1e4   :  { %v284_v48 = vrot.slane %v283_v44, 1  ;;  %v299_v49 = vadd.f32 %v298_v45, %v297_v41  ;;  %v888_v41 = vld [vmem:[%s6747_s11 + $0x40] sm:$0xff]  ;;  %v890_v45 = vld [vmem:[%s6747_s11 + $0x50] sm:$0xff]  ;;  %v969_v36 = vld [vmem:[%s6747_s11 + $0x2c8] sm:$0xff] }
 0x1e5   :  { %v279_v50 = vadd.f32 %v278_v46, %v277_v42  ;;  %v294_v51 = vrot.slane %v293_v47, 1  ;;  %v3331_v42 = vpack.c.bf16 %v891_v39, %v883_v37  ;;  %v3205_v43 = vpack.c.bf16 %v888_v41, %v880_v40  ;;  %3204 = vmatprep.subr.bf16.mxu0 %v3203_v38  ;;  %v963_v37 = vld [vmem:[%s6747_s11 + $0x298] sm:$0xff]  ;;  %v960_v40 = vld [vmem:[%s6747_s11 + $0x280] sm:$0xff] }
 0x1e6   :  { %v285_v52 = vadd.f32 %v284_v48, %v283_v44  ;;  %v300_v53 = vrot.slane %v299_v49, 1  ;;  %v882_v44 = vld [vmem:[%s6747_s11 + $0x10] sm:$0xff]  ;;  %v905_v48 = vld [vmem:[%s6747_s11 + $0xc8] sm:$0xff]  ;;  %v3223_v38 = vpack.c.bf16 %v969_v36, %v961_v35  ;;  %v971_v39 = vld [vmem:[%s6747_s11 + $0x2d8] sm:$0xff] }
 0x1e7   :  { %v286_v54 = vmul.f32 0.16666667, %v279_v50  ;;  %v295_v55 = vadd.f32 %v294_v51, %v293_v47  ;;  %v3333_v46 = vpack.c.bf16 %v890_v45, %v882_v44  ;;  %3332 = vmatprep.subr.bf16.mxu1 %v3331_v42  ;;  %v897_v47 = vld [vmem:[%s6747_s11 + $0x88] sm:$0xff]  ;;  %v907_v51 = vld [vmem:[%s6747_s11 + $0xd8] sm:$0xff]  ;;  %v968_v41 = vld [vmem:[%s6747_s11 + $0x2c0] sm:$0xff]  ;;  %v3351_v42 = vpack.c.bf16 %v971_v39, %v963_v37 }
 0x1e8   :  { %v287_v56 = vmul.f32 0.16666667, %v285_v52  ;;  %v301_v57 = vadd.f32 %v300_v53, %v299_v49  ;;  %v899_v49 = vld [vmem:[%s6747_s11 + $0x98] sm:$0xff]  ;;  %v3207_v50 = vpack.c.bf16 %v905_v48, %v897_v47  ;;  %v896_v52 = vld [vmem:[%s6747_s11 + $0x80] sm:$0xff]  ;;  %v962_v44 = vld [vmem:[%s6747_s11 + $0x290] sm:$0xff] }
 0x1e9   :  { %v302_v58 = vmul.f32 0.16666667, %v295_v55  ;;  %v304_v59 = vmul.f32 %v286_v54, %v286_v54  ;;  %v904_v53 = vld [vmem:[%s6747_s11 + $0xc0] sm:$0xff]  ;;  %v970_v45 = vld [vmem:[%s6747_s11 + $0x2d0] sm:$0xff]  ;;  %v977_v47 = vld [vmem:[%s6747_s11 + $0x308] sm:$0xff] }
 0x1ea   :  { %v303_v60 = vmul.f32 0.16666667, %v301_v57  ;;  %v305_v61 = vmul.f32 %v287_v56, %v287_v56  ;;  %v3209_v55 = vpack.c.bf16 %v904_v53, %v896_v52  ;;  %v906_v57 = vld [vmem:[%s6747_s11 + $0xd0] sm:$0xff]  ;;  %v985_v48 = vld [vmem:[%s6747_s11 + $0x348] sm:$0xff]  ;;  %v976_v52 = vld [vmem:[%s6747_s11 + $0x300] sm:$0xff] }
 0x1eb   :  { %v306_v62 = vsub.f32 %v302_v58, %v304_v59  ;;  %v913_v59 = vld [vmem:[%s6747_s11 + $0x108] sm:$0xff]  ;;  %v984_v53 = vld [vmem:[%s6747_s11 + $0x340] sm:$0xff]  ;;  %v1043_v37 = vld [vmem:[%s6747_s11 + $0x518] sm:$0xff] }
 0x1ec   :  { %v307_v63 = vsub.f32 %v303_v60, %v305_v61  ;;  %v921_v60 = vld [vmem:[%s6747_s11 + $0x148] sm:$0xff]  ;;  %v915_v61 = vld [vmem:[%s6747_s11 + $0x118] sm:$0xff] }
 0x1ed   :  { %v309_v1 = vadd.f32 0.8, %v306_v62  ;;  %v3211_v62 = vpack.c.bf16 %v921_v60, %v913_v59  ;;  %v993_v59 = vld [vmem:[%s6747_s11 + $0x388] sm:$0xff]  ;;  %v1051_v39 = vld [vmem:[%s6747_s11 + $0x558] sm:$0xff] }
 0x1ee   :  { %v310_v2 = vadd.f32 0.8, %v307_v63  ;;  %v923_v63 = vld [vmem:[%s6747_s11 + $0x158] sm:$0xff]  ;;  %v1001_v60 = vld [vmem:[%s6747_s11 + $0x3c8] sm:$0xff] }
 0x1ef   :  { %3863 = vrsqrt.f32 %v309_v1  ;;  %v912_v1 = vld [vmem:[%s6747_s11 + $0x100] sm:$0xff]  ;;  %v3339_v3 = vpack.c.bf16 %v923_v63, %v915_v61  ;;  %v995_v61 = vld [vmem:[%s6747_s11 + $0x398] sm:$0xff]  ;;  %v1041_v35 = vld [vmem:[%s6747_s11 + $0x508] sm:$0xff] }
 0x1f0   :  { %3865 = vrsqrt.f32 %v310_v2  ;;  %v920_v2 = vld [vmem:[%s6747_s11 + $0x140] sm:$0xff]  ;;  %v1003_v63 = vld [vmem:[%s6747_s11 + $0x3d8] sm:$0xff]  ;;  %v1049_v36 = vld [vmem:[%s6747_s11 + $0x548] sm:$0xff] }
 0x1f1   :  { %v3213_v4 = vpack.c.bf16 %v920_v2, %v912_v1  ;;  %v992_v1 = vld [vmem:[%s6747_s11 + $0x380] sm:$0xff] }
 0x1f2   :  { %v1000_v2 = vld [vmem:[%s6747_s11 + $0x3c0] sm:$0xff] }
 0x1f9   :  { %v3864_v0 = vpop.eup %3863 }
 0x1fa   :  { %v3866_v7 = vpop.eup %3865 }
 0x1fb   :  { %v315_v8 = vcombine.low %v3864_v0, %v3866_v7  ;;  %v922_v0 = vld [vmem:[%s6747_s11 + $0x150] sm:$0xff] }
 0x1fc   :  { %v3341_v7 = vpack.c.bf16 %v922_v0, %v914_v5  ;;  %v994_v5 = vld [vmem:[%s6747_s11 + $0x390] sm:$0xff] }
 0x1fd   :  { %v322_v9 = vrot.slane %v315_v8, %v4548_v6  ;;  %v929_v8 = vld [vmem:[%s6747_s11 + $0x188] sm:$0xff]  ;;  %v1002_v0 = vld [vmem:[%s6747_s11 + $0x3d0] sm:$0xff] }
 0x1ff   :  { %v329_v11 = vrot.slane %v322_v9, %v4548_v6  ;;  %v937_v9 = vld [vmem:[%s6747_s11 + $0x1c8] sm:$0xff] }
 0x201   :  { %v331_v12 = vmul.f32 %v329_v11, %v308_v10  ;;  %v931_v10 = vld [vmem:[%s6747_s11 + $0x198] sm:$0xff]  ;;  %v3215_v11 = vpack.c.bf16 %v937_v9, %v929_v8  ;;  %v1009_v8 = vld [vmem:[%s6747_s11 + $0x408] sm:$0xff] }
 0x202   :  { %v1017_v9 = vld [vmem:[%s6747_s11 + $0x448] sm:$0xff] }
 0x203   :  { %v337_v13 = vrot.slane %v331_v12, %v4532_v19  ;;  %v341_v14 = vrot.slane %v331_v12, %v4538_v21  ;;  %v939_v12 = vld [vmem:[%s6747_s11 + $0x1d8] sm:$0xff] }
 0x205   :  { %v344_v15 = vmul.f32 %v337_v13, %v286_v54  ;;  %v345_v16 = vmul.f32 %v341_v14, %v287_v56  ;;  %v366_v17 = vmul.f32 %v341_v14, %v268_v27  ;;  %v365_v20 = vmul.f32 %v337_v13, %v266_v25  ;;  %v898_v56 = vld [vmem:[%s6747_s11 + $0x90] sm:$0xff]  ;;  %v928_v13 = vld [vmem:[%s6747_s11 + $0x180] sm:$0xff] }
 0x206   :  { %v3335_v54 = vpack.c.bf16 %v907_v51, %v899_v49  ;;  %v3337_v58 = vpack.c.bf16 %v906_v57, %v898_v56  ;;  %v936_v14 = vld [vmem:[%s6747_s11 + $0x1c0] sm:$0xff]  ;;  %v979_v49 = vld [vmem:[%s6747_s11 + $0x318] sm:$0xff]  ;;  %v978_v56 = vld [vmem:[%s6747_s11 + $0x310] sm:$0xff] }
 0x207   :  { %v348_v22 = vcombine.low %v344_v15, %v345_v16  ;;  %v3343_v15 = vpack.c.bf16 %v939_v12, %v931_v10  ;;  %v3217_v16 = vpack.c.bf16 %v936_v14, %v928_v13  ;;  %v987_v51 = vld [vmem:[%s6747_s11 + $0x358] sm:$0xff]  ;;  %v986_v57 = vld [vmem:[%s6747_s11 + $0x350] sm:$0xff]  ;;  %v1008_v13 = vld [vmem:[%s6747_s11 + $0x400] sm:$0xff] }
 0x208   :  { %v1011_v10 = vld [vmem:[%s6747_s11 + $0x418] sm:$0xff]  ;;  %v1016_v14 = vld [vmem:[%s6747_s11 + $0x440] sm:$0xff] }
 0x209   :  { %v355_v23 = vrot.slane %v348_v22, %v4548_v6  ;;  %v1019_v12 = vld [vmem:[%s6747_s11 + $0x458] sm:$0xff] }
 0x20b   :  { %v362_v26 = vrot.slane %v355_v23, %v4548_v6  ;;  %v945_v23 = vld [vmem:[%s6747_s11 + $0x208] sm:$0xff] }
 0x20d   :  { %v364_v28 = vsub.f32 %v332_v24, %v362_v26  ;;  %v953_v24 = vld [vmem:[%s6747_s11 + $0x248] sm:$0xff]  ;;  %v947_v26 = vld [vmem:[%s6747_s11 + $0x218] sm:$0xff] }
 0x20f   :  { %v375_v29 = vrot.slane %v364_v28, %v4538_v21  ;;  %v371_v30 = vrot.slane %v364_v28, %v4532_v19  ;;  %v3219_v28 = vpack.c.bf16 %v953_v24, %v945_v23  ;;  %v1025_v23 = vld [vmem:[%s6747_s11 + $0x488] sm:$0xff] }
 0x210   :  { %v1033_v24 = vld [vmem:[%s6747_s11 + $0x4c8] sm:$0xff] }
 0x211   :  { %v379_v31 = vadd.f32 %v375_v29, %v366_v17  ;;  %v378_v32 = vadd.f32 %v371_v30, %v365_v20  ;;  %v930_v17 = vld [vmem:[%s6747_s11 + $0x190] sm:$0xff]  ;;  %v955_v29 = vld [vmem:[%s6747_s11 + $0x258] sm:$0xff]  ;;  %v944_v30 = vld [vmem:[%s6747_s11 + $0x200] sm:$0xff] }
 0x212   :  { %v938_v20 = vld [vmem:[%s6747_s11 + $0x1d0] sm:$0xff] }
 0x213   :  { %v381_v33 = vmul.f32 0.2, %v379_v31  ;;  %v380_v34 = vmul.f32 0.2, %v378_v32  ;;  %v3345_v22 = vpack.c.bf16 %v938_v20, %v930_v17  ;;  %v1010_v17 = vld [vmem:[%s6747_s11 + $0x410] sm:$0xff] }
 0x214   :  { %v1018_v20 = vld [vmem:[%s6747_s11 + $0x450] sm:$0xff] }
 0x215   :  { %v383_v27 = vmax.f32 %v379_v31, %v381_v33  ;;  %v382_v25 = vmax.f32 %v378_v32, %v380_v34  ;;  %v952_v31 = vld [vmem:[%s6747_s11 + $0x240] sm:$0xff]  ;;  %v3347_v32 = vpack.c.bf16 %v955_v29, %v947_v26  ;;  %v946_v34 = vld [vmem:[%s6747_s11 + $0x210] sm:$0xff]  ;;  %v1027_v26 = vld [vmem:[%s6747_s11 + $0x498] sm:$0xff] }
 0x216   :  { %v3221_v33 = vpack.c.bf16 %v952_v31, %v944_v30  ;;  %v1035_v29 = vld [vmem:[%s6747_s11 + $0x4d8] sm:$0xff]  ;;  %v1024_v30 = vld [vmem:[%s6747_s11 + $0x480] sm:$0xff] }
 0x217   :  { %598 = vmatprep.mubr.f32.mxu0 %v383_v27  ;;  %669 = vmatprep.mubr.f32.mxu1 %v383_v27  ;;  %v954_v27 = vld [vmem:[%s6747_s11 + $0x250] sm:$0xff]  ;;  %v1032_v31 = vld [vmem:[%s6747_s11 + $0x4c0] sm:$0xff] }
 0x218   :  { %599 = vmatmul.mubr.f32.vlgmr.msra.gmra.mrb[2].mxu0 %v382_v25  ;;  %670 = vmatmul.mubr.f32.vlgmr.msra.gmra.mrb[2].mxu1 %v382_v25  ;;  %v3349_v25 = vpack.c.bf16 %v954_v27, %v946_v34  ;;  %v1026_v34 = vld [vmem:[%s6747_s11 + $0x490] sm:$0xff] }
 0x219   :  { %3206 = vmatpush1.bf16.msra.mxu0 %v3205_v43  ;;  %3334 = vmatpush1.bf16.msra.mxu1 %v3333_v46  ;;  %v3225_v43 = vpack.c.bf16 %v968_v41, %v960_v40  ;;  %v3353_v46 = vpack.c.bf16 %v970_v45, %v962_v44  ;;  %v1034_v27 = vld [vmem:[%s6747_s11 + $0x4d0] sm:$0xff]  ;;  %v1040_v40 = vld [vmem:[%s6747_s11 + $0x500] sm:$0xff] }
 0x21a   :  { %3208 = vmatprep.subr.bf16.mxu0 %v3207_v50  ;;  %3336 = vmatprep.subr.bf16.mxu1 %v3335_v54  ;;  %v3227_v50 = vpack.c.bf16 %v985_v48, %v977_v47  ;;  %v3355_v54 = vpack.c.bf16 %v987_v51, %v979_v49  ;;  %v1048_v41 = vld [vmem:[%s6747_s11 + $0x540] sm:$0xff]  ;;  %v1042_v44 = vld [vmem:[%s6747_s11 + $0x510] sm:$0xff]  ;;  %v1057_v47 = vld [vmem:[%s6747_s11 + $0x588] sm:$0xff] }
 0x21b   :  { %v1050_v45 = vld [vmem:[%s6747_s11 + $0x550] sm:$0xff]  ;;  %v1065_v48 = vld [vmem:[%s6747_s11 + $0x5c8] sm:$0xff]  ;;  %v1059_v49 = vld [vmem:[%s6747_s11 + $0x598] sm:$0xff] }
 0x21c   :  { %v1067_v51 = vld [vmem:[%s6747_s11 + $0x5d8] sm:$0xff] }
 0x21d   :  { %3210 = vmatpush1.bf16.msra.mxu0 %v3209_v55  ;;  %3338 = vmatpush1.bf16.msra.mxu1 %v3337_v58  ;;  %v3229_v55 = vpack.c.bf16 %v984_v53, %v976_v52  ;;  %v3357_v58 = vpack.c.bf16 %v986_v57, %v978_v56  ;;  %v1056_v52 = vld [vmem:[%s6747_s11 + $0x580] sm:$0xff]  ;;  %v1058_v56 = vld [vmem:[%s6747_s11 + $0x590] sm:$0xff] }
 0x21e   :  { %3212 = vmatprep.subr.bf16.mxu0 %v3211_v62  ;;  %3340 = vmatprep.subr.bf16.mxu1 %v3339_v3  ;;  %v3231_v62 = vpack.c.bf16 %v1001_v60, %v993_v59  ;;  %v3359_v3 = vpack.c.bf16 %v1003_v63, %v995_v61  ;;  %v1064_v53 = vld [vmem:[%s6747_s11 + $0x5c0] sm:$0xff]  ;;  %v1066_v57 = vld [vmem:[%s6747_s11 + $0x5d0] sm:$0xff]  ;;  %v1073_v59 = vld [vmem:[%s6747_s11 + $0x608] sm:$0xff] }
 0x21f   :  { %v1081_v60 = vld [vmem:[%s6747_s11 + $0x648] sm:$0xff]  ;;  %v1075_v61 = vld [vmem:[%s6747_s11 + $0x618] sm:$0xff] }
 0x220   :  { %v1083_v63 = vld [vmem:[%s6747_s11 + $0x658] sm:$0xff] }
 0x221   :  { %3214 = vmatpush1.bf16.msra.mxu0 %v3213_v4  ;;  %3342 = vmatpush1.bf16.msra.mxu1 %v3341_v7  ;;  %v3233_v4 = vpack.c.bf16 %v1000_v2, %v992_v1  ;;  %v3361_v7 = vpack.c.bf16 %v1002_v0, %v994_v5  ;;  %v1072_v1 = vld [vmem:[%s6747_s11 + $0x600] sm:$0xff]  ;;  %v1074_v5 = vld [vmem:[%s6747_s11 + $0x610] sm:$0xff] }
 0x222   :  { %3216 = vmatprep.subr.bf16.mxu0 %v3215_v11  ;;  %3344 = vmatprep.subr.bf16.mxu1 %v3343_v15  ;;  %v3235_v11 = vpack.c.bf16 %v1017_v9, %v1009_v8  ;;  %v3363_v15 = vpack.c.bf16 %v1019_v12, %v1011_v10  ;;  %v1080_v2 = vld [vmem:[%s6747_s11 + $0x640] sm:$0xff]  ;;  %v1082_v0 = vld [vmem:[%s6747_s11 + $0x650] sm:$0xff]  ;;  %v1089_v8 = vld [vmem:[%s6747_s11 + $0x688] sm:$0xff] }
 0x223   :  { %v1097_v9 = vld [vmem:[%s6747_s11 + $0x6c8] sm:$0xff]  ;;  %v1091_v10 = vld [vmem:[%s6747_s11 + $0x698] sm:$0xff] }
 0x224   :  { %v1099_v12 = vld [vmem:[%s6747_s11 + $0x6d8] sm:$0xff] }
 0x225   :  { %3218 = vmatpush1.bf16.msra.mxu0 %v3217_v16  ;;  %3346 = vmatpush1.bf16.msra.mxu1 %v3345_v22  ;;  %v3237_v16 = vpack.c.bf16 %v1016_v14, %v1008_v13  ;;  %v3365_v22 = vpack.c.bf16 %v1018_v20, %v1010_v17  ;;  %v1088_v13 = vld [vmem:[%s6747_s11 + $0x680] sm:$0xff]  ;;  %v1090_v17 = vld [vmem:[%s6747_s11 + $0x690] sm:$0xff] }
 0x226   :  { %3220 = vmatprep.subr.bf16.mxu0 %v3219_v28  ;;  %3348 = vmatprep.subr.bf16.mxu1 %v3347_v32  ;;  %v3239_v28 = vpack.c.bf16 %v1033_v24, %v1025_v23  ;;  %v3367_v32 = vpack.c.bf16 %v1035_v29, %v1027_v26  ;;  %v1096_v14 = vld [vmem:[%s6747_s11 + $0x6c0] sm:$0xff]  ;;  %v1098_v20 = vld [vmem:[%s6747_s11 + $0x6d0] sm:$0xff]  ;;  %v1105_v23 = vld [vmem:[%s6747_s11 + $0x708] sm:$0xff] }
 0x227   :  { %v1113_v24 = vld [vmem:[%s6747_s11 + $0x748] sm:$0xff]  ;;  %v1107_v26 = vld [vmem:[%s6747_s11 + $0x718] sm:$0xff] }
 0x228   :  { %v1115_v29 = vld [vmem:[%s6747_s11 + $0x758] sm:$0xff] }
 0x229   :  { %3222 = vmatpush1.bf16.msra.mxu0 %v3221_v33  ;;  %3350 = vmatpush1.bf16.msra.mxu1 %v3349_v25  ;;  %v3241_v33 = vpack.c.bf16 %v1032_v31, %v1024_v30  ;;  %v3369_v25 = vpack.c.bf16 %v1034_v27, %v1026_v34  ;;  %v1104_v30 = vld [vmem:[%s6747_s11 + $0x700] sm:$0xff]  ;;  %v1106_v34 = vld [vmem:[%s6747_s11 + $0x710] sm:$0xff] }
 0x22a   :  { %3224 = vmatprep.subr.bf16.mxu0 %v3223_v38  ;;  %3352 = vmatprep.subr.bf16.mxu1 %v3351_v42  ;;  %v3243_v38 = vpack.c.bf16 %v1049_v36, %v1041_v35  ;;  %v3371_v42 = vpack.c.bf16 %v1051_v39, %v1043_v37  ;;  %v1112_v31 = vld [vmem:[%s6747_s11 + $0x740] sm:$0xff]  ;;  %v1114_v27 = vld [vmem:[%s6747_s11 + $0x750] sm:$0xff]  ;;  %v1121_v35 = vld [vmem:[%s6747_s11 + $0x788] sm:$0xff] }
 0x22b   :  { %v1129_v36 = vld [vmem:[%s6747_s11 + $0x7c8] sm:$0xff]  ;;  %v1123_v37 = vld [vmem:[%s6747_s11 + $0x798] sm:$0xff] }
 0x22c   :  { %v1131_v39 = vld [vmem:[%s6747_s11 + $0x7d8] sm:$0xff] }
 0x22d   :  { %3226 = vmatpush1.bf16.msra.mxu0 %v3225_v43  ;;  %3354 = vmatpush1.bf16.msra.mxu1 %v3353_v46  ;;  %v3245_v43 = vpack.c.bf16 %v1048_v41, %v1040_v40  ;;  %v3373_v46 = vpack.c.bf16 %v1050_v45, %v1042_v44  ;;  %v1120_v40 = vld [vmem:[%s6747_s11 + $0x780] sm:$0xff]  ;;  %v1122_v44 = vld [vmem:[%s6747_s11 + $0x790] sm:$0xff] }
 0x22e   :  { %3228 = vmatprep.subr.bf16.mxu0 %v3227_v50  ;;  %3356 = vmatprep.subr.bf16.mxu1 %v3355_v54  ;;  %v3247_v50 = vpack.c.bf16 %v1065_v48, %v1057_v47  ;;  %v3375_v54 = vpack.c.bf16 %v1067_v51, %v1059_v49  ;;  %v1128_v41 = vld [vmem:[%s6747_s11 + $0x7c0] sm:$0xff]  ;;  %v1130_v45 = vld [vmem:[%s6747_s11 + $0x7d0] sm:$0xff]  ;;  %v1137_v47 = vld [vmem:[%s6747_s11 + $0x808] sm:$0xff] }
 0x22f   :  { %v1145_v48 = vld [vmem:[%s6747_s11 + $0x848] sm:$0xff]  ;;  %v1139_v49 = vld [vmem:[%s6747_s11 + $0x818] sm:$0xff] }
 0x230   :  { %v1147_v51 = vld [vmem:[%s6747_s11 + $0x858] sm:$0xff] }
 0x231   :  { %3230 = vmatpush1.bf16.msra.mxu0 %v3229_v55  ;;  %3358 = vmatpush1.bf16.msra.mxu1 %v3357_v58  ;;  %v3249_v55 = vpack.c.bf16 %v1064_v53, %v1056_v52  ;;  %v3377_v58 = vpack.c.bf16 %v1066_v57, %v1058_v56  ;;  %v3395_v52 = vpack.c.bf16 %v1147_v51, %v1139_v49  ;;  %v4961_v53 = vsub.s32 2, %v4529_v18 }
 0x232   :  { %3232 = vmatprep.subr.bf16.mxu0 %v3231_v62  ;;  %3360 = vmatprep.subr.bf16.mxu1 %v3359_v3  ;;  %v3251_v62 = vpack.c.bf16 %v1081_v60, %v1073_v59  ;;  %v3379_v3 = vpack.c.bf16 %v1083_v63, %v1075_v61 }
 0x235   :  { %3234 = vmatpush1.bf16.msra.mxu0 %v3233_v4  ;;  %3362 = vmatpush1.bf16.msra.mxu1 %v3361_v7  ;;  %v3253_v4 = vpack.c.bf16 %v1080_v2, %v1072_v1  ;;  %v3381_v7 = vpack.c.bf16 %v1082_v0, %v1074_v5 }
 0x236   :  { %3236 = vmatprep.subr.bf16.mxu0 %v3235_v11  ;;  %3364 = vmatprep.subr.bf16.mxu1 %v3363_v15  ;;  %v3255_v11 = vpack.c.bf16 %v1097_v9, %v1089_v8  ;;  %v3383_v15 = vpack.c.bf16 %v1099_v12, %v1091_v10 }
 0x239   :  { %3238 = vmatpush1.bf16.msra.mxu0 %v3237_v16  ;;  %3366 = vmatpush1.bf16.msra.mxu1 %v3365_v22  ;;  %v3257_v16 = vpack.c.bf16 %v1096_v14, %v1088_v13  ;;  %v3385_v22 = vpack.c.bf16 %v1098_v20, %v1090_v17 }
 0x23a   :  { %3240 = vmatprep.subr.bf16.mxu0 %v3239_v28  ;;  %3368 = vmatprep.subr.bf16.mxu1 %v3367_v32  ;;  %v3259_v28 = vpack.c.bf16 %v1113_v24, %v1105_v23  ;;  %v3387_v32 = vpack.c.bf16 %v1115_v29, %v1107_v26 }
 0x23d   :  { %3242 = vmatpush1.bf16.msra.mxu0 %v3241_v33  ;;  %3370 = vmatpush1.bf16.msra.mxu1 %v3369_v25  ;;  %v3261_v33 = vpack.c.bf16 %v1112_v31, %v1104_v30  ;;  %v3389_v25 = vpack.c.bf16 %v1114_v27, %v1106_v34 }
 0x23e   :  { %3244 = vmatprep.subr.bf16.mxu0 %v3243_v38  ;;  %3372 = vmatprep.subr.bf16.mxu1 %v3371_v42  ;;  %v3263_v38 = vpack.c.bf16 %v1129_v36, %v1121_v35  ;;  %v3391_v42 = vpack.c.bf16 %v1131_v39, %v1123_v37 }
 0x241   :  { %3246 = vmatpush1.bf16.msra.mxu0 %v3245_v43  ;;  %3374 = vmatpush1.bf16.msra.mxu1 %v3373_v46  ;;  %v3265_v43 = vpack.c.bf16 %v1128_v41, %v1120_v40  ;;  %v3393_v46 = vpack.c.bf16 %v1130_v45, %v1122_v44 }
 0x242   :  { %3248 = vmatprep.subr.bf16.mxu0 %v3247_v50  ;;  %3376 = vmatprep.subr.bf16.mxu1 %v3375_v54  ;;  %v3267_v50 = vpack.c.bf16 %v1145_v48, %v1137_v47  ;;  %v512_v54 = vld [vmem:[%s6748_s8] sm:$0xf] }
 0x243   :  { %v517_v56 = vrot.slane %v512_v54, %v4532_v19  ;;  %v525_v57 = vrot.slane %v512_v54, %v4961_v53 }
 0x245   :  { %3250 = vmatpush1.bf16.msra.mxu0 %v3249_v55  ;;  %3378 = vmatpush1.bf16.msra.mxu1 %v3377_v58  ;;  %v4967_v55 = vsub.s32 3, %v4529_v18  ;;  %v521_v58 = vrot.slane %v512_v54, %v4538_v21 }
 0x246   :  { %3252 = vmatprep.subr.bf16.mxu0 %v3251_v62  ;;  %3380 = vmatprep.subr.bf16.mxu1 %v3379_v3 }
 0x247   :  { %v529_v59 = vrot.slane %v512_v54, %v4967_v55 }
 0x249   :  { %3254 = vmatpush1.bf16.msra.mxu0 %v3253_v4  ;;  %3382 = vmatpush1.bf16.msra.mxu1 %v3381_v7 }
 0x24a   :  { %3256 = vmatprep.subr.bf16.mxu0 %v3255_v11  ;;  %3384 = vmatprep.subr.bf16.mxu1 %v3383_v15 }
 0x24d   :  { %3258 = vmatpush1.bf16.msra.mxu0 %v3257_v16  ;;  %3386 = vmatpush1.bf16.msra.mxu1 %v3385_v22 }
 0x24e   :  { %3260 = vmatprep.subr.bf16.mxu0 %v3259_v28  ;;  %3388 = vmatprep.subr.bf16.mxu1 %v3387_v32 }
 0x251   :  { %3262 = vmatpush1.bf16.msra.mxu0 %v3261_v33  ;;  %3390 = vmatpush1.bf16.msra.mxu1 %v3389_v25 }
 0x252   :  { %3264 = vmatprep.subr.bf16.mxu0 %v3263_v38  ;;  %3392 = vmatprep.subr.bf16.mxu1 %v3391_v42 }
 0x255   :  { %3266 = vmatpush1.bf16.msra.mxu0 %v3265_v43  ;;  %3394 = vmatpush1.bf16.msra.mxu1 %v3393_v46 }
 0x256   :  { %3268 = vmatprep.subr.bf16.mxu0 %v3267_v50  ;;  %3396 = vmatprep.subr.bf16.mxu1 %v3395_v52 }
 0x2eb   :  { %v600_v60 = vpop.f32.mrb[2].mxu0  ;;  %v671_v61 = vpop.f32.mrb[2].mxu1 }
 0x2ec   :  { %v4973_v62 = vadd.f32 %v600_v60, %v517_v56  ;;  %v4975_v63 = vadd.f32 %v671_v61, %v525_v57  ;;  %v602_v1 = vpop.f32.mrb[3].mxu0  ;;  %v673_v2 = vpop.f32.mrb[3].mxu1 }
 0x2ed   :  { %v4977_v3 = vadd.f32 %v602_v1, %v521_v58  ;;  %v4979_v4 = vadd.f32 %v673_v2, %v529_v59 }
 0x2ee   :  { %v676_v5 = vsel %vm58_vm1, %v4973_v62, 0.0  ;;  %v678_v0 = vsel %vm58_vm1, %v4975_v63, 0.0 }
 0x2ef   :  { %v680_v7 = vrot.slane %v676_v5, 4  ;;  %v708_v8 = vmul.f32 %v676_v5, %v4973_v62  ;;  %v692_v9 = vrot.slane %v678_v0, 4  ;;  %v710_v10 = vmul.f32 %v678_v0, %v4975_v63 }
 0x2f0   :  { %v677_v11 = vsel %vm58_vm1, %v4977_v3, 0.0  ;;  %v679_v12 = vsel %vm58_vm1, %v4979_v4, 0.0 }
 0x2f1   :  { %v681_v13 = vadd.f32 %v680_v7, %v676_v5  ;;  %v712_v14 = vrot.slane %v708_v8, 4  ;;  %v693_v15 = vadd.f32 %v692_v9, %v678_v0  ;;  %v724_v16 = vrot.slane %v710_v10, 4 }
 0x2f2   :  { %v686_v17 = vrot.slane %v677_v11, 4  ;;  %v709_v20 = vmul.f32 %v677_v11, %v4977_v3  ;;  %v698_v22 = vrot.slane %v679_v12, 4  ;;  %v711_v23 = vmul.f32 %v679_v12, %v4979_v4 }
 0x2f3   :  { %v682_v24 = vrot.slane %v681_v13, 2  ;;  %v713_v26 = vadd.f32 %v712_v14, %v708_v8  ;;  %v694_v28 = vrot.slane %v693_v15, 2  ;;  %v725_v29 = vadd.f32 %v724_v16, %v710_v10 }
 0x2f4   :  { %v687_v30 = vadd.f32 %v686_v17, %v677_v11  ;;  %v718_v31 = vrot.slane %v709_v20, 4  ;;  %v699_v32 = vadd.f32 %v698_v22, %v679_v12  ;;  %v730_v33 = vrot.slane %v711_v23, 4 }
 0x2f5   :  { %v683_v34 = vadd.f32 %v682_v24, %v681_v13  ;;  %v714_v27 = vrot.slane %v713_v26, 2  ;;  %v695_v25 = vadd.f32 %v694_v28, %v693_v15  ;;  %v726_v35 = vrot.slane %v725_v29, 2 }
 0x2f6   :  { %v688_v36 = vrot.slane %v687_v30, 2  ;;  %v719_v37 = vadd.f32 %v718_v31, %v709_v20  ;;  %v700_v38 = vrot.slane %v699_v32, 2  ;;  %v731_v39 = vadd.f32 %v730_v33, %v711_v23 }
 0x2f7   :  { %v684_v40 = vrot.slane %v683_v34, 1  ;;  %v715_v41 = vadd.f32 %v714_v27, %v713_v26  ;;  %v696_v42 = vrot.slane %v695_v25, 1  ;;  %v727_v43 = vadd.f32 %v726_v35, %v725_v29 }
 0x2f8   :  { %v689_v44 = vadd.f32 %v688_v36, %v687_v30  ;;  %v720_v45 = vrot.slane %v719_v37, 2  ;;  %v701_v46 = vadd.f32 %v700_v38, %v699_v32  ;;  %v732_v47 = vrot.slane %v731_v39, 2 }
 0x2f9   :  { %v685_v48 = vadd.f32 %v684_v40, %v683_v34  ;;  %v716_v49 = vrot.slane %v715_v41, 1  ;;  %v697_v50 = vadd.f32 %v696_v42, %v695_v25  ;;  %v728_v51 = vrot.slane %v727_v43, 1 }
 0x2fa   :  { %v690_v52 = vrot.slane %v689_v44, 1  ;;  %v721_v54 = vadd.f32 %v720_v45, %v719_v37  ;;  %v702_v56 = vrot.slane %v701_v46, 1  ;;  %v733_v57 = vadd.f32 %v732_v47, %v731_v39  ;;  %v748_v39 = vld [vmem:[%s6749_s9] sm:$0xf] }
 0x2fb   :  { %v704_v58 = vmul.f32 0.16666667, %v685_v48  ;;  %v717_v59 = vadd.f32 %v716_v49, %v715_v41  ;;  %v706_v60 = vmul.f32 0.16666667, %v697_v50  ;;  %v729_v61 = vadd.f32 %v728_v51, %v727_v43 }
 0x2fc   :  { %v691_v1 = vadd.f32 %v690_v52, %v689_v44  ;;  %v722_v2 = vrot.slane %v721_v54, 1  ;;  %v703_v5 = vadd.f32 %v702_v56, %v701_v46  ;;  %v734_v0 = vrot.slane %v733_v57, 1 }
 0x2fd   :  { %v736_v7 = vmul.f32 0.16666667, %v717_v59  ;;  %v740_v8 = vmul.f32 %v704_v58, %v704_v58  ;;  %v738_v9 = vmul.f32 0.16666667, %v729_v61  ;;  %v742_v10 = vmul.f32 %v706_v60, %v706_v60 }
 0x2fe   :  { %v705_v11 = vmul.f32 0.16666667, %v691_v1  ;;  %v723_v12 = vadd.f32 %v722_v2, %v721_v54  ;;  %v707_v13 = vmul.f32 0.16666667, %v703_v5  ;;  %v735_v14 = vadd.f32 %v734_v0, %v733_v57 }
 0x2ff   :  { %v744_v15 = vsub.f32 %v736_v7, %v740_v8  ;;  %v746_v16 = vsub.f32 %v738_v9, %v742_v10  ;;  %v1136_v8 = vld [vmem:[%s6747_s11 + $0x800] sm:$0xff] }
 0x300   :  { %v737_v17 = vmul.f32 0.16666667, %v723_v12  ;;  %v741_v20 = vmul.f32 %v705_v11, %v705_v11  ;;  %v739_v22 = vmul.f32 0.16666667, %v735_v14  ;;  %v743_v23 = vmul.f32 %v707_v13, %v707_v13  ;;  %v1144_v10 = vld [vmem:[%s6747_s11 + $0x840] sm:$0xff]  ;;  %v1146_v12 = vld [vmem:[%s6747_s11 + $0x850] sm:$0xff] }
 0x301   :  { %v749_v24 = vadd.f32 0.8, %v744_v15  ;;  %v751_v26 = vadd.f32 0.8, %v746_v16  ;;  %v1153_v15 = vld [vmem:[%s6747_s11 + $0x888] sm:$0xff] }
 0x302   :  { %v745_v28 = vsub.f32 %v737_v17, %v741_v20  ;;  %v747_v29 = vsub.f32 %v739_v22, %v743_v23  ;;  %v1161_v17 = vld [vmem:[%s6747_s11 + $0x8c8] sm:$0xff]  ;;  %v1155_v20 = vld [vmem:[%s6747_s11 + $0x898] sm:$0xff] }
 0x303   :  { %3867 = vrsqrt.f32 %v749_v24  ;;  %v1163_v22 = vld [vmem:[%s6747_s11 + $0x8d8] sm:$0xff] }
 0x304   :  { %v750_v30 = vadd.f32 0.8, %v745_v28  ;;  %v752_v31 = vadd.f32 0.8, %v747_v29  ;;  %3869 = vrsqrt.f32 %v751_v26  ;;  %v3269_v26 = vpack.c.bf16 %v1144_v10, %v1136_v8  ;;  %v1152_v29 = vld [vmem:[%s6747_s11 + $0x880] sm:$0xff]  ;;  %v1210_v8 = vld [vmem:[%s6747_s11 + $0xa50] sm:$0xff] }
 0x305   :  { %v1217_v10 = vld [vmem:[%s6747_s11 + $0xa88] sm:$0xff] }
 0x306   :  { %3871 = vrsqrt.f32 %v750_v30  ;;  %v1160_v30 = vld [vmem:[%s6747_s11 + $0x8c0] sm:$0xff] }
 0x307   :  { %3873 = vrsqrt.f32 %v752_v31  ;;  %v1154_v31 = vld [vmem:[%s6747_s11 + $0x890] sm:$0xff] }
 0x30d   :  { %v3868_v32 = vpop.eup %3867 }
 0x30e   :  { %v3870_v33 = vpop.eup %3869 }
 0x310   :  { %v3872_v34 = vpop.eup %3871 }
 0x311   :  { %v3874_v27 = vpop.eup %3873  ;;  %v761_v25 = vcombine.low %v3868_v32, %v3872_v34  ;;  %v1162_v32 = vld [vmem:[%s6747_s11 + $0x8d0] sm:$0xff]  ;;  %v3271_v34 = vpack.c.bf16 %v1161_v17, %v1153_v15  ;;  %v1224_v17 = vld [vmem:[%s6747_s11 + $0xac0] sm:$0xff] }
 0x312   :  { %v762_v35 = vcombine.low %v3870_v33, %v3874_v27  ;;  %v1169_v33 = vld [vmem:[%s6747_s11 + $0x908] sm:$0xff]  ;;  %v3399_v27 = vpack.c.bf16 %v1163_v22, %v1155_v20 }
 0x313   :  { %v769_v36 = vrot.slane %v761_v25, %v4548_v6  ;;  %v1177_v25 = vld [vmem:[%s6747_s11 + $0x948] sm:$0xff] }
 0x314   :  { %v776_v37 = vrot.slane %v762_v35, %v4548_v6  ;;  %v1171_v35 = vld [vmem:[%s6747_s11 + $0x918] sm:$0xff] }
 0x316   :  { %v777_v38 = vcombine.low %v769_v36, %v776_v37  ;;  %v1179_v36 = vld [vmem:[%s6747_s11 + $0x958] sm:$0xff] }
 0x318   :  { %v784_v40 = vrot.slane %v777_v38, %v4548_v6  ;;  %v3273_v38 = vpack.c.bf16 %v1160_v30, %v1152_v29  ;;  %v1233_v29 = vld [vmem:[%s6747_s11 + $0xb08] sm:$0xff] }
 0x319   :  { %v1241_v30 = vld [vmem:[%s6747_s11 + $0xb48] sm:$0xff] }
 0x31a   :  { %v786_v41 = vmul.f32 %v784_v40, %v748_v39  ;;  %v3401_v39 = vpack.c.bf16 %v1162_v32, %v1154_v31  ;;  %v1168_v40 = vld [vmem:[%s6747_s11 + $0x900] sm:$0xff]  ;;  %v1235_v31 = vld [vmem:[%s6747_s11 + $0xb18] sm:$0xff] }
 0x31b   :  { %v1243_v32 = vld [vmem:[%s6747_s11 + $0xb58] sm:$0xff] }
 0x31c   :  { %v792_v42 = vrot.slane %v786_v41, %v4532_v19  ;;  %v796_v43 = vrot.slane %v786_v41, %v4538_v21  ;;  %v800_v44 = vrot.slane %v786_v41, %v4961_v53  ;;  %v804_v45 = vrot.slane %v786_v41, %v4967_v55  ;;  %v1176_v41 = vld [vmem:[%s6747_s11 + $0x940] sm:$0xff] }
 0x31e   :  { %v809_v46 = vmul.f32 %v792_v42, %v704_v58  ;;  %v810_v47 = vmul.f32 %v796_v43, %v705_v11  ;;  %v811_v48 = vmul.f32 %v800_v44, %v706_v60  ;;  %v812_v49 = vmul.f32 %v804_v45, %v707_v13  ;;  %v787_v58 = vld [vmem:[%s6750_s10] sm:$0xf]  ;;  %v1138_v11 = vld [vmem:[%s6747_s11 + $0x810] sm:$0xff] }
 0x31f   :  { %v846_v50 = vmul.f32 %v804_v45, %v4979_v4  ;;  %v844_v51 = vmul.f32 %v796_v43, %v4977_v3  ;;  %v843_v52 = vmul.f32 %v792_v42, %v4973_v62  ;;  %v845_v54 = vmul.f32 %v800_v44, %v4975_v63  ;;  %v1170_v44 = vld [vmem:[%s6747_s11 + $0x910] sm:$0xff] }
 0x320   :  { %v817_v56 = vcombine.low %v809_v46, %v810_v47  ;;  %v818_v57 = vcombine.low %v811_v48, %v812_v49  ;;  %v3397_v28 = vpack.c.bf16 %v1146_v12, %v1138_v11  ;;  %v3275_v42 = vpack.c.bf16 %v1177_v25, %v1169_v33  ;;  %v1178_v45 = vld [vmem:[%s6747_s11 + $0x950] sm:$0xff]  ;;  %v1185_v46 = vld [vmem:[%s6747_s11 + $0x988] sm:$0xff]  ;;  %v1187_v48 = vld [vmem:[%s6747_s11 + $0x998] sm:$0xff] }
 0x321   :  { %v3403_v43 = vpack.c.bf16 %v1179_v36, %v1171_v35  ;;  %v1193_v47 = vld [vmem:[%s6747_s11 + $0x9c8] sm:$0xff]  ;;  %v1195_v49 = vld [vmem:[%s6747_s11 + $0x9d8] sm:$0xff]  ;;  %v1240_v25 = vld [vmem:[%s6747_s11 + $0xb40] sm:$0xff]  ;;  %v3291_v35 = vpack.c.bf16 %v1241_v30, %v1233_v29  ;;  %v3419_v36 = vpack.c.bf16 %v1243_v32, %v1235_v31 }
 0x322   :  { %v825_v59 = vrot.slane %v817_v56, %v4548_v6  ;;  %v832_v61 = vrot.slane %v818_v57, %v4548_v6  ;;  %v3279_v56 = vpack.c.bf16 %v1193_v47, %v1185_v46  ;;  %v3407_v57 = vpack.c.bf16 %v1195_v49, %v1187_v48  ;;  %v1225_v11 = vld [vmem:[%s6747_s11 + $0xac8] sm:$0xff]  ;;  %v1219_v12 = vld [vmem:[%s6747_s11 + $0xa98] sm:$0xff]  ;;  %v1248_v46 = vld [vmem:[%s6747_s11 + $0xb80] sm:$0xff] }
 0x323   :  { %v3287_v20 = vpack.c.bf16 %v1225_v11, %v1217_v10  ;;  %v1256_v47 = vld [vmem:[%s6747_s11 + $0xbc0] sm:$0xff] }
 0x324   :  { %v833_v1 = vcombine.low %v825_v59, %v832_v61  ;;  %v1186_v59 = vld [vmem:[%s6747_s11 + $0x990] sm:$0xff]  ;;  %v1280_v10 = vld [vmem:[%s6747_s11 + $0xc80] sm:$0xff] }
 0x325   :  { %v1194_v61 = vld [vmem:[%s6747_s11 + $0x9d0] sm:$0xff]  ;;  %v1288_v11 = vld [vmem:[%s6747_s11 + $0xcc0] sm:$0xff] }
 0x326   :  { %v840_v60 = vrot.slane %v833_v1, %v4548_v6  ;;  %v1201_v1 = vld [vmem:[%s6747_s11 + $0xa08] sm:$0xff]  ;;  %v1296_v29 = vld [vmem:[%s6747_s11 + $0xd00] sm:$0xff] }
 0x327   :  { %v1304_v30 = vld [vmem:[%s6747_s11 + $0xd40] sm:$0xff] }
 0x328   :  { %v842_v4 = vsub.f32 %v787_v58, %v840_v60  ;;  %v1209_v58 = vld [vmem:[%s6747_s11 + $0xa48] sm:$0xff]  ;;  %v1203_v60 = vld [vmem:[%s6747_s11 + $0xa18] sm:$0xff] }
 0x32a   :  { %v863_v3 = vrot.slane %v842_v4, %v4967_v55  ;;  %v855_v62 = vrot.slane %v842_v4, %v4538_v21  ;;  %v851_v63 = vrot.slane %v842_v4, %v4532_v19  ;;  %v859_v2 = vrot.slane %v842_v4, %v4961_v53  ;;  %v1211_v4 = vld [vmem:[%s6747_s11 + $0xa58] sm:$0xff] }
 0x32c   :  { %v871_v5 = vadd.f32 %v863_v3, %v846_v50  ;;  %v869_v0 = vadd.f32 %v855_v62, %v844_v51  ;;  %v868_v7 = vadd.f32 %v851_v63, %v843_v52  ;;  %v5024_v9 = vadd.f32 %v859_v2, %v845_v54  ;;  %v1184_v52 = vld [vmem:[%s6747_s11 + $0x980] sm:$0xff] }
 0x32d   :  { %v3277_v50 = vpack.c.bf16 %v1176_v41, %v1168_v40  ;;  %v3405_v51 = vpack.c.bf16 %v1178_v45, %v1170_v44  ;;  %v1192_v54 = vld [vmem:[%s6747_s11 + $0x9c0] sm:$0xff]  ;;  %v3409_v62 = vpack.c.bf16 %v1194_v61, %v1186_v59  ;;  %v1249_v40 = vld [vmem:[%s6747_s11 + $0xb88] sm:$0xff]  ;;  %v3297_v59 = vpack.c.bf16 %v1256_v47, %v1248_v46 }
 0x32e   :  { %v873_v13 = vmul.f32 0.2, %v869_v0  ;;  %v872_v14 = vmul.f32 0.2, %v868_v7  ;;  %v875_v16 = vmul.f32 0.2, %v871_v5  ;;  %v3281_v3 = vpack.c.bf16 %v1192_v54, %v1184_v52 }
 0x32f   :  { %v1200_v63 = vld [vmem:[%s6747_s11 + $0xa00] sm:$0xff]  ;;  %v1257_v41 = vld [vmem:[%s6747_s11 + $0xbc8] sm:$0xff] }
 0x330   :  { %v5047_v23 = vmax.f32 %v869_v0, %v873_v13  ;;  %v5049_v24 = vmax.f32 %v868_v7, %v872_v14  ;;  %v5079_v37 = vmax.f32 %v871_v5, %v875_v16  ;;  %v1208_v2 = vld [vmem:[%s6747_s11 + $0xa40] sm:$0xff]  ;;  %v3283_v5 = vpack.c.bf16 %v1209_v58, %v1201_v1  ;;  %v1202_v7 = vld [vmem:[%s6747_s11 + $0xa10] sm:$0xff]  ;;  %v1227_v13 = vld [vmem:[%s6747_s11 + $0xad8] sm:$0xff] }
 0x331   :  { %v3411_v0 = vpack.c.bf16 %v1211_v4, %v1203_v60  ;;  %v3285_v14 = vpack.c.bf16 %v1208_v2, %v1200_v63  ;;  %v3413_v15 = vpack.c.bf16 %v1210_v8, %v1202_v7  ;;  %v1216_v16 = vld [vmem:[%s6747_s11 + $0xa80] sm:$0xff]  ;;  %v3415_v22 = vpack.c.bf16 %v1227_v13, %v1219_v12  ;;  %v1265_v52 = vld [vmem:[%s6747_s11 + $0xc08] sm:$0xff] }
 0x332   :  { %1498 = vmatprep.mubr.f32.mxu0 %v5047_v23  ;;  %1640 = vmatprep.mubr.f32.mxu1 %v5047_v23  ;;  %v3289_v33 = vpack.c.bf16 %v1224_v17, %v1216_v16  ;;  %v3295_v48 = vpack.c.bf16 %v1257_v41, %v1249_v40  ;;  %v1273_v54 = vld [vmem:[%s6747_s11 + $0xc48] sm:$0xff]  ;;  %v1264_v1 = vld [vmem:[%s6747_s11 + $0xc00] sm:$0xff] }
 0x333   :  { %1499 = vmatmul.mubr.f32.vlgmr.msra.gmra.mrb[4].mxu0 %v5049_v24  ;;  %1641 = vmatmul.mubr.f32.vlgmr.msra.gmra.mrb[4].mxu1 %v5049_v24  ;;  %v1272_v58 = vld [vmem:[%s6747_s11 + $0xc40] sm:$0xff]  ;;  %v3299_v60 = vpack.c.bf16 %v1273_v54, %v1265_v52  ;;  %v1281_v63 = vld [vmem:[%s6747_s11 + $0xc88] sm:$0xff] }
 0x334   :  { %3270 = vmatpush1.bf16.msra.mxu0 %v3269_v26  ;;  %3398 = vmatpush1.bf16.msra.mxu1 %v3397_v28  ;;  %v1218_v26 = vld [vmem:[%s6747_s11 + $0xa90] sm:$0xff]  ;;  %v1289_v2 = vld [vmem:[%s6747_s11 + $0xcc8] sm:$0xff]  ;;  %v3301_v7 = vpack.c.bf16 %v1272_v58, %v1264_v1  ;;  %v1312_v40 = vld [vmem:[%s6747_s11 + $0xd80] sm:$0xff] }
 0x335   :  { %1569 = vmatprep.mubr.f32.mxu0 %v5079_v37  ;;  %1711 = vmatprep.mubr.f32.mxu1 %v5079_v37  ;;  %v1226_v28 = vld [vmem:[%s6747_s11 + $0xad0] sm:$0xff]  ;;  %v3303_v12 = vpack.c.bf16 %v1289_v2, %v1281_v63  ;;  %v1297_v16 = vld [vmem:[%s6747_s11 + $0xd08] sm:$0xff]  ;;  %v1320_v41 = vld [vmem:[%s6747_s11 + $0xdc0] sm:$0xff] }
 0x336   :  { %3272 = vmatprep.subr.bf16.mxu0 %v3271_v34  ;;  %3400 = vmatprep.subr.bf16.mxu1 %v3399_v27  ;;  %v3417_v34 = vpack.c.bf16 %v1226_v28, %v1218_v26  ;;  %v1232_v27 = vld [vmem:[%s6747_s11 + $0xb00] sm:$0xff]  ;;  %v1305_v17 = vld [vmem:[%s6747_s11 + $0xd48] sm:$0xff]  ;;  %v3305_v26 = vpack.c.bf16 %v1288_v11, %v1280_v10 }
 0x337   :  { %v3293_v44 = vpack.c.bf16 %v1240_v25, %v1232_v27  ;;  %v3307_v31 = vpack.c.bf16 %v1305_v17, %v1297_v16  ;;  %v1313_v27 = vld [vmem:[%s6747_s11 + $0xd88] sm:$0xff]  ;;  %v1328_v52 = vld [vmem:[%s6747_s11 + $0xe00] sm:$0xff] }
 0x338   :  { %3274 = vmatpush1.bf16.msra.mxu0 %v3273_v38  ;;  %3402 = vmatpush1.bf16.msra.mxu1 %v3401_v39  ;;  %v1234_v38 = vld [vmem:[%s6747_s11 + $0xb10] sm:$0xff]  ;;  %v1321_v25 = vld [vmem:[%s6747_s11 + $0xdc8] sm:$0xff]  ;;  %v1336_v54 = vld [vmem:[%s6747_s11 + $0xe40] sm:$0xff] }
 0x339   :  { %3276 = vmatprep.subr.bf16.mxu0 %v3275_v42  ;;  %3404 = vmatprep.subr.bf16.mxu1 %v3403_v43  ;;  %v1242_v39 = vld [vmem:[%s6747_s11 + $0xb50] sm:$0xff]  ;;  %v1251_v42 = vld [vmem:[%s6747_s11 + $0xb98] sm:$0xff]  ;;  %v1329_v46 = vld [vmem:[%s6747_s11 + $0xe08] sm:$0xff] }
 0x33a   :  { %v1259_v43 = vld [vmem:[%s6747_s11 + $0xbd8] sm:$0xff]  ;;  %v3421_v45 = vpack.c.bf16 %v1242_v39, %v1234_v38  ;;  %v3309_v38 = vpack.c.bf16 %v1304_v30, %v1296_v29  ;;  %v1337_v47 = vld [vmem:[%s6747_s11 + $0xe48] sm:$0xff]  ;;  %v1344_v63 = vld [vmem:[%s6747_s11 + $0xe80] sm:$0xff] }
 0x33b   :  { %v3423_v49 = vpack.c.bf16 %v1259_v43, %v1251_v42  ;;  %v3311_v42 = vpack.c.bf16 %v1321_v25, %v1313_v27  ;;  %v1345_v1 = vld [vmem:[%s6747_s11 + $0xe88] sm:$0xff]  ;;  %v1352_v2 = vld [vmem:[%s6747_s11 + $0xec0] sm:$0xff] }
 0x33c   :  { %3278 = vmatpush1.bf16.msra.mxu0 %v3277_v50  ;;  %3406 = vmatpush1.bf16.msra.mxu1 %v3405_v51  ;;  %v1250_v50 = vld [vmem:[%s6747_s11 + $0xb90] sm:$0xff]  ;;  %v1353_v58 = vld [vmem:[%s6747_s11 + $0xec8] sm:$0xff]  ;;  %v1360_v16 = vld [vmem:[%s6747_s11 + $0xf00] sm:$0xff] }
 0x33d   :  { %3280 = vmatprep.subr.bf16.mxu0 %v3279_v56  ;;  %3408 = vmatprep.subr.bf16.mxu1 %v3407_v57  ;;  %v1258_v51 = vld [vmem:[%s6747_s11 + $0xbd0] sm:$0xff]  ;;  %v1267_v56 = vld [vmem:[%s6747_s11 + $0xc18] sm:$0xff]  ;;  %v1361_v10 = vld [vmem:[%s6747_s11 + $0xf08] sm:$0xff] }
 0x33e   :  { %v1275_v57 = vld [vmem:[%s6747_s11 + $0xc58] sm:$0xff]  ;;  %v3425_v61 = vpack.c.bf16 %v1258_v51, %v1250_v50  ;;  %v3313_v50 = vpack.c.bf16 %v1320_v41, %v1312_v40  ;;  %v1369_v11 = vld [vmem:[%s6747_s11 + $0xf48] sm:$0xff]  ;;  %v1368_v17 = vld [vmem:[%s6747_s11 + $0xf40] sm:$0xff] }
 0x33f   :  { %v3427_v4 = vpack.c.bf16 %v1275_v57, %v1267_v56  ;;  %v3315_v56 = vpack.c.bf16 %v1337_v47, %v1329_v46  ;;  %v1377_v29 = vld [vmem:[%s6747_s11 + $0xf88] sm:$0xff]  ;;  %v1376_v27 = vld [vmem:[%s6747_s11 + $0xf80] sm:$0xff]  ;;  %v874_v46 = vmul.f32 0.2, %v5024_v9 }
 0x340   :  { %3282 = vmatpush1.bf16.msra.mxu0 %v3281_v3  ;;  %3410 = vmatpush1.bf16.msra.mxu1 %v3409_v62  ;;  %v1266_v3 = vld [vmem:[%s6747_s11 + $0xc10] sm:$0xff]  ;;  %v1385_v30 = vld [vmem:[%s6747_s11 + $0xfc8] sm:$0xff]  ;;  %v1384_v25 = vld [vmem:[%s6747_s11 + $0xfc0] sm:$0xff] }
 0x341   :  { %3284 = vmatprep.subr.bf16.mxu0 %v3283_v5  ;;  %3412 = vmatprep.subr.bf16.mxu1 %v3411_v0  ;;  %v1274_v62 = vld [vmem:[%s6747_s11 + $0xc50] sm:$0xff]  ;;  %v1283_v5 = vld [vmem:[%s6747_s11 + $0xc98] sm:$0xff]  ;;  %v885_v40 = vld [vmem:[%s6747_s11 + $0x28] sm:$0xff] }
 0x342   :  { %v1291_v0 = vld [vmem:[%s6747_s11 + $0xcd8] sm:$0xff]  ;;  %v3429_v8 = vpack.c.bf16 %v1274_v62, %v1266_v3  ;;  %v3317_v3 = vpack.c.bf16 %v1336_v54, %v1328_v52  ;;  %v893_v41 = vld [vmem:[%s6747_s11 + $0x68] sm:$0xff]  ;;  %v894_v52 = vld [vmem:[%s6747_s11 + $0x70] sm:$0xff] }
 0x343   :  { %v3431_v13 = vpack.c.bf16 %v1291_v0, %v1283_v5  ;;  %v3319_v5 = vpack.c.bf16 %v1353_v58, %v1345_v1  ;;  %v3459_v47 = vpack.c.bf16 %v893_v41, %v885_v40  ;;  %v901_v54 = vld [vmem:[%s6747_s11 + $0xa8] sm:$0xff]  ;;  %v5445_v1 = vmax.f32 %v5024_v9, %v874_v46  ;;  %v910_v9 = vld [vmem:[%s6747_s11 + $0xf0] sm:$0xff]  ;;  %v948_v41 = vld [vmem:[%s6747_s11 + $0x220] sm:$0xff] }
 0x344   :  { %3286 = vmatpush1.bf16.msra.mxu0 %v3285_v14  ;;  %3414 = vmatpush1.bf16.msra.mxu1 %v3413_v15  ;;  %v1282_v14 = vld [vmem:[%s6747_s11 + $0xc90] sm:$0xff]  ;;  %v965_v46 = vld [vmem:[%s6747_s11 + $0x2a8] sm:$0xff] }
 0x345   :  { %3288 = vmatprep.subr.bf16.mxu0 %v3287_v20  ;;  %3416 = vmatprep.subr.bf16.mxu1 %v3415_v22  ;;  %v1290_v15 = vld [vmem:[%s6747_s11 + $0xcd0] sm:$0xff]  ;;  %v1299_v20 = vld [vmem:[%s6747_s11 + $0xd18] sm:$0xff] }
 0x346   :  { %v1307_v22 = vld [vmem:[%s6747_s11 + $0xd58] sm:$0xff]  ;;  %v3433_v28 = vpack.c.bf16 %v1290_v15, %v1282_v14  ;;  %v3321_v14 = vpack.c.bf16 %v1352_v2, %v1344_v63  ;;  %v917_v2 = vld [vmem:[%s6747_s11 + $0x128] sm:$0xff] }
 0x347   :  { %v3435_v32 = vpack.c.bf16 %v1307_v22, %v1299_v20  ;;  %v3323_v20 = vpack.c.bf16 %v1369_v11, %v1361_v10 }
 0x348   :  { %3290 = vmatpush1.bf16.msra.mxu0 %v3289_v33  ;;  %3418 = vmatpush1.bf16.msra.mxu1 %v3417_v34  ;;  %v1298_v33 = vld [vmem:[%s6747_s11 + $0xd10] sm:$0xff] }
 0x349   :  { %3292 = vmatprep.subr.bf16.mxu0 %v3291_v35  ;;  %3420 = vmatprep.subr.bf16.mxu1 %v3419_v36  ;;  %v1306_v34 = vld [vmem:[%s6747_s11 + $0xd50] sm:$0xff]  ;;  %v1315_v35 = vld [vmem:[%s6747_s11 + $0xd98] sm:$0xff] }
 0x34a   :  { %v1323_v36 = vld [vmem:[%s6747_s11 + $0xdd8] sm:$0xff]  ;;  %v3437_v39 = vpack.c.bf16 %v1306_v34, %v1298_v33  ;;  %v3325_v33 = vpack.c.bf16 %v1368_v17, %v1360_v16  ;;  %v933_v16 = vld [vmem:[%s6747_s11 + $0x1a8] sm:$0xff] }
 0x34b   :  { %v3439_v43 = vpack.c.bf16 %v1323_v36, %v1315_v35  ;;  %v3327_v35 = vpack.c.bf16 %v1385_v30, %v1377_v29  ;;  %v941_v17 = vld [vmem:[%s6747_s11 + $0x1e8] sm:$0xff]  ;;  %v932_v30 = vld [vmem:[%s6747_s11 + $0x1a0] sm:$0xff] }
 0x34c   :  { %3294 = vmatpush1.bf16.msra.mxu0 %v3293_v44  ;;  %3422 = vmatpush1.bf16.msra.mxu1 %v3421_v45  ;;  %v1314_v44 = vld [vmem:[%s6747_s11 + $0xd90] sm:$0xff]  ;;  %v3471_v29 = vpack.c.bf16 %v941_v17, %v933_v16  ;;  %v996_v16 = vld [vmem:[%s6747_s11 + $0x3a0] sm:$0xff] }
 0x34d   :  { %3296 = vmatprep.subr.bf16.mxu0 %v3295_v48  ;;  %3424 = vmatprep.subr.bf16.mxu1 %v3423_v49  ;;  %v1322_v45 = vld [vmem:[%s6747_s11 + $0xdd0] sm:$0xff]  ;;  %v1331_v48 = vld [vmem:[%s6747_s11 + $0xe18] sm:$0xff]  ;;  %v1004_v17 = vld [vmem:[%s6747_s11 + $0x3e0] sm:$0xff] }
 0x34e   :  { %v1339_v49 = vld [vmem:[%s6747_s11 + $0xe58] sm:$0xff]  ;;  %v3441_v51 = vpack.c.bf16 %v1322_v45, %v1314_v44  ;;  %v3329_v44 = vpack.c.bf16 %v1384_v25, %v1376_v27  ;;  %v949_v27 = vld [vmem:[%s6747_s11 + $0x228] sm:$0xff] }
 0x34f   :  { %v3443_v57 = vpack.c.bf16 %v1339_v49, %v1331_v48  ;;  %v884_v49 = vld [vmem:[%s6747_s11 + $0x20] sm:$0xff]  ;;  %v957_v25 = vld [vmem:[%s6747_s11 + $0x268] sm:$0xff] }
 0x350   :  { %3298 = vmatpush1.bf16.msra.mxu0 %v3297_v59  ;;  %3426 = vmatpush1.bf16.msra.mxu1 %v3425_v61  ;;  %v1330_v59 = vld [vmem:[%s6747_s11 + $0xe10] sm:$0xff]  ;;  %v3475_v40 = vpack.c.bf16 %v957_v25, %v949_v27  ;;  %v1012_v27 = vld [vmem:[%s6747_s11 + $0x420] sm:$0xff] }
 0x351   :  { %3300 = vmatprep.subr.bf16.mxu0 %v3299_v60  ;;  %3428 = vmatprep.subr.bf16.mxu1 %v3427_v4  ;;  %v1338_v61 = vld [vmem:[%s6747_s11 + $0xe50] sm:$0xff]  ;;  %v1347_v60 = vld [vmem:[%s6747_s11 + $0xe98] sm:$0xff]  ;;  %v1020_v25 = vld [vmem:[%s6747_s11 + $0x460] sm:$0xff] }
 0x352   :  { %v1355_v4 = vld [vmem:[%s6747_s11 + $0xed8] sm:$0xff]  ;;  %v3445_v62 = vpack.c.bf16 %v1338_v61, %v1330_v59 }
 0x353   :  { %v3447_v0 = vpack.c.bf16 %v1355_v4, %v1347_v60  ;;  %v911_v59 = vld [vmem:[%s6747_s11 + $0xf8] sm:$0xff]  ;;  %v900_v60 = vld [vmem:[%s6747_s11 + $0xa0] sm:$0xff] }
 0x354   :  { %3302 = vmatpush1.bf16.msra.mxu0 %v3301_v7  ;;  %3430 = vmatpush1.bf16.msra.mxu1 %v3429_v8  ;;  %v1346_v7 = vld [vmem:[%s6747_s11 + $0xe90] sm:$0xff]  ;;  %v908_v4 = vld [vmem:[%s6747_s11 + $0xe0] sm:$0xff] }
 0x355   :  { %3304 = vmatprep.subr.bf16.mxu0 %v3303_v12  ;;  %3432 = vmatprep.subr.bf16.mxu1 %v3431_v13  ;;  %v1354_v8 = vld [vmem:[%s6747_s11 + $0xed0] sm:$0xff]  ;;  %v1363_v12 = vld [vmem:[%s6747_s11 + $0xf18] sm:$0xff] }
 0x356   :  { %v1371_v13 = vld [vmem:[%s6747_s11 + $0xf58] sm:$0xff]  ;;  %v3449_v15 = vpack.c.bf16 %v1354_v8, %v1346_v7  ;;  %v3465_v8 = vpack.c.bf16 %v908_v4, %v900_v60  ;;  %v989_v60 = vld [vmem:[%s6747_s11 + $0x368] sm:$0xff] }
 0x357   :  { %v3451_v22 = vpack.c.bf16 %v1371_v13, %v1363_v12  ;;  %v927_v7 = vld [vmem:[%s6747_s11 + $0x178] sm:$0xff]  ;;  %v916_v12 = vld [vmem:[%s6747_s11 + $0x120] sm:$0xff] }
 0x358   :  { %3306 = vmatpush1.bf16.msra.mxu0 %v3305_v26  ;;  %3434 = vmatpush1.bf16.msra.mxu1 %v3433_v28  ;;  %v1362_v26 = vld [vmem:[%s6747_s11 + $0xf10] sm:$0xff]  ;;  %v924_v13 = vld [vmem:[%s6747_s11 + $0x160] sm:$0xff]  ;;  %v983_v4 = vld [vmem:[%s6747_s11 + $0x338] sm:$0xff] }
 0x359   :  { %3308 = vmatprep.subr.bf16.mxu0 %v3307_v31  ;;  %3436 = vmatprep.subr.bf16.mxu1 %v3435_v32  ;;  %v1370_v28 = vld [vmem:[%s6747_s11 + $0xf50] sm:$0xff]  ;;  %v1379_v31 = vld [vmem:[%s6747_s11 + $0xf98] sm:$0xff] }
 0x35a   :  { %v1387_v32 = vld [vmem:[%s6747_s11 + $0xfd8] sm:$0xff]  ;;  %v3453_v34 = vpack.c.bf16 %v1370_v28, %v1362_v26  ;;  %v3469_v26 = vpack.c.bf16 %v924_v13, %v916_v12 }
 0x35b   :  { %v3455_v36 = vpack.c.bf16 %v1387_v32, %v1379_v31  ;;  %v940_v31 = vld [vmem:[%s6747_s11 + $0x1e0] sm:$0xff]  ;;  %v934_v32 = vld [vmem:[%s6747_s11 + $0x1b0] sm:$0xff]  ;;  %v999_v12 = vld [vmem:[%s6747_s11 + $0x3b8] sm:$0xff] }
 0x35c   :  { %3310 = vmatpush1.bf16.msra.mxu0 %v3309_v38  ;;  %3438 = vmatpush1.bf16.msra.mxu1 %v3437_v39  ;;  %v1378_v38 = vld [vmem:[%s6747_s11 + $0xf90] sm:$0xff]  ;;  %v1007_v13 = vld [vmem:[%s6747_s11 + $0x3f8] sm:$0xff] }
 0x35d   :  { %3312 = vmatprep.subr.bf16.mxu0 %v3311_v42  ;;  %3440 = vmatprep.subr.bf16.mxu1 %v3439_v43  ;;  %v1386_v39 = vld [vmem:[%s6747_s11 + $0xfd0] sm:$0xff]  ;;  %v887_v42 = vld [vmem:[%s6747_s11 + $0x38] sm:$0xff] }
 0x35e   :  { %v895_v43 = vld [vmem:[%s6747_s11 + $0x78] sm:$0xff]  ;;  %v3457_v45 = vpack.c.bf16 %v1386_v39, %v1378_v38  ;;  %v3473_v38 = vpack.c.bf16 %v940_v31, %v932_v30 }
 0x35f   :  { %v3587_v48 = vpack.c.bf16 %v895_v43, %v887_v42  ;;  %v956_v42 = vld [vmem:[%s6747_s11 + $0x260] sm:$0xff]  ;;  %v950_v43 = vld [vmem:[%s6747_s11 + $0x230] sm:$0xff]  ;;  %v1015_v30 = vld [vmem:[%s6747_s11 + $0x438] sm:$0xff] }
 0x360   :  { %3314 = vmatpush1.bf16.msra.mxu0 %v3313_v50  ;;  %3442 = vmatpush1.bf16.msra.mxu1 %v3441_v51  ;;  %v892_v50 = vld [vmem:[%s6747_s11 + $0x60] sm:$0xff]  ;;  %v886_v51 = vld [vmem:[%s6747_s11 + $0x30] sm:$0xff]  ;;  %v1023_v31 = vld [vmem:[%s6747_s11 + $0x478] sm:$0xff] }
 0x361   :  { %3316 = vmatprep.subr.bf16.mxu0 %v3315_v56  ;;  %3444 = vmatprep.subr.bf16.mxu1 %v3443_v57  ;;  %v909_v56 = vld [vmem:[%s6747_s11 + $0xe8] sm:$0xff]  ;;  %v903_v57 = vld [vmem:[%s6747_s11 + $0xb8] sm:$0xff]  ;;  %v3461_v61 = vpack.c.bf16 %v892_v50, %v884_v49  ;;  %v3589_v58 = vpack.c.bf16 %v894_v52, %v886_v51  ;;  %v3477_v50 = vpack.c.bf16 %v956_v42, %v948_v41 }
 0x362   :  { %v3591_v63 = vpack.c.bf16 %v911_v59, %v903_v57  ;;  %v975_v49 = vld [vmem:[%s6747_s11 + $0x2f8] sm:$0xff]  ;;  %v966_v57 = vld [vmem:[%s6747_s11 + $0x2b0] sm:$0xff] }
 0x363   :  { %v1031_v41 = vld [vmem:[%s6747_s11 + $0x4b8] sm:$0xff] }
 0x364   :  { %3318 = vmatpush1.bf16.msra.mxu0 %v3317_v3  ;;  %3446 = vmatpush1.bf16.msra.mxu1 %v3445_v62  ;;  %v902_v3 = vld [vmem:[%s6747_s11 + $0xb0] sm:$0xff]  ;;  %v3463_v62 = vpack.c.bf16 %v909_v56, %v901_v54  ;;  %v964_v54 = vld [vmem:[%s6747_s11 + $0x2a0] sm:$0xff]  ;;  %v1039_v42 = vld [vmem:[%s6747_s11 + $0x4f8] sm:$0xff] }
 0x365   :  { %3320 = vmatprep.subr.bf16.mxu0 %v3319_v5  ;;  %3448 = vmatprep.subr.bf16.mxu1 %v3447_v0  ;;  %v925_v5 = vld [vmem:[%s6747_s11 + $0x168] sm:$0xff]  ;;  %v919_v0 = vld [vmem:[%s6747_s11 + $0x138] sm:$0xff]  ;;  %v3593_v10 = vpack.c.bf16 %v910_v9, %v902_v3  ;;  %v972_v56 = vld [vmem:[%s6747_s11 + $0x2e0] sm:$0xff] }
 0x366   :  { %v3467_v11 = vpack.c.bf16 %v925_v5, %v917_v2  ;;  %v991_v3 = vld [vmem:[%s6747_s11 + $0x378] sm:$0xff]  ;;  %v980_v2 = vld [vmem:[%s6747_s11 + $0x320] sm:$0xff] }
 0x367   :  { %v988_v5 = vld [vmem:[%s6747_s11 + $0x360] sm:$0xff] }
 0x368   :  { %3322 = vmatpush1.bf16.msra.mxu0 %v3321_v14  ;;  %3450 = vmatpush1.bf16.msra.mxu1 %v3449_v15  ;;  %v918_v14 = vld [vmem:[%s6747_s11 + $0x130] sm:$0xff]  ;;  %v3595_v15 = vpack.c.bf16 %v927_v7, %v919_v0  ;;  %v3611_v7 = vpack.c.bf16 %v991_v3, %v983_v4 }
 0x369   :  { %3324 = vmatprep.subr.bf16.mxu0 %v3323_v20  ;;  %3452 = vmatprep.subr.bf16.mxu1 %v3451_v22  ;;  %v935_v20 = vld [vmem:[%s6747_s11 + $0x1b8] sm:$0xff]  ;;  %v982_v0 = vld [vmem:[%s6747_s11 + $0x330] sm:$0xff] }
 0x36a   :  { %v943_v22 = vld [vmem:[%s6747_s11 + $0x1f8] sm:$0xff]  ;;  %v1046_v4 = vld [vmem:[%s6747_s11 + $0x530] sm:$0xff] }
 0x36c   :  { %3326 = vmatpush1.bf16.msra.mxu0 %v3325_v33  ;;  %3454 = vmatpush1.bf16.msra.mxu1 %v3453_v34  ;;  %v3599_v33 = vpack.c.bf16 %v943_v22, %v935_v20  ;;  %v942_v34 = vld [vmem:[%s6747_s11 + $0x1f0] sm:$0xff]  ;;  %v3615_v22 = vpack.c.bf16 %v1007_v13, %v999_v12 }
 0x36d   :  { %3328 = vmatprep.subr.bf16.mxu0 %v3327_v35  ;;  %3456 = vmatprep.subr.bf16.mxu1 %v3455_v36  ;;  %v951_v35 = vld [vmem:[%s6747_s11 + $0x238] sm:$0xff]  ;;  %v3601_v39 = vpack.c.bf16 %v942_v34, %v934_v32  ;;  %v998_v20 = vld [vmem:[%s6747_s11 + $0x3b0] sm:$0xff]  ;;  %v3489_v32 = vpack.c.bf16 %v1004_v17, %v996_v16 }
 0x36e   :  { %v959_v36 = vld [vmem:[%s6747_s11 + $0x278] sm:$0xff]  ;;  %v1062_v12 = vld [vmem:[%s6747_s11 + $0x5b0] sm:$0xff] }
 0x36f   :  { %v1079_v16 = vld [vmem:[%s6747_s11 + $0x638] sm:$0xff] }
 0x370   :  { %3330 = vmatpush1.bf16.msra.mxu0 %v3329_v44  ;;  %3458 = vmatpush1.bf16.msra.mxu1 %v3457_v45  ;;  %v3603_v44 = vpack.c.bf16 %v959_v36, %v951_v35  ;;  %v958_v45 = vld [vmem:[%s6747_s11 + $0x270] sm:$0xff]  ;;  %v3619_v36 = vpack.c.bf16 %v1023_v31, %v1015_v30  ;;  %v1087_v17 = vld [vmem:[%s6747_s11 + $0x678] sm:$0xff] }
 0x371   :  { %3460 = vmatprep.subr.bf16.mxu0 %v3459_v47  ;;  %3588 = vmatprep.subr.bf16.mxu1 %v3587_v48  ;;  %v973_v47 = vld [vmem:[%s6747_s11 + $0x2e8] sm:$0xff]  ;;  %v967_v48 = vld [vmem:[%s6747_s11 + $0x2b8] sm:$0xff]  ;;  %v3605_v51 = vpack.c.bf16 %v958_v45, %v950_v43  ;;  %v1014_v35 = vld [vmem:[%s6747_s11 + $0x430] sm:$0xff]  ;;  %v3493_v43 = vpack.c.bf16 %v1020_v25, %v1012_v27  ;;  %v3635_v31 = vpack.c.bf16 %v1087_v17, %v1079_v16 }
 0x372   :  { %v3479_v52 = vpack.c.bf16 %v973_v47, %v965_v46  ;;  %v3607_v59 = vpack.c.bf16 %v975_v49, %v967_v48  ;;  %v1028_v46 = vld [vmem:[%s6747_s11 + $0x4a0] sm:$0xff]  ;;  %v1030_v48 = vld [vmem:[%s6747_s11 + $0x4b0] sm:$0xff]  ;;  %v3623_v49 = vpack.c.bf16 %v1039_v42, %v1031_v41  ;;  %v1095_v27 = vld [vmem:[%s6747_s11 + $0x6b8] sm:$0xff] }
 0x373   :  { %1570 = vmatmul.mubr.f32.vlgmr.msra.gmra.mrb[4].mxu0 %v5445_v1  ;;  %1712 = vmatmul.mubr.f32.vlgmr.msra.gmra.mrb[4].mxu1 %v5445_v1  ;;  %v1036_v47 = vld [vmem:[%s6747_s11 + $0x4e0] sm:$0xff]  ;;  %v1078_v30 = vld [vmem:[%s6747_s11 + $0x630] sm:$0xff]  ;;  %v1103_v25 = vld [vmem:[%s6747_s11 + $0x6f8] sm:$0xff] }
 0x374   :  { %3462 = vmatpush1.bf16.msra.mxu0 %v3461_v61  ;;  %1782 = vmatprep.mubr.f32.mxu0 %v5047_v23  ;;  %v974_v61 = vld [vmem:[%s6747_s11 + $0x2f0] sm:$0xff]  ;;  %v3639_v42 = vpack.c.bf16 %v1103_v25, %v1095_v27 }
 0x375   :  { %3590 = vmatpush1.bf16.msra.mxu1 %v3589_v58  ;;  %1924 = vmatprep.mubr.f32.mxu1 %v5047_v23  ;;  %v926_v23 = vld [vmem:[%s6747_s11 + $0x170] sm:$0xff]  ;;  %v981_v58 = vld [vmem:[%s6747_s11 + $0x328] sm:$0xff] }
 0x376   :  { %3464 = vmatprep.subr.bf16.mxu0 %v3463_v62  ;;  %3592 = vmatprep.subr.bf16.mxu1 %v3591_v63  ;;  %v3597_v28 = vpack.c.bf16 %v926_v23, %v918_v14  ;;  %v3481_v62 = vpack.c.bf16 %v972_v56, %v964_v54  ;;  %v3609_v63 = vpack.c.bf16 %v974_v61, %v966_v57  ;;  %v1047_v54 = vld [vmem:[%s6747_s11 + $0x538] sm:$0xff]  ;;  %v1094_v41 = vld [vmem:[%s6747_s11 + $0x6b0] sm:$0xff] }
 0x377   :  { %v3483_v9 = vpack.c.bf16 %v989_v60, %v981_v58  ;;  %v3485_v14 = vpack.c.bf16 %v988_v5, %v980_v2  ;;  %v1055_v56 = vld [vmem:[%s6747_s11 + $0x578] sm:$0xff]  ;;  %v3497_v57 = vpack.c.bf16 %v1036_v47, %v1028_v46  ;;  %v1044_v58 = vld [vmem:[%s6747_s11 + $0x520] sm:$0xff]  ;;  %v1142_v17 = vld [vmem:[%s6747_s11 + $0x830] sm:$0xff] }
 0x378   :  { %3466 = vmatpush1.bf16.msra.mxu0 %v3465_v8  ;;  %v990_v8 = vld [vmem:[%s6747_s11 + $0x370] sm:$0xff]  ;;  %v1052_v60 = vld [vmem:[%s6747_s11 + $0x560] sm:$0xff]  ;;  %v3627_v3 = vpack.c.bf16 %v1055_v56, %v1047_v54  ;;  %v1063_v2 = vld [vmem:[%s6747_s11 + $0x5b8] sm:$0xff] }
 0x379   :  { %3594 = vmatpush1.bf16.msra.mxu1 %v3593_v10  ;;  %3468 = vmatprep.subr.bf16.mxu0 %v3467_v11  ;;  %v997_v10 = vld [vmem:[%s6747_s11 + $0x3a8] sm:$0xff]  ;;  %v1071_v5 = vld [vmem:[%s6747_s11 + $0x5f8] sm:$0xff]  ;;  %v1110_v54 = vld [vmem:[%s6747_s11 + $0x730] sm:$0xff] }
 0x37a   :  { %3596 = vmatprep.subr.bf16.mxu1 %v3595_v15  ;;  %v1005_v11 = vld [vmem:[%s6747_s11 + $0x3e8] sm:$0xff]  ;;  %v3613_v15 = vpack.c.bf16 %v990_v8, %v982_v0  ;;  %v3501_v0 = vpack.c.bf16 %v1052_v60, %v1044_v58  ;;  %v3631_v13 = vpack.c.bf16 %v1071_v5, %v1063_v2  ;;  %v1111_v46 = vld [vmem:[%s6747_s11 + $0x738] sm:$0xff]  ;;  %v1126_v2 = vld [vmem:[%s6747_s11 + $0x7b0] sm:$0xff] }
 0x37b   :  { %v3487_v23 = vpack.c.bf16 %v1005_v11, %v997_v10  ;;  %v1060_v10 = vld [vmem:[%s6747_s11 + $0x5a0] sm:$0xff]  ;;  %v1119_v47 = vld [vmem:[%s6747_s11 + $0x778] sm:$0xff]  ;;  %v1166_v25 = vld [vmem:[%s6747_s11 + $0x8f0] sm:$0xff] }
 0x37c   :  { %3470 = vmatpush1.bf16.msra.mxu0 %v3469_v26  ;;  %v1006_v26 = vld [vmem:[%s6747_s11 + $0x3f0] sm:$0xff]  ;;  %v1068_v11 = vld [vmem:[%s6747_s11 + $0x5e0] sm:$0xff]  ;;  %v3643_v56 = vpack.c.bf16 %v1119_v47, %v1111_v46  ;;  %v1127_v58 = vld [vmem:[%s6747_s11 + $0x7b8] sm:$0xff] }
 0x37d   :  { %3598 = vmatpush1.bf16.msra.mxu1 %v3597_v28  ;;  %3472 = vmatprep.subr.bf16.mxu0 %v3471_v29  ;;  %v1013_v28 = vld [vmem:[%s6747_s11 + $0x428] sm:$0xff]  ;;  %v1135_v60 = vld [vmem:[%s6747_s11 + $0x7f8] sm:$0xff]  ;;  %v1174_v46 = vld [vmem:[%s6747_s11 + $0x930] sm:$0xff] }
 0x37e   :  { %3600 = vmatprep.subr.bf16.mxu1 %v3599_v33  ;;  %v1021_v29 = vld [vmem:[%s6747_s11 + $0x468] sm:$0xff]  ;;  %v3617_v33 = vpack.c.bf16 %v1006_v26, %v998_v20  ;;  %v3505_v20 = vpack.c.bf16 %v1068_v11, %v1060_v10  ;;  %v3647_v5 = vpack.c.bf16 %v1135_v60, %v1127_v58  ;;  %v1143_v10 = vld [vmem:[%s6747_s11 + $0x838] sm:$0xff]  ;;  %v1182_v47 = vld [vmem:[%s6747_s11 + $0x970] sm:$0xff] }
 0x37f   :  { %v3491_v34 = vpack.c.bf16 %v1021_v29, %v1013_v28  ;;  %v1076_v28 = vld [vmem:[%s6747_s11 + $0x620] sm:$0xff]  ;;  %v1151_v11 = vld [vmem:[%s6747_s11 + $0x878] sm:$0xff]  ;;  %v1198_v58 = vld [vmem:[%s6747_s11 + $0x9f0] sm:$0xff] }
 0x380   :  { %3474 = vmatpush1.bf16.msra.mxu0 %v3473_v38  ;;  %v1022_v38 = vld [vmem:[%s6747_s11 + $0x470] sm:$0xff]  ;;  %v1084_v29 = vld [vmem:[%s6747_s11 + $0x660] sm:$0xff]  ;;  %v3651_v16 = vpack.c.bf16 %v1151_v11, %v1143_v10  ;;  %v1205_v60 = vld [vmem:[%s6747_s11 + $0xa28] sm:$0xff] }
 0x381   :  { %3602 = vmatpush1.bf16.msra.mxu1 %v3601_v39  ;;  %3476 = vmatprep.subr.bf16.mxu0 %v3475_v40  ;;  %v1029_v39 = vld [vmem:[%s6747_s11 + $0x4a8] sm:$0xff]  ;;  %v1214_v10 = vld [vmem:[%s6747_s11 + $0xa70] sm:$0xff] }
 0x382   :  { %3604 = vmatprep.subr.bf16.mxu1 %v3603_v44  ;;  %v1037_v40 = vld [vmem:[%s6747_s11 + $0x4e8] sm:$0xff]  ;;  %v3621_v44 = vpack.c.bf16 %v1022_v38, %v1014_v35  ;;  %v3509_v35 = vpack.c.bf16 %v1084_v29, %v1076_v28  ;;  %v1159_v29 = vld [vmem:[%s6747_s11 + $0x8b8] sm:$0xff] }
 0x383   :  { %v3495_v45 = vpack.c.bf16 %v1037_v40, %v1029_v39  ;;  %v1092_v39 = vld [vmem:[%s6747_s11 + $0x6a0] sm:$0xff]  ;;  %v1221_v11 = vld [vmem:[%s6747_s11 + $0xaa8] sm:$0xff] }
 0x384   :  { %3478 = vmatpush1.bf16.msra.mxu0 %v3477_v50  ;;  %v1038_v50 = vld [vmem:[%s6747_s11 + $0x4f0] sm:$0xff]  ;;  %v1100_v40 = vld [vmem:[%s6747_s11 + $0x6e0] sm:$0xff] }
 0x385   :  { %3606 = vmatpush1.bf16.msra.mxu1 %v3605_v51  ;;  %3480 = vmatprep.subr.bf16.mxu0 %v3479_v52  ;;  %v1045_v51 = vld [vmem:[%s6747_s11 + $0x528] sm:$0xff] }
 0x386   :  { %3608 = vmatprep.subr.bf16.mxu1 %v3607_v59  ;;  %v1053_v52 = vld [vmem:[%s6747_s11 + $0x568] sm:$0xff]  ;;  %v3625_v59 = vpack.c.bf16 %v1038_v50, %v1030_v48  ;;  %v3513_v48 = vpack.c.bf16 %v1100_v40, %v1092_v39  ;;  %v1175_v39 = vld [vmem:[%s6747_s11 + $0x938] sm:$0xff] }
 0x387   :  { %v3499_v61 = vpack.c.bf16 %v1053_v52, %v1045_v51  ;;  %v1108_v51 = vld [vmem:[%s6747_s11 + $0x720] sm:$0xff]  ;;  %v1183_v40 = vld [vmem:[%s6747_s11 + $0x978] sm:$0xff] }
 0x388   :  { %3482 = vmatpush1.bf16.msra.mxu0 %v3481_v62  ;;  %v1054_v62 = vld [vmem:[%s6747_s11 + $0x570] sm:$0xff]  ;;  %v1116_v52 = vld [vmem:[%s6747_s11 + $0x760] sm:$0xff] }
 0x389   :  { %3610 = vmatpush1.bf16.msra.mxu1 %v3609_v63  ;;  %3484 = vmatprep.subr.bf16.mxu0 %v3483_v9  ;;  %v1061_v63 = vld [vmem:[%s6747_s11 + $0x5a8] sm:$0xff] }
 0x38a   :  { %3612 = vmatprep.subr.bf16.mxu1 %v3611_v7  ;;  %v1069_v9 = vld [vmem:[%s6747_s11 + $0x5e8] sm:$0xff]  ;;  %v3629_v7 = vpack.c.bf16 %v1054_v62, %v1046_v4  ;;  %v3517_v4 = vpack.c.bf16 %v1116_v52, %v1108_v51  ;;  %v3661_v52 = vpack.c.bf16 %v1182_v47, %v1174_v46  ;;  %v1260_v47 = vld [vmem:[%s6747_s11 + $0xbe0] sm:$0xff] }
 0x38b   :  { %v3503_v8 = vpack.c.bf16 %v1069_v9, %v1061_v63  ;;  %v1124_v63 = vld [vmem:[%s6747_s11 + $0x7a0] sm:$0xff] }
 0x38c   :  { %3486 = vmatpush1.bf16.msra.mxu0 %v3485_v14  ;;  %v1070_v14 = vld [vmem:[%s6747_s11 + $0x5f0] sm:$0xff]  ;;  %v1132_v9 = vld [vmem:[%s6747_s11 + $0x7e0] sm:$0xff] }
 0x38d   :  { %3614 = vmatpush1.bf16.msra.mxu1 %v3613_v15  ;;  %3488 = vmatprep.subr.bf16.mxu0 %v3487_v23  ;;  %v1077_v15 = vld [vmem:[%s6747_s11 + $0x628] sm:$0xff] }
 0x38e   :  { %3616 = vmatprep.subr.bf16.mxu1 %v3615_v22  ;;  %v1085_v23 = vld [vmem:[%s6747_s11 + $0x668] sm:$0xff]  ;;  %v3633_v22 = vpack.c.bf16 %v1070_v14, %v1062_v12  ;;  %v3521_v12 = vpack.c.bf16 %v1132_v9, %v1124_v63 }
 0x38f   :  { %v3507_v26 = vpack.c.bf16 %v1085_v23, %v1077_v15  ;;  %v1140_v15 = vld [vmem:[%s6747_s11 + $0x820] sm:$0xff] }
 0x390   :  { %3490 = vmatpush1.bf16.msra.mxu0 %v3489_v32  ;;  %v1086_v32 = vld [vmem:[%s6747_s11 + $0x670] sm:$0xff]  ;;  %v1148_v23 = vld [vmem:[%s6747_s11 + $0x860] sm:$0xff] }
 0x391   :  { %3618 = vmatpush1.bf16.msra.mxu1 %v3617_v33  ;;  %3492 = vmatprep.subr.bf16.mxu0 %v3491_v34  ;;  %v1093_v33 = vld [vmem:[%s6747_s11 + $0x6a8] sm:$0xff]  ;;  %v3525_v28 = vpack.c.bf16 %v1148_v23, %v1140_v15 }
 0x392   :  { %3620 = vmatprep.subr.bf16.mxu1 %v3619_v36  ;;  %v1101_v34 = vld [vmem:[%s6747_s11 + $0x6e8] sm:$0xff]  ;;  %v3637_v36 = vpack.c.bf16 %v1086_v32, %v1078_v30  ;;  %v1167_v30 = vld [vmem:[%s6747_s11 + $0x8f8] sm:$0xff]  ;;  %v1156_v32 = vld [vmem:[%s6747_s11 + $0x8a0] sm:$0xff] }
 0x393   :  { %v3511_v38 = vpack.c.bf16 %v1101_v34, %v1093_v33  ;;  %v1164_v33 = vld [vmem:[%s6747_s11 + $0x8e0] sm:$0xff]  ;;  %v1158_v34 = vld [vmem:[%s6747_s11 + $0x8b0] sm:$0xff] }
 0x394   :  { %3494 = vmatpush1.bf16.msra.mxu0 %v3493_v43  ;;  %v1102_v43 = vld [vmem:[%s6747_s11 + $0x6f0] sm:$0xff] }
 0x395   :  { %3622 = vmatpush1.bf16.msra.mxu1 %v3621_v44  ;;  %3496 = vmatprep.subr.bf16.mxu0 %v3495_v45  ;;  %v1109_v44 = vld [vmem:[%s6747_s11 + $0x728] sm:$0xff] }
 0x396   :  { %3624 = vmatprep.subr.bf16.mxu1 %v3623_v49  ;;  %v1117_v45 = vld [vmem:[%s6747_s11 + $0x768] sm:$0xff]  ;;  %v3641_v49 = vpack.c.bf16 %v1102_v43, %v1094_v41  ;;  %v3529_v41 = vpack.c.bf16 %v1164_v33, %v1156_v32  ;;  %v1247_v32 = vld [vmem:[%s6747_s11 + $0xb78] sm:$0xff] }
 0x397   :  { %v3515_v50 = vpack.c.bf16 %v1117_v45, %v1109_v44  ;;  %v1172_v44 = vld [vmem:[%s6747_s11 + $0x920] sm:$0xff] }
 0x398   :  { %3498 = vmatpush1.bf16.msra.mxu0 %v3497_v57  ;;  %v1118_v57 = vld [vmem:[%s6747_s11 + $0x770] sm:$0xff]  ;;  %v1180_v45 = vld [vmem:[%s6747_s11 + $0x960] sm:$0xff] }
 0x399   :  { %3626 = vmatpush1.bf16.msra.mxu1 %v3625_v59  ;;  %3500 = vmatprep.subr.bf16.mxu0 %v3499_v61  ;;  %v1125_v59 = vld [vmem:[%s6747_s11 + $0x7a8] sm:$0xff]  ;;  %v3533_v51 = vpack.c.bf16 %v1180_v45, %v1172_v44 }
 0x39a   :  { %3628 = vmatprep.subr.bf16.mxu1 %v3627_v3  ;;  %v1133_v61 = vld [vmem:[%s6747_s11 + $0x7e8] sm:$0xff]  ;;  %v3645_v3 = vpack.c.bf16 %v1118_v57, %v1110_v54  ;;  %v1196_v57 = vld [vmem:[%s6747_s11 + $0x9e0] sm:$0xff] }
 0x39b   :  { %v3519_v62 = vpack.c.bf16 %v1133_v61, %v1125_v59  ;;  %v1190_v59 = vld [vmem:[%s6747_s11 + $0x9b0] sm:$0xff] }
 0x39c   :  { %3502 = vmatpush1.bf16.msra.mxu0 %v3501_v0  ;;  %v1134_v0 = vld [vmem:[%s6747_s11 + $0x7f0] sm:$0xff]  ;;  %v3665_v9 = vpack.c.bf16 %v1198_v58, %v1190_v59  ;;  %v1276_v58 = vld [vmem:[%s6747_s11 + $0xc60] sm:$0xff] }
 0x39d   :  { %3630 = vmatpush1.bf16.msra.mxu1 %v3629_v7  ;;  %3504 = vmatprep.subr.bf16.mxu0 %v3503_v8  ;;  %v1141_v7 = vld [vmem:[%s6747_s11 + $0x828] sm:$0xff] }
 0x39e   :  { %3632 = vmatprep.subr.bf16.mxu1 %v3631_v13  ;;  %v1149_v8 = vld [vmem:[%s6747_s11 + $0x868] sm:$0xff]  ;;  %v3649_v13 = vpack.c.bf16 %v1134_v0, %v1126_v2  ;;  %v1212_v0 = vld [vmem:[%s6747_s11 + $0xa60] sm:$0xff] }
 0x39f   :  { %v3523_v14 = vpack.c.bf16 %v1149_v8, %v1141_v7  ;;  %v1206_v7 = vld [vmem:[%s6747_s11 + $0xa30] sm:$0xff] }
 0x3a0   :  { %3506 = vmatpush1.bf16.msra.mxu0 %v3505_v20  ;;  %v1150_v20 = vld [vmem:[%s6747_s11 + $0x870] sm:$0xff]  ;;  %v3669_v23 = vpack.c.bf16 %v1214_v10, %v1206_v7  ;;  %v1292_v10 = vld [vmem:[%s6747_s11 + $0xce0] sm:$0xff] }
 0x3a1   :  { %3634 = vmatpush1.bf16.msra.mxu1 %v3633_v22  ;;  %3508 = vmatprep.subr.bf16.mxu0 %v3507_v26  ;;  %v1157_v22 = vld [vmem:[%s6747_s11 + $0x8a8] sm:$0xff] }
 0x3a2   :  { %3636 = vmatprep.subr.bf16.mxu1 %v3635_v31  ;;  %v1165_v26 = vld [vmem:[%s6747_s11 + $0x8e8] sm:$0xff]  ;;  %v3653_v31 = vpack.c.bf16 %v1150_v20, %v1142_v17  ;;  %v1220_v17 = vld [vmem:[%s6747_s11 + $0xaa0] sm:$0xff] }
 0x3a3   :  { %v3527_v27 = vpack.c.bf16 %v1165_v26, %v1157_v22  ;;  %v1228_v20 = vld [vmem:[%s6747_s11 + $0xae0] sm:$0xff]  ;;  %v1222_v22 = vld [vmem:[%s6747_s11 + $0xab0] sm:$0xff] }
 0x3a4   :  { %3510 = vmatpush1.bf16.msra.mxu0 %v3509_v35  ;;  %v1173_v35 = vld [vmem:[%s6747_s11 + $0x928] sm:$0xff]  ;;  %v3545_v33 = vpack.c.bf16 %v1228_v20, %v1220_v17 }
 0x3a5   :  { %3638 = vmatpush1.bf16.msra.mxu1 %v3637_v36  ;;  %3512 = vmatprep.subr.bf16.mxu0 %v3511_v38  ;;  %v1181_v36 = vld [vmem:[%s6747_s11 + $0x968] sm:$0xff]  ;;  %v3655_v38 = vpack.c.bf16 %v1167_v30, %v1159_v29 }
 0x3a6   :  { %3640 = vmatprep.subr.bf16.mxu1 %v3639_v42  ;;  %v3657_v42 = vpack.c.bf16 %v1166_v25, %v1158_v34  ;;  %v3531_v43 = vpack.c.bf16 %v1181_v36, %v1173_v35  ;;  %v1237_v29 = vld [vmem:[%s6747_s11 + $0xb28] sm:$0xff]  ;;  %v1236_v25 = vld [vmem:[%s6747_s11 + $0xb20] sm:$0xff]  ;;  %v1238_v36 = vld [vmem:[%s6747_s11 + $0xb30] sm:$0xff] }
 0x3a7   :  { %v1245_v30 = vld [vmem:[%s6747_s11 + $0xb68] sm:$0xff]  ;;  %v1244_v35 = vld [vmem:[%s6747_s11 + $0xb60] sm:$0xff] }
 0x3a8   :  { %3514 = vmatpush1.bf16.msra.mxu0 %v3513_v48  ;;  %v1189_v48 = vld [vmem:[%s6747_s11 + $0x9a8] sm:$0xff]  ;;  %v3549_v44 = vpack.c.bf16 %v1244_v35, %v1236_v25 }
 0x3a9   :  { %3642 = vmatpush1.bf16.msra.mxu1 %v3641_v49  ;;  %3516 = vmatprep.subr.bf16.mxu0 %v3515_v50  ;;  %v1197_v49 = vld [vmem:[%s6747_s11 + $0x9e8] sm:$0xff]  ;;  %v1191_v50 = vld [vmem:[%s6747_s11 + $0x9b8] sm:$0xff] }
 0x3aa   :  { %3644 = vmatprep.subr.bf16.mxu1 %v3643_v56  ;;  %v3535_v54 = vpack.c.bf16 %v1197_v49, %v1189_v48  ;;  %v1188_v56 = vld [vmem:[%s6747_s11 + $0x9a0] sm:$0xff]  ;;  %v1254_v48 = vld [vmem:[%s6747_s11 + $0xbb0] sm:$0xff] }
 0x3ab   :  { %v3537_v63 = vpack.c.bf16 %v1196_v57, %v1188_v56 }
 0x3ac   :  { %3518 = vmatpush1.bf16.msra.mxu0 %v3517_v4  ;;  %v1213_v4 = vld [vmem:[%s6747_s11 + $0xa68] sm:$0xff] }
 0x3ad   :  { %3646 = vmatpush1.bf16.msra.mxu1 %v3645_v3  ;;  %3520 = vmatprep.subr.bf16.mxu0 %v3519_v62  ;;  %v1207_v3 = vld [vmem:[%s6747_s11 + $0xa38] sm:$0xff]  ;;  %v3539_v2 = vpack.c.bf16 %v1213_v4, %v1205_v60  ;;  %v1270_v60 = vld [vmem:[%s6747_s11 + $0xc30] sm:$0xff] }
 0x3ae   :  { %3648 = vmatprep.subr.bf16.mxu1 %v3647_v5  ;;  %v1215_v62 = vld [vmem:[%s6747_s11 + $0xa78] sm:$0xff]  ;;  %v1204_v5 = vld [vmem:[%s6747_s11 + $0xa20] sm:$0xff] }
 0x3af   :  { %v3667_v8 = vpack.c.bf16 %v1215_v62, %v1207_v3  ;;  %v3541_v15 = vpack.c.bf16 %v1212_v0, %v1204_v5  ;;  %v1278_v3 = vld [vmem:[%s6747_s11 + $0xc70] sm:$0xff]  ;;  %v1285_v62 = vld [vmem:[%s6747_s11 + $0xca8] sm:$0xff] }
 0x3b0   :  { %3522 = vmatpush1.bf16.msra.mxu0 %v3521_v12  ;;  %v1229_v12 = vld [vmem:[%s6747_s11 + $0xae8] sm:$0xff]  ;;  %v3685_v0 = vpack.c.bf16 %v1278_v3, %v1270_v60  ;;  %v1356_v3 = vld [vmem:[%s6747_s11 + $0xee0] sm:$0xff] }
 0x3b1   :  { %3650 = vmatpush1.bf16.msra.mxu1 %v3649_v13  ;;  %3524 = vmatprep.subr.bf16.mxu0 %v3523_v14  ;;  %v1223_v13 = vld [vmem:[%s6747_s11 + $0xab8] sm:$0xff] }
 0x3b2   :  { %3652 = vmatprep.subr.bf16.mxu1 %v3651_v16  ;;  %v1231_v14 = vld [vmem:[%s6747_s11 + $0xaf8] sm:$0xff]  ;;  %v3543_v16 = vpack.c.bf16 %v1229_v12, %v1221_v11  ;;  %v1286_v11 = vld [vmem:[%s6747_s11 + $0xcb0] sm:$0xff] }
 0x3b3   :  { %1783 = vmatmul.mubr.f32.vlgmr.msra.gmra.mrb[6].mxu0 %v5049_v24  ;;  %v3671_v26 = vpack.c.bf16 %v1231_v14, %v1223_v13  ;;  %v1294_v13 = vld [vmem:[%s6747_s11 + $0xcf0] sm:$0xff]  ;;  %v1301_v14 = vld [vmem:[%s6747_s11 + $0xd28] sm:$0xff] }
 0x3b4   :  { %1925 = vmatmul.mubr.f32.vlgmr.msra.gmra.mrb[6].mxu1 %v5049_v24  ;;  %3526 = vmatpush1.bf16.msra.mxu0 %v3525_v28  ;;  %v3659_v24 = vpack.c.bf16 %v1183_v40, %v1175_v39  ;;  %v1230_v28 = vld [vmem:[%s6747_s11 + $0xaf0] sm:$0xff]  ;;  %v1253_v40 = vld [vmem:[%s6747_s11 + $0xba8] sm:$0xff]  ;;  %v3689_v20 = vpack.c.bf16 %v1294_v13, %v1286_v11  ;;  %v1372_v13 = vld [vmem:[%s6747_s11 + $0xf60] sm:$0xff] }
 0x3b5   :  { %1853 = vmatprep.mubr.f32.mxu0 %v5079_v37  ;;  %3654 = vmatpush1.bf16.msra.mxu1 %v3653_v31  ;;  %v1239_v31 = vld [vmem:[%s6747_s11 + $0xb38] sm:$0xff]  ;;  %v3673_v34 = vpack.c.bf16 %v1230_v28, %v1222_v22  ;;  %v1246_v39 = vld [vmem:[%s6747_s11 + $0xb70] sm:$0xff]  ;;  %v1308_v28 = vld [vmem:[%s6747_s11 + $0xd60] sm:$0xff] }
 0x3b6   :  { %1995 = vmatprep.mubr.f32.mxu1 %v5079_v37  ;;  %3528 = vmatprep.subr.bf16.mxu0 %v3527_v27  ;;  %v1199_v37 = vld [vmem:[%s6747_s11 + $0x9f8] sm:$0xff]  ;;  %v3547_v27 = vpack.c.bf16 %v1245_v30, %v1237_v29  ;;  %v3677_v45 = vpack.c.bf16 %v1246_v39, %v1238_v36  ;;  %v1302_v29 = vld [vmem:[%s6747_s11 + $0xd30] sm:$0xff]  ;;  %v1324_v39 = vld [vmem:[%s6747_s11 + $0xde0] sm:$0xff] }
 0x3b7   :  { %3656 = vmatprep.subr.bf16.mxu1 %v3655_v38  ;;  %v3663_v61 = vpack.c.bf16 %v1199_v37, %v1191_v50  ;;  %v3675_v38 = vpack.c.bf16 %v1247_v32, %v1239_v31  ;;  %v1262_v50 = vld [vmem:[%s6747_s11 + $0xbf0] sm:$0xff]  ;;  %v1269_v37 = vld [vmem:[%s6747_s11 + $0xc28] sm:$0xff] }
 0x3b8   :  { %3530 = vmatpush1.bf16.msra.mxu0 %v3529_v41  ;;  %v1261_v41 = vld [vmem:[%s6747_s11 + $0xbe8] sm:$0xff]  ;;  %v3681_v57 = vpack.c.bf16 %v1262_v50, %v1254_v48  ;;  %v1310_v31 = vld [vmem:[%s6747_s11 + $0xd70] sm:$0xff]  ;;  %v1340_v50 = vld [vmem:[%s6747_s11 + $0xe60] sm:$0xff] }
 0x3b9   :  { %3658 = vmatpush1.bf16.msra.mxu1 %v3657_v42  ;;  %3532 = vmatprep.subr.bf16.mxu0 %v3531_v43  ;;  %v1255_v42 = vld [vmem:[%s6747_s11 + $0xbb8] sm:$0xff]  ;;  %v3551_v46 = vpack.c.bf16 %v1261_v41, %v1253_v40  ;;  %v1317_v32 = vld [vmem:[%s6747_s11 + $0xda8] sm:$0xff]  ;;  %v3693_v35 = vpack.c.bf16 %v1310_v31, %v1302_v29  ;;  %v1318_v40 = vld [vmem:[%s6747_s11 + $0xdb0] sm:$0xff] }
 0x3ba   :  { %3660 = vmatprep.subr.bf16.mxu1 %v3659_v24  ;;  %v1263_v43 = vld [vmem:[%s6747_s11 + $0xbf8] sm:$0xff]  ;;  %v1252_v24 = vld [vmem:[%s6747_s11 + $0xba0] sm:$0xff] }
 0x3bb   :  { %v3679_v49 = vpack.c.bf16 %v1263_v43, %v1255_v42  ;;  %v3553_v56 = vpack.c.bf16 %v1260_v47, %v1252_v24  ;;  %v1326_v42 = vld [vmem:[%s6747_s11 + $0xdf0] sm:$0xff]  ;;  %v1333_v43 = vld [vmem:[%s6747_s11 + $0xe28] sm:$0xff]  ;;  %v1388_v31 = vld [vmem:[%s6747_s11 + $0xfe0] sm:$0xff] }
 0x3bc   :  { %3534 = vmatpush1.bf16.msra.mxu0 %v3533_v51  ;;  %v1277_v51 = vld [vmem:[%s6747_s11 + $0xc68] sm:$0xff]  ;;  %v3697_v47 = vpack.c.bf16 %v1326_v42, %v1318_v40 }
 0x3bd   :  { %3662 = vmatpush1.bf16.msra.mxu1 %v3661_v52  ;;  %3536 = vmatprep.subr.bf16.mxu0 %v3535_v54  ;;  %v1271_v52 = vld [vmem:[%s6747_s11 + $0xc38] sm:$0xff]  ;;  %v3555_v59 = vpack.c.bf16 %v1277_v51, %v1269_v37  ;;  %v1334_v37 = vld [vmem:[%s6747_s11 + $0xe30] sm:$0xff] }
 0x3be   :  { %3664 = vmatprep.subr.bf16.mxu1 %v3663_v61  ;;  %v1279_v54 = vld [vmem:[%s6747_s11 + $0xc78] sm:$0xff]  ;;  %v1268_v61 = vld [vmem:[%s6747_s11 + $0xc20] sm:$0xff] }
 0x3bf   :  { %v3683_v4 = vpack.c.bf16 %v1279_v54, %v1271_v52  ;;  %v3557_v5 = vpack.c.bf16 %v1276_v58, %v1268_v61  ;;  %v1342_v52 = vld [vmem:[%s6747_s11 + $0xe70] sm:$0xff]  ;;  %v1349_v54 = vld [vmem:[%s6747_s11 + $0xea8] sm:$0xff] }
 0x3c0   :  { %3538 = vmatpush1.bf16.msra.mxu0 %v3537_v63  ;;  %v1293_v63 = vld [vmem:[%s6747_s11 + $0xce8] sm:$0xff]  ;;  %v3701_v58 = vpack.c.bf16 %v1342_v52, %v1334_v37 }
 0x3c1   :  { %3666 = vmatpush1.bf16.msra.mxu1 %v3665_v9  ;;  %3540 = vmatprep.subr.bf16.mxu0 %v3539_v2  ;;  %v1287_v9 = vld [vmem:[%s6747_s11 + $0xcb8] sm:$0xff]  ;;  %v3559_v7 = vpack.c.bf16 %v1293_v63, %v1285_v62  ;;  %v1350_v62 = vld [vmem:[%s6747_s11 + $0xeb0] sm:$0xff] }
 0x3c2   :  { %3668 = vmatprep.subr.bf16.mxu1 %v3667_v8  ;;  %v1295_v2 = vld [vmem:[%s6747_s11 + $0xcf8] sm:$0xff]  ;;  %v1284_v8 = vld [vmem:[%s6747_s11 + $0xca0] sm:$0xff] }
 0x3c3   :  { %v3687_v12 = vpack.c.bf16 %v1295_v2, %v1287_v9  ;;  %v3561_v17 = vpack.c.bf16 %v1292_v10, %v1284_v8  ;;  %v1358_v9 = vld [vmem:[%s6747_s11 + $0xef0] sm:$0xff]  ;;  %v1365_v2 = vld [vmem:[%s6747_s11 + $0xf28] sm:$0xff] }
 0x3c4   :  { %3542 = vmatpush1.bf16.msra.mxu0 %v3541_v15  ;;  %v1309_v15 = vld [vmem:[%s6747_s11 + $0xd68] sm:$0xff]  ;;  %v3705_v10 = vpack.c.bf16 %v1358_v9, %v1350_v62 }
 0x3c5   :  { %3670 = vmatpush1.bf16.msra.mxu1 %v3669_v23  ;;  %3544 = vmatprep.subr.bf16.mxu0 %v3543_v16  ;;  %v1303_v23 = vld [vmem:[%s6747_s11 + $0xd38] sm:$0xff]  ;;  %v3563_v22 = vpack.c.bf16 %v1309_v15, %v1301_v14  ;;  %v1366_v14 = vld [vmem:[%s6747_s11 + $0xf30] sm:$0xff] }
 0x3c6   :  { %3672 = vmatprep.subr.bf16.mxu1 %v3671_v26  ;;  %v1311_v16 = vld [vmem:[%s6747_s11 + $0xd78] sm:$0xff]  ;;  %v1300_v26 = vld [vmem:[%s6747_s11 + $0xd20] sm:$0xff] }
 0x3c7   :  { %v3691_v30 = vpack.c.bf16 %v1311_v16, %v1303_v23  ;;  %v3565_v25 = vpack.c.bf16 %v1308_v28, %v1300_v26  ;;  %v1374_v23 = vld [vmem:[%s6747_s11 + $0xf70] sm:$0xff]  ;;  %v1381_v16 = vld [vmem:[%s6747_s11 + $0xfa8] sm:$0xff] }
 0x3c8   :  { %3546 = vmatpush1.bf16.msra.mxu0 %v3545_v33  ;;  %v1325_v33 = vld [vmem:[%s6747_s11 + $0xde8] sm:$0xff]  ;;  %v3709_v28 = vpack.c.bf16 %v1374_v23, %v1366_v14 }
 0x3c9   :  { %3674 = vmatpush1.bf16.msra.mxu1 %v3673_v34  ;;  %3548 = vmatprep.subr.bf16.mxu0 %v3547_v27  ;;  %v1319_v34 = vld [vmem:[%s6747_s11 + $0xdb8] sm:$0xff]  ;;  %v3567_v36 = vpack.c.bf16 %v1325_v33, %v1317_v32  ;;  %v1382_v33 = vld [vmem:[%s6747_s11 + $0xfb0] sm:$0xff] }
 0x3ca   :  { %3676 = vmatprep.subr.bf16.mxu1 %v3675_v38  ;;  %v1327_v27 = vld [vmem:[%s6747_s11 + $0xdf8] sm:$0xff]  ;;  %v1316_v38 = vld [vmem:[%s6747_s11 + $0xda0] sm:$0xff] }
 0x3cb   :  { %v3695_v41 = vpack.c.bf16 %v1327_v27, %v1319_v34  ;;  %v3569_v24 = vpack.c.bf16 %v1324_v39, %v1316_v38  ;;  %v1390_v34 = vld [vmem:[%s6747_s11 + $0xff0] sm:$0xff] }
 0x3cc   :  { %3550 = vmatpush1.bf16.msra.mxu0 %v3549_v44  ;;  %v1341_v44 = vld [vmem:[%s6747_s11 + $0xe68] sm:$0xff] }
 0x3cd   :  { %3678 = vmatpush1.bf16.msra.mxu1 %v3677_v45  ;;  %3552 = vmatprep.subr.bf16.mxu0 %v3551_v46  ;;  %v1335_v45 = vld [vmem:[%s6747_s11 + $0xe38] sm:$0xff]  ;;  %v3571_v48 = vpack.c.bf16 %v1341_v44, %v1333_v43 }
 0x3ce   :  { %3680 = vmatprep.subr.bf16.mxu1 %v3679_v49  ;;  %v1343_v46 = vld [vmem:[%s6747_s11 + $0xe78] sm:$0xff]  ;;  %v1332_v49 = vld [vmem:[%s6747_s11 + $0xe20] sm:$0xff] }
 0x3cf   :  { %v3699_v51 = vpack.c.bf16 %v1343_v46, %v1335_v45  ;;  %v3573_v61 = vpack.c.bf16 %v1340_v50, %v1332_v49 }
 0x3d0   :  { %3554 = vmatpush1.bf16.msra.mxu0 %v3553_v56  ;;  %v1357_v56 = vld [vmem:[%s6747_s11 + $0xee8] sm:$0xff] }
 0x3d1   :  { %3682 = vmatpush1.bf16.msra.mxu1 %v3681_v57  ;;  %3556 = vmatprep.subr.bf16.mxu0 %v3555_v59  ;;  %v1351_v57 = vld [vmem:[%s6747_s11 + $0xeb8] sm:$0xff]  ;;  %v3575_v60 = vpack.c.bf16 %v1357_v56, %v1349_v54 }
 0x3d2   :  { %3684 = vmatprep.subr.bf16.mxu1 %v3683_v4  ;;  %v1359_v59 = vld [vmem:[%s6747_s11 + $0xef8] sm:$0xff]  ;;  %v1348_v4 = vld [vmem:[%s6747_s11 + $0xea0] sm:$0xff] }
 0x3d3   :  { %v3703_v63 = vpack.c.bf16 %v1359_v59, %v1351_v57  ;;  %v3577_v8 = vpack.c.bf16 %v1356_v3, %v1348_v4 }
 0x3d4   :  { %3558 = vmatpush1.bf16.msra.mxu0 %v3557_v5  ;;  %v1373_v5 = vld [vmem:[%s6747_s11 + $0xf68] sm:$0xff] }
 0x3d5   :  { %3686 = vmatpush1.bf16.msra.mxu1 %v3685_v0  ;;  %3560 = vmatprep.subr.bf16.mxu0 %v3559_v7  ;;  %v1367_v0 = vld [vmem:[%s6747_s11 + $0xf38] sm:$0xff]  ;;  %v3579_v11 = vpack.c.bf16 %v1373_v5, %v1365_v2 }
 0x3d6   :  { %3688 = vmatprep.subr.bf16.mxu1 %v3687_v12  ;;  %v1375_v7 = vld [vmem:[%s6747_s11 + $0xf78] sm:$0xff]  ;;  %v1364_v12 = vld [vmem:[%s6747_s11 + $0xf20] sm:$0xff] }
 0x3d7   :  { %v3707_v15 = vpack.c.bf16 %v1375_v7, %v1367_v0  ;;  %v3581_v26 = vpack.c.bf16 %v1372_v13, %v1364_v12 }
 0x3d8   :  { %3562 = vmatpush1.bf16.msra.mxu0 %v3561_v17  ;;  %v1389_v17 = vld [vmem:[%s6747_s11 + $0xfe8] sm:$0xff] }
 0x3d9   :  { %3690 = vmatpush1.bf16.msra.mxu1 %v3689_v20  ;;  %3564 = vmatprep.subr.bf16.mxu0 %v3563_v22  ;;  %v1383_v20 = vld [vmem:[%s6747_s11 + $0xfb8] sm:$0xff]  ;;  %v3583_v29 = vpack.c.bf16 %v1389_v17, %v1381_v16 }
 0x3da   :  { %3692 = vmatprep.subr.bf16.mxu1 %v3691_v30  ;;  %v1391_v22 = vld [vmem:[%s6747_s11 + $0xff8] sm:$0xff]  ;;  %v1380_v30 = vld [vmem:[%s6747_s11 + $0xfa0] sm:$0xff] }
 0x3db   :  { %v3711_v32 = vpack.c.bf16 %v1391_v22, %v1383_v20  ;;  %v3585_v27 = vpack.c.bf16 %v1388_v31, %v1380_v30 }
 0x3dc   :  { %3566 = vmatpush1.bf16.msra.mxu0 %v3565_v25  ;;  %v3713_v25 = vpack.c.bf16 %v1390_v34, %v1382_v33 }
 0x3dd   :  { %3694 = vmatpush1.bf16.msra.mxu1 %v3693_v35  ;;  %3568 = vmatprep.subr.bf16.mxu0 %v3567_v36  ;;  %v6192_v35 = vld [vmem:[%s6751_s12] sm:$0xff] }
 0x3de   :  { %3696 = vmatprep.subr.bf16.mxu1 %v3695_v41  ;;  %v1397_v36 = vrot.slane %v6192_v35, %v4532_v19  ;;  %v1405_v38 = vrot.slane %v6192_v35, %v4961_v53  ;;  %v1401_v39 = vrot.slane %v6192_v35, %v4538_v21  ;;  %v1409_v40 = vrot.slane %v6192_v35, %v4967_v55 }
 0x3e0   :  { %3570 = vmatpush1.bf16.msra.mxu0 %v3569_v24 }
 0x3e1   :  { %3698 = vmatpush1.bf16.msra.mxu1 %v3697_v47  ;;  %3572 = vmatprep.subr.bf16.mxu0 %v3571_v48 }
 0x3e2   :  { %3700 = vmatprep.subr.bf16.mxu1 %v3699_v51 }
 0x3e4   :  { %3574 = vmatpush1.bf16.msra.mxu0 %v3573_v61 }
 0x3e5   :  { %3702 = vmatpush1.bf16.msra.mxu1 %v3701_v58  ;;  %3576 = vmatprep.subr.bf16.mxu0 %v3575_v60 }
 0x3e6   :  { %3704 = vmatprep.subr.bf16.mxu1 %v3703_v63 }
 0x3e8   :  { %3578 = vmatpush1.bf16.msra.mxu0 %v3577_v8 }
 0x3e9   :  { %3706 = vmatpush1.bf16.msra.mxu1 %v3705_v10  ;;  %3580 = vmatprep.subr.bf16.mxu0 %v3579_v11 }
 0x3ea   :  { %3708 = vmatprep.subr.bf16.mxu1 %v3707_v15 }
 0x3ec   :  { %3582 = vmatpush1.bf16.msra.mxu0 %v3581_v26 }
 0x3ed   :  { %3710 = vmatpush1.bf16.msra.mxu1 %v3709_v28  ;;  %3584 = vmatprep.subr.bf16.mxu0 %v3583_v29 }
 0x3ee   :  { %3712 = vmatprep.subr.bf16.mxu1 %v3711_v32 }
 0x3f0   :  { %3586 = vmatpush1.bf16.msra.mxu0 %v3585_v27 }
 0x3f1   :  { %3714 = vmatpush1.bf16.msra.mxu1 %v3713_v25 }
 0x3f3   :  { %1854 = vmatmul.mubr.f32.vlgmr.msra.gmra.mrb[6].mxu0 %v5445_v1 }
 0x3f4   :  { %1996 = vmatmul.mubr.f32.vlgmr.msra.gmra.mrb[6].mxu1 %v5445_v1 }
 0x446   :  { %v1571_v41 = vpop.f32.mrb[4].mxu0  ;;  %v1713_v42 = vpop.f32.mrb[4].mxu1 }
 0x447   :  { %v6202_v1 = vadd.f32 %v1571_v41, %v1397_v36  ;;  %v6204_v43 = vadd.f32 %v1713_v42, %v1405_v38  ;;  %v1573_v44 = vpop.f32.mrb[5].mxu0  ;;  %v1715_v45 = vpop.f32.mrb[5].mxu1 }
 0x448   :  { %v6206_v46 = vadd.f32 %v1573_v44, %v1401_v39  ;;  %v6208_v24 = vadd.f32 %v1715_v45, %v1409_v40 }
 0x449   :  { %v2002_v47 = vsel %vm58_vm1, %v6202_v1, 0.0  ;;  %v2004_v48 = vsel %vm58_vm1, %v6204_v43, 0.0 }
 0x44a   :  { %v2010_v49 = vrot.slane %v2002_v47, 4  ;;  %v2066_v50 = vmul.f32 %v6202_v1, %v2002_v47  ;;  %v2022_v37 = vrot.slane %v2004_v48, 4  ;;  %v2068_v51 = vmul.f32 %v6204_v43, %v2004_v48 }
 0x44b   :  { %v2003_v52 = vsel %vm58_vm1, %v6206_v46, 0.0  ;;  %v2005_v54 = vsel %vm58_vm1, %v6208_v24, 0.0 }
 0x44c   :  { %v2011_v56 = vadd.f32 %v2010_v49, %v2002_v47  ;;  %v2074_v57 = vrot.slane %v2066_v50, 4  ;;  %v2023_v59 = vadd.f32 %v2022_v37, %v2004_v48  ;;  %v2086_v61 = vrot.slane %v2068_v51, 4 }
 0x44d   :  { %v2016_v58 = vrot.slane %v2003_v52, 4  ;;  %v2067_v60 = vmul.f32 %v6206_v46, %v2003_v52  ;;  %v2028_v4 = vrot.slane %v2005_v54, 4  ;;  %v2069_v3 = vmul.f32 %v6208_v24, %v2005_v54 }
 0x44e   :  { %v2012_v62 = vrot.slane %v2011_v56, 2  ;;  %v2075_v63 = vadd.f32 %v2074_v57, %v2066_v50  ;;  %v2024_v9 = vrot.slane %v2023_v59, 2  ;;  %v2087_v2 = vadd.f32 %v2086_v61, %v2068_v51 }
 0x44f   :  { %v2017_v5 = vadd.f32 %v2016_v58, %v2003_v52  ;;  %v2080_v0 = vrot.slane %v2067_v60, 4  ;;  %v2029_v7 = vadd.f32 %v2028_v4, %v2005_v54  ;;  %v2092_v8 = vrot.slane %v2069_v3, 4 }
 0x450   :  { %v2013_v10 = vadd.f32 %v2012_v62, %v2011_v56  ;;  %v2076_v11 = vrot.slane %v2075_v63, 2  ;;  %v2025_v12 = vadd.f32 %v2024_v9, %v2023_v59  ;;  %v2088_v13 = vrot.slane %v2087_v2, 2 }
 0x451   :  { %v2018_v14 = vrot.slane %v2017_v5, 2  ;;  %v2081_v15 = vadd.f32 %v2080_v0, %v2067_v60  ;;  %v2030_v23 = vrot.slane %v2029_v7, 2  ;;  %v2093_v16 = vadd.f32 %v2092_v8, %v2069_v3 }
 0x452   :  { %v2014_v17 = vrot.slane %v2013_v10, 1  ;;  %v2077_v20 = vadd.f32 %v2076_v11, %v2075_v63  ;;  %v2026_v22 = vrot.slane %v2025_v12, 1  ;;  %v2089_v26 = vadd.f32 %v2088_v13, %v2087_v2 }
 0x453   :  { %v2019_v28 = vadd.f32 %v2018_v14, %v2017_v5  ;;  %v2082_v29 = vrot.slane %v2081_v15, 2  ;;  %v2031_v30 = vadd.f32 %v2030_v23, %v2029_v7  ;;  %v2094_v31 = vrot.slane %v2093_v16, 2 }
 0x454   :  { %v2015_v32 = vadd.f32 %v2014_v17, %v2013_v10  ;;  %v2078_v33 = vrot.slane %v2077_v20, 1  ;;  %v2027_v34 = vadd.f32 %v2026_v22, %v2025_v12  ;;  %v2090_v27 = vrot.slane %v2089_v26, 1  ;;  %v2421_v17 = vld [vmem:[%s6752_s15 + $0x88] sm:$0xff] }
 0x455   :  { %v2020_v25 = vrot.slane %v2019_v28, 1  ;;  %v2083_v36 = vadd.f32 %v2082_v29, %v2081_v15  ;;  %v2032_v38 = vrot.slane %v2031_v30, 1  ;;  %v2095_v39 = vadd.f32 %v2094_v31, %v2093_v16  ;;  %v2420_v16 = vld [vmem:[%s6752_s15 + $0x80] sm:$0xff]  ;;  %v2405_v29 = vld [vmem:[%s6752_s15 + $0x8] sm:$0xff] }
 0x456   :  { %v6226_v40 = vmul.f32 0.16666667, %v2015_v32  ;;  %v2079_v41 = vadd.f32 %v2078_v33, %v2077_v20  ;;  %v6228_v42 = vmul.f32 0.16666667, %v2027_v34  ;;  %v2091_v44 = vadd.f32 %v2090_v27, %v2089_v26  ;;  %v2452_v20 = vld [vmem:[%s6752_s15 + $0x180] sm:$0xff]  ;;  %v2453_v26 = vld [vmem:[%s6752_s15 + $0x188] sm:$0xff] }
 0x457   :  { %v2021_v45 = vadd.f32 %v2020_v25, %v2019_v28  ;;  %v2084_v47 = vrot.slane %v2083_v36, 1  ;;  %v2033_v48 = vadd.f32 %v2032_v38, %v2031_v30  ;;  %v2096_v49 = vrot.slane %v2095_v39, 1  ;;  %v2404_v28 = vld [vmem:[%s6752_s15] sm:$0xff]  ;;  %v2437_v34 = vld [vmem:[%s6752_s15 + $0x108] sm:$0xff]  ;;  %v2422_v25 = vld [vmem:[%s6752_s15 + $0x90] sm:$0xff] }
 0x458   :  { %v2122_v50 = vmul.f32 0.16666667, %v2079_v41  ;;  %v2130_v37 = vmul.f32 %v6226_v40, %v6226_v40  ;;  %v2124_v51 = vmul.f32 0.16666667, %v2091_v44  ;;  %v2132_v52 = vmul.f32 %v6228_v42, %v6228_v42  ;;  %v2436_v33 = vld [vmem:[%s6752_s15 + $0x100] sm:$0xff]  ;;  %v2454_v38 = vld [vmem:[%s6752_s15 + $0x190] sm:$0xff] }
 0x459   :  { %v6234_v54 = vmul.f32 0.16666667, %v2021_v45  ;;  %v2085_v56 = vadd.f32 %v2084_v47, %v2083_v36  ;;  %v6236_v57 = vmul.f32 0.16666667, %v2033_v48  ;;  %v2097_v59 = vadd.f32 %v2096_v49, %v2095_v39  ;;  %v2423_v36 = vld [vmem:[%s6752_s15 + $0x98] sm:$0xff]  ;;  %v2406_v44 = vld [vmem:[%s6752_s15 + $0x10] sm:$0xff] }
 0x45a   :  { %v2138_v61 = vsub.f32 %v2122_v50, %v2130_v37  ;;  %v2140_v58 = vsub.f32 %v2124_v51, %v2132_v52  ;;  %v3715_v22 = vpack.c.bf16 %v2421_v17, %v2420_v16  ;;  %v3747_v31 = vpack.c.bf16 %v2453_v26, %v2452_v20  ;;  %v2455_v41 = vld [vmem:[%s6752_s15 + $0x198] sm:$0xff]  ;;  %v2438_v49 = vld [vmem:[%s6752_s15 + $0x110] sm:$0xff]  ;;  %v2424_v51 = vld [vmem:[%s6752_s15 + $0xa0] sm:$0xff] }
 0x45b   :  { %v2123_v60 = vmul.f32 0.16666667, %v2085_v56  ;;  %v2131_v4 = vmul.f32 %v6234_v54, %v6234_v54  ;;  %v2125_v3 = vmul.f32 0.16666667, %v2097_v59  ;;  %v2133_v62 = vmul.f32 %v6236_v57, %v6236_v57  ;;  %v2407_v45 = vld [vmem:[%s6752_s15 + $0x18] sm:$0xff]  ;;  %v2425_v52 = vld [vmem:[%s6752_s15 + $0xa8] sm:$0xff] }
 0x45c   :  { %v2147_v63 = vadd.f32 0.8, %v2138_v61  ;;  %v2149_v9 = vadd.f32 0.8, %v2140_v58  ;;  %v3717_v32 = vpack.c.bf16 %v2405_v29, %v2404_v28  ;;  %3716 = vmatprep.subr.bf16.mxu0 %v3715_v22  ;;  %v3749_v27 = vpack.c.bf16 %v2437_v34, %v2436_v33  ;;  %3748 = vmatprep.subr.bf16.mxu1 %v3747_v31  ;;  %v2439_v50 = vld [vmem:[%s6752_s15 + $0x118] sm:$0xff]  ;;  %v2456_v56 = vld [vmem:[%s6752_s15 + $0x1a0] sm:$0xff] }
 0x45d   :  { %v2139_v2 = vsub.f32 %v2123_v60, %v2131_v4  ;;  %v2141_v5 = vsub.f32 %v2125_v3, %v2133_v62  ;;  %v3719_v39 = vpack.c.bf16 %v2423_v36, %v2422_v25  ;;  %v3751_v47 = vpack.c.bf16 %v2455_v41, %v2454_v38  ;;  %v2457_v61 = vld [vmem:[%s6752_s15 + $0x1a8] sm:$0xff]  ;;  %v2408_v58 = vld [vmem:[%s6752_s15 + $0x20] sm:$0xff]  ;;  %v2443_v16 = vld [vmem:[%s6752_s15 + $0x138] sm:$0xff] }
 0x45e   :  { %3875 = vrsqrt.f32 %v2147_v63  ;;  %3718 = vmatpush3.bf16.msra.mxu0 %v3717_v32  ;;  %3750 = vmatpush3.bf16.msra.mxu1 %v3749_v27  ;;  %v3721_v48 = vpack.c.bf16 %v2407_v45, %v2406_v44  ;;  %v3753_v37 = vpack.c.bf16 %v2439_v50, %v2438_v49  ;;  %v3723_v59 = vpack.c.bf16 %v2425_v52, %v2424_v51  ;;  %v2409_v60 = vld [vmem:[%s6752_s15 + $0x28] sm:$0xff]  ;;  %v2440_v62 = vld [vmem:[%s6752_s15 + $0x120] sm:$0xff]  ;;  %v2430_v38 = vld [vmem:[%s6752_s15 + $0xd0] sm:$0xff] }
 0x45f   :  { %v2148_v0 = vadd.f32 0.8, %v2139_v2  ;;  %v2150_v7 = vadd.f32 0.8, %v2141_v5  ;;  %3877 = vrsqrt.f32 %v2149_v9  ;;  %3720 = vmatprep.subr.bf16.mxu0 %v3719_v39  ;;  %3752 = vmatprep.subr.bf16.mxu1 %v3751_v47  ;;  %v3755_v4 = vpack.c.bf16 %v2457_v61, %v2456_v56  ;;  %v2441_v63 = vld [vmem:[%s6752_s15 + $0x128] sm:$0xff]  ;;  %v2426_v2 = vld [vmem:[%s6752_s15 + $0xb0] sm:$0xff] }
 0x460   :  { %v3725_v3 = vpack.c.bf16 %v2409_v60, %v2408_v58  ;;  %v3757_v9 = vpack.c.bf16 %v2441_v63, %v2440_v62  ;;  %v2427_v5 = vld [vmem:[%s6752_s15 + $0xb8] sm:$0xff]  ;;  %v2428_v20 = vld [vmem:[%s6752_s15 + $0xc0] sm:$0xff]  ;;  %v2429_v22 = vld [vmem:[%s6752_s15 + $0xc8] sm:$0xff] }
 0x461   :  { %3879 = vrsqrt.f32 %v2148_v0  ;;  %v2458_v0 = vld [vmem:[%s6752_s15 + $0x1b0] sm:$0xff]  ;;  %v2460_v26 = vld [vmem:[%s6752_s15 + $0x1c0] sm:$0xff]  ;;  %v3731_v28 = vpack.c.bf16 %v2429_v22, %v2428_v20  ;;  %v2461_v29 = vld [vmem:[%s6752_s15 + $0x1c8] sm:$0xff] }
 0x462   :  { %3881 = vrsqrt.f32 %v2150_v7  ;;  %3722 = vmatpush3.bf16.msra.mxu0 %v3721_v48  ;;  %3754 = vmatpush3.bf16.msra.mxu1 %v3753_v37  ;;  %v3727_v7 = vpack.c.bf16 %v2427_v5, %v2426_v2  ;;  %v2412_v31 = vld [vmem:[%s6752_s15 + $0x40] sm:$0xff]  ;;  %v2413_v32 = vld [vmem:[%s6752_s15 + $0x48] sm:$0xff]  ;;  %v3763_v33 = vpack.c.bf16 %v2461_v29, %v2460_v26  ;;  %v2431_v39 = vld [vmem:[%s6752_s15 + $0xd8] sm:$0xff] }
 0x463   :  { %3724 = vmatprep.subr.bf16.mxu0 %v3723_v59  ;;  %3756 = vmatprep.subr.bf16.mxu1 %v3755_v4  ;;  %v3733_v34 = vpack.c.bf16 %v2413_v32, %v2412_v31  ;;  %v2444_v27 = vld [vmem:[%s6752_s15 + $0x140] sm:$0xff]  ;;  %v2445_v25 = vld [vmem:[%s6752_s15 + $0x148] sm:$0xff]  ;;  %v2462_v41 = vld [vmem:[%s6752_s15 + $0x1d0] sm:$0xff]  ;;  %v3735_v44 = vpack.c.bf16 %v2431_v39, %v2430_v38 }
 0x464   :  { %v3765_v36 = vpack.c.bf16 %v2445_v25, %v2444_v27  ;;  %v2463_v45 = vld [vmem:[%s6752_s15 + $0x1d8] sm:$0xff]  ;;  %v2414_v47 = vld [vmem:[%s6752_s15 + $0x50] sm:$0xff]  ;;  %v2432_v52 = vld [vmem:[%s6752_s15 + $0xe0] sm:$0xff]  ;;  %v6458_v27 = vsub.s32 6, %v4529_v18  ;;  %v6461_v25 = vsub.s32 5, %v4529_v18 }
 0x465   :  { %v2415_v48 = vld [vmem:[%s6752_s15 + $0x58] sm:$0xff]  ;;  %v3767_v49 = vpack.c.bf16 %v2463_v45, %v2462_v41  ;;  %v2446_v37 = vld [vmem:[%s6752_s15 + $0x150] sm:$0xff]  ;;  %v2433_v59 = vld [vmem:[%s6752_s15 + $0xe8] sm:$0xff] }
 0x466   :  { %3726 = vmatpush3.bf16.msra.mxu0 %v3725_v3  ;;  %3758 = vmatpush3.bf16.msra.mxu1 %v3757_v9  ;;  %v3737_v50 = vpack.c.bf16 %v2415_v48, %v2414_v47  ;;  %v2447_v51 = vld [vmem:[%s6752_s15 + $0x158] sm:$0xff]  ;;  %v2464_v61 = vld [vmem:[%s6752_s15 + $0x1e0] sm:$0xff]  ;;  %v2465_v58 = vld [vmem:[%s6752_s15 + $0x1e8] sm:$0xff]  ;;  %v3739_v60 = vpack.c.bf16 %v2433_v59, %v2432_v52  ;;  %v1421_v39 = vrot.slane %v6192_v35, %v6458_v27 }
 0x467   :  { %3728 = vmatprep.subr.bf16.mxu0 %v3727_v7  ;;  %v3769_v56 = vpack.c.bf16 %v2447_v51, %v2446_v37  ;;  %v3771_v4 = vpack.c.bf16 %v2465_v58, %v2464_v61  ;;  %v2416_v3 = vld [vmem:[%s6752_s15 + $0x60] sm:$0xff]  ;;  %v2417_v62 = vld [vmem:[%s6752_s15 + $0x68] sm:$0xff]  ;;  %v2434_v5 = vld [vmem:[%s6752_s15 + $0xf0] sm:$0xff]  ;;  %v1417_v41 = vrot.slane %v6192_v35, %v6461_v25 }
 0x468   :  { %v3876_v8 = vpop.eup %3875  ;;  %v2448_v63 = vld [vmem:[%s6752_s15 + $0x160] sm:$0xff]  ;;  %v3741_v9 = vpack.c.bf16 %v2417_v62, %v2416_v3  ;;  %v2449_v2 = vld [vmem:[%s6752_s15 + $0x168] sm:$0xff] }
 0x469   :  { %v3878_v10 = vpop.eup %3877  ;;  %v3773_v7 = vpack.c.bf16 %v2449_v2, %v2448_v63  ;;  %v2484_v26 = vld [vmem:[%s6752_s15 + $0x280] sm:$0xff]  ;;  %v2517_v32 = vld [vmem:[%s6752_s15 + $0x388] sm:$0xff] }
 0x46a   :  { %v2516_v29 = vld [vmem:[%s6752_s15 + $0x380] sm:$0xff] }
 0x46b   :  { %v3880_v11 = vpop.eup %3879 }
 0x46c   :  { %v3882_v12 = vpop.eup %3881  ;;  %v2171_v13 = vcombine.low %v3876_v8, %v3880_v11  ;;  %v2459_v8 = vld [vmem:[%s6752_s15 + $0x1b8] sm:$0xff] }
 0x46d   :  { %v2172_v14 = vcombine.low %v3878_v10, %v3882_v12  ;;  %v2410_v10 = vld [vmem:[%s6752_s15 + $0x30] sm:$0xff]  ;;  %v2411_v11 = vld [vmem:[%s6752_s15 + $0x38] sm:$0xff]  ;;  %v3759_v12 = vpack.c.bf16 %v2459_v8, %v2458_v0 }
 0x46e   :  { %v6243_v15 = vrot.slane %v2171_v13, %v4548_v6  ;;  %v3729_v13 = vpack.c.bf16 %v2411_v11, %v2410_v10  ;;  %v2435_v0 = vld [vmem:[%s6752_s15 + $0xf8] sm:$0xff]  ;;  %v2466_v10 = vld [vmem:[%s6752_s15 + $0x1f0] sm:$0xff] }
 0x46f   :  { %v6246_v23 = vrot.slane %v2172_v14, %v4548_v6  ;;  %v2442_v14 = vld [vmem:[%s6752_s15 + $0x130] sm:$0xff]  ;;  %3760 = vmatprep.subr.bf16.mxu1 %v3759_v12  ;;  %v3743_v8 = vpack.c.bf16 %v2435_v0, %v2434_v5  ;;  %v2467_v11 = vld [vmem:[%s6752_s15 + $0x1f8] sm:$0xff] }
 0x470   :  { %v3761_v17 = vpack.c.bf16 %v2443_v16, %v2442_v14  ;;  %3730 = vmatpush3.bf16.msra.mxu0 %v3729_v13  ;;  %v2418_v12 = vld [vmem:[%s6752_s15 + $0x70] sm:$0xff]  ;;  %v3775_v13 = vpack.c.bf16 %v2467_v11, %v2466_v10  ;;  %v2419_v14 = vld [vmem:[%s6752_s15 + $0x78] sm:$0xff] }
 0x471   :  { %v2203_v30 = vcombine.low %v6243_v15, %v6246_v23  ;;  %3732 = vmatprep.subr.bf16.mxu0 %v3731_v28  ;;  %v2450_v16 = vld [vmem:[%s6752_s15 + $0x170] sm:$0xff]  ;;  %v3745_v20 = vpack.c.bf16 %v2419_v14, %v2418_v12  ;;  %v2485_v28 = vld [vmem:[%s6752_s15 + $0x288] sm:$0xff] }
 0x472   :  { %3762 = vmatpush3.bf16.msra.mxu1 %v3761_v17  ;;  %v2451_v17 = vld [vmem:[%s6752_s15 + $0x178] sm:$0xff]  ;;  %v3779_v31 = vpack.c.bf16 %v2485_v28, %v2484_v26 }
 0x473   :  { %3764 = vmatprep.subr.bf16.mxu1 %v3763_v33  ;;  %v3777_v22 = vpack.c.bf16 %v2451_v17, %v2450_v16  ;;  %v3811_v33 = vpack.c.bf16 %v2517_v32, %v2516_v29 }
 0x474   :  { %3734 = vmatpush3.bf16.msra.mxu0 %v3733_v34  ;;  %v6455_v34 = vsub.s32 4, %v4529_v18 }
 0x475   :  { %3736 = vmatprep.subr.bf16.mxu0 %v3735_v44 }
 0x476   :  { %3766 = vmatpush3.bf16.msra.mxu1 %v3765_v36  ;;  %v6464_v36 = vsub.s32 7, %v4529_v18  ;;  %v1413_v38 = vrot.slane %v6192_v35, %v6455_v34 }
 0x477   :  { %3768 = vmatprep.subr.bf16.mxu1 %v3767_v49 }
 0x478   :  { %3738 = vmatpush3.bf16.msra.mxu0 %v3737_v50  ;;  %v1425_v44 = vrot.slane %v6192_v35, %v6464_v36 }
 0x479   :  { %3740 = vmatprep.subr.bf16.mxu0 %v3739_v60 }
 0x47a   :  { %3770 = vmatpush3.bf16.msra.mxu1 %v3769_v56 }
 0x47b   :  { %3772 = vmatprep.subr.bf16.mxu1 %v3771_v4 }
 0x47c   :  { %3742 = vmatpush3.bf16.msra.mxu0 %v3741_v9 }
 0x47d   :  { %3744 = vmatprep.subr.bf16.mxu0 %v3743_v8 }
 0x47e   :  { %3774 = vmatpush3.bf16.msra.mxu1 %v3773_v7 }
 0x47f   :  { %3776 = vmatprep.subr.bf16.mxu1 %v3775_v13 }
 0x480   :  { %3746 = vmatpush3.bf16.msra.mxu0 %v3745_v20 }
 0x481   :  { %3780 = vmatprep.subr.bf16.mxu0 %v3779_v31 }
 0x482   :  { %3778 = vmatpush3.bf16.msra.mxu1 %v3777_v22 }
 0x483   :  { %3812 = vmatprep.subr.bf16.mxu1 %v3811_v33 }
 0x4c6   :  { %v1855_v45 = vpop.f32.mrb[6].mxu0 }
 0x4c7   :  { %v6474_v47 = vadd.f32 %v1855_v45, %v1413_v38  ;;  %v1997_v48 = vpop.f32.mrb[6].mxu1  ;;  %v1857_v49 = vpop.f32.mrb[7].mxu0 }
 0x4c8   :  { %v6476_v50 = vadd.f32 %v1997_v48, %v1421_v39  ;;  %v6478_v37 = vadd.f32 %v1857_v49, %v1417_v41  ;;  %v1999_v51 = vpop.f32.mrb[7].mxu1 }
 0x4c9   :  { %v2006_v52 = vsel %vm58_vm1, %v6474_v47, 0.0  ;;  %v6483_v56 = vadd.f32 %v1999_v51, %v1425_v44 }
 0x4ca   :  { %v2034_v59 = vrot.slane %v2006_v52, 4  ;;  %v2070_v61 = vmul.f32 %v6474_v47, %v2006_v52  ;;  %v2008_v35 = vsel %vm58_vm1, %v6476_v50, 0.0  ;;  %v2007_v58 = vsel %vm58_vm1, %v6478_v37, 0.0 }
 0x4cb   :  { %v2046_v60 = vrot.slane %v2008_v35, 4  ;;  %v2072_v4 = vmul.f32 %v6476_v50, %v2008_v35  ;;  %v2040_v3 = vrot.slane %v2007_v58, 4  ;;  %v2071_v62 = vmul.f32 %v6478_v37, %v2007_v58 }
 0x4cc   :  { %v2035_v63 = vadd.f32 %v2034_v59, %v2006_v52  ;;  %v2098_v9 = vrot.slane %v2070_v61, 4  ;;  %v2009_v2 = vsel %vm58_vm1, %v6483_v56, 0.0 }
 0x4cd   :  { %v2047_v5 = vadd.f32 %v2046_v60, %v2008_v35  ;;  %v2110_v0 = vrot.slane %v2072_v4, 4  ;;  %v2041_v7 = vadd.f32 %v2040_v3, %v2007_v58  ;;  %v2104_v8 = vrot.slane %v2071_v62, 4 }
 0x4ce   :  { %v2036_v10 = vrot.slane %v2035_v63, 2  ;;  %v2099_v11 = vadd.f32 %v2098_v9, %v2070_v61  ;;  %v2052_v12 = vrot.slane %v2009_v2, 4  ;;  %v2073_v13 = vmul.f32 %v6483_v56, %v2009_v2 }
 0x4cf   :  { %v2048_v14 = vrot.slane %v2047_v5, 2  ;;  %v2111_v16 = vadd.f32 %v2110_v0, %v2072_v4  ;;  %v2042_v17 = vrot.slane %v2041_v7, 2  ;;  %v2105_v20 = vadd.f32 %v2104_v8, %v2071_v62 }
 0x4d0   :  { %v2037_v22 = vadd.f32 %v2036_v10, %v2035_v63  ;;  %v2100_v26 = vrot.slane %v2099_v11, 2  ;;  %v2053_v28 = vadd.f32 %v2052_v12, %v2009_v2  ;;  %v2116_v29 = vrot.slane %v2073_v13, 4 }
 0x4d1   :  { %v2049_v31 = vadd.f32 %v2048_v14, %v2047_v5  ;;  %v2112_v18 = vrot.slane %v2111_v16, 2  ;;  %v2043_v32 = vadd.f32 %v2042_v17, %v2041_v7  ;;  %v2106_v33 = vrot.slane %v2105_v20, 2 }
 0x4d2   :  { %v2038_v38 = vrot.slane %v2037_v22, 1  ;;  %v2101_v39 = vadd.f32 %v2100_v26, %v2099_v11  ;;  %v2054_v41 = vrot.slane %v2053_v28, 2  ;;  %v2117_v44 = vadd.f32 %v2116_v29, %v2073_v13 }
 0x4d3   :  { %v2050_v45 = vrot.slane %v2049_v31, 1  ;;  %v2113_v48 = vadd.f32 %v2112_v18, %v2111_v16  ;;  %v2044_v49 = vrot.slane %v2043_v32, 1  ;;  %v2107_v51 = vadd.f32 %v2106_v33, %v2105_v20 }
 0x4d4   :  { %v2039_v52 = vadd.f32 %v2038_v38, %v2037_v22  ;;  %v2102_v59 = vrot.slane %v2101_v39, 1  ;;  %v2055_v61 = vadd.f32 %v2054_v41, %v2053_v28  ;;  %v2118_v35 = vrot.slane %v2117_v44, 2 }
 0x4d5   :  { %v2051_v58 = vadd.f32 %v2050_v45, %v2049_v31  ;;  %v2114_v60 = vrot.slane %v2113_v48, 1  ;;  %v2045_v4 = vadd.f32 %v2044_v49, %v2043_v32  ;;  %v2108_v3 = vrot.slane %v2107_v51, 1 }
 0x4d6   :  { %v2062_v62 = vmul.f32 0.16666667, %v2039_v52  ;;  %v2103_v63 = vadd.f32 %v2102_v59, %v2101_v39  ;;  %v2056_v9 = vrot.slane %v2055_v61, 1  ;;  %v2119_v2 = vadd.f32 %v2118_v35, %v2117_v44 }
 0x4d7   :  { %v2064_v5 = vmul.f32 0.16666667, %v2051_v58  ;;  %v2115_v0 = vadd.f32 %v2114_v60, %v2113_v48  ;;  %v2063_v7 = vmul.f32 0.16666667, %v2045_v4  ;;  %v2109_v8 = vadd.f32 %v2108_v3, %v2107_v51  ;;  %v2146_v3 = vld [vmem:[%s6753_s13] sm:$0xff] }
 0x4d8   :  { %v2126_v10 = vmul.f32 0.16666667, %v2103_v63  ;;  %v2134_v11 = vmul.f32 %v2062_v62, %v2062_v62  ;;  %v2057_v12 = vadd.f32 %v2056_v9, %v2055_v61  ;;  %v2120_v13 = vrot.slane %v2119_v2, 1 }
 0x4d9   :  { %v2128_v14 = vmul.f32 0.16666667, %v2115_v0  ;;  %v2136_v16 = vmul.f32 %v2064_v5, %v2064_v5  ;;  %v2127_v17 = vmul.f32 0.16666667, %v2109_v8  ;;  %v2135_v20 = vmul.f32 %v2063_v7, %v2063_v7 }
 0x4da   :  { %v2142_v22 = vsub.f32 %v2126_v10, %v2134_v11  ;;  %v2065_v26 = vmul.f32 0.16666667, %v2057_v12  ;;  %v2121_v28 = vadd.f32 %v2120_v13, %v2119_v2  ;;  %v2211_v60 = vrot.slane %v2203_v30, %v4548_v6 }
 0x4db   :  { %v2144_v29 = vsub.f32 %v2128_v14, %v2136_v16  ;;  %v2143_v31 = vsub.f32 %v2127_v17, %v2135_v20 }
 0x4dc   :  { %v2151_v18 = vadd.f32 0.8, %v2142_v22  ;;  %v2129_v32 = vmul.f32 0.16666667, %v2121_v28  ;;  %v2137_v33 = vmul.f32 %v2065_v26, %v2065_v26 }
 0x4dd   :  { %v2153_v38 = vadd.f32 0.8, %v2144_v29  ;;  %v2152_v39 = vadd.f32 0.8, %v2143_v31 }
 0x4de   :  { %3883 = vrsqrt.f32 %v2151_v18  ;;  %v2145_v41 = vsub.f32 %v2129_v32, %v2137_v33 }
 0x4df   :  { %3885 = vrsqrt.f32 %v2153_v38 }
 0x4e0   :  { %3887 = vrsqrt.f32 %v2152_v39  ;;  %v2154_v44 = vadd.f32 0.8, %v2145_v41  ;;  %v2222_v41 = vld [vmem:[%s6754_s14] sm:$0xff] }
 0x4e2   :  { %3889 = vrsqrt.f32 %v2154_v44 }
 0x4e8   :  { %v3884_v45 = vpop.eup %3883 }
 0x4e9   :  { %v3886_v48 = vpop.eup %3885 }
 0x4ea   :  { %v3888_v49 = vpop.eup %3887 }
 0x4eb   :  { %v2173_v51 = vcombine.low %v3884_v45, %v3888_v49  ;;  %v2468_v49 = vld [vmem:[%s6752_s15 + $0x200] sm:$0xff] }
 0x4ec   :  { %v3890_v52 = vpop.eup %3889 }
 0x4ed   :  { %v2195_v59 = vrot.slane %v2173_v51, %v4548_v6  ;;  %v2174_v61 = vcombine.low %v3886_v48, %v3890_v52 }
 0x4ef   :  { %v2202_v35 = vrot.slane %v2174_v61, %v4548_v6 }
 0x4f1   :  { %v2204_v58 = vcombine.low %v2195_v59, %v2202_v35 }
 0x4f3   :  { %v2218_v4 = vrot.slane %v2204_v58, %v4548_v6  ;;  %v2487_v58 = vld [vmem:[%s6752_s15 + $0x298] sm:$0xff] }
 0x4f5   :  { %v2219_v63 = vcombine.low %v2211_v60, %v2218_v4  ;;  %v2518_v60 = vld [vmem:[%s6752_s15 + $0x390] sm:$0xff]  ;;  %v2519_v4 = vld [vmem:[%s6752_s15 + $0x398] sm:$0xff] }
 0x4f7   :  { %v2221_v9 = vmul.f32 %v2219_v63, %v2146_v3 }
 0x4f9   :  { %v2243_v2 = vrot.slane %v2221_v9, %v6455_v34  ;;  %v2247_v0 = vrot.slane %v2221_v9, %v6461_v25  ;;  %v2251_v8 = vrot.slane %v2221_v9, %v6458_v27  ;;  %v2255_v10 = vrot.slane %v2221_v9, %v6464_v36 }
 0x4fa   :  { %v2227_v11 = vrot.slane %v2221_v9, %v4532_v19  ;;  %v2231_v15 = vrot.slane %v2221_v9, %v4538_v21  ;;  %v2235_v23 = vrot.slane %v2221_v9, %v4961_v53  ;;  %v2239_v30 = vrot.slane %v2221_v9, %v4967_v55 }
 0x4fb   :  { %v2268_v12 = vmul.f32 %v2243_v2, %v2062_v62  ;;  %v2269_v13 = vmul.f32 %v2247_v0, %v2063_v7  ;;  %v2270_v14 = vmul.f32 %v2251_v8, %v2064_v5  ;;  %v2271_v16 = vmul.f32 %v2255_v10, %v2065_v26 }
 0x4fc   :  { %v2338_v17 = vmul.f32 %v6483_v56, %v2255_v10  ;;  %v2264_v20 = vmul.f32 %v2227_v11, %v6226_v40  ;;  %v2265_v22 = vmul.f32 %v2231_v15, %v6234_v54  ;;  %v2266_v28 = vmul.f32 %v2235_v23, %v6228_v42 }
 0x4fd   :  { %v2282_v29 = vcombine.low %v2268_v12, %v2269_v13  ;;  %v2283_v31 = vcombine.low %v2270_v14, %v2271_v16  ;;  %v2267_v18 = vmul.f32 %v2239_v30, %v6236_v57  ;;  %v2332_v32 = vmul.f32 %v6206_v46, %v2231_v15  ;;  %v2470_v14 = vld [vmem:[%s6752_s15 + $0x210] sm:$0xff]  ;;  %v2471_v16 = vld [vmem:[%s6752_s15 + $0x218] sm:$0xff] }
 0x4fe   :  { %v2280_v33 = vcombine.low %v2264_v20, %v2265_v22  ;;  %v2334_v62 = vmul.f32 %v6208_v24, %v2239_v30  ;;  %v2331_v5 = vmul.f32 %v6202_v1, %v2227_v11  ;;  %v2333_v7 = vmul.f32 %v6204_v43, %v2235_v23  ;;  %v2502_v20 = vld [vmem:[%s6752_s15 + $0x310] sm:$0xff]  ;;  %v2503_v22 = vld [vmem:[%s6752_s15 + $0x318] sm:$0xff] }
 0x4ff   :  { %v2304_v56 = vrot.slane %v2282_v29, %v4548_v6  ;;  %v2311_v40 = vrot.slane %v2283_v31, %v4548_v6  ;;  %v2281_v54 = vcombine.low %v2266_v28, %v2267_v18  ;;  %v2336_v42 = vmul.f32 %v6478_v37, %v2247_v0  ;;  %v2488_v28 = vld [vmem:[%s6752_s15 + $0x2a0] sm:$0xff]  ;;  %v2489_v18 = vld [vmem:[%s6752_s15 + $0x2a8] sm:$0xff] }
 0x500   :  { %v2290_v26 = vrot.slane %v2280_v33, %v4548_v6  ;;  %v2335_v57 = vmul.f32 %v6474_v47, %v2243_v2  ;;  %v2337_v46 = vmul.f32 %v6476_v50, %v2251_v8  ;;  %v3815_v31 = vpack.c.bf16 %v2519_v4, %v2518_v60  ;;  %v2521_v33 = vld [vmem:[%s6752_s15 + $0x3a8] sm:$0xff] }
 0x501   :  { %v2313_v38 = vcombine.low %v2304_v56, %v2311_v40  ;;  %v2297_v24 = vrot.slane %v2281_v54, %v4548_v6  ;;  %v3817_v56 = vpack.c.bf16 %v2503_v22, %v2502_v20  ;;  %v2472_v40 = vld [vmem:[%s6752_s15 + $0x220] sm:$0xff]  ;;  %v2473_v54 = vld [vmem:[%s6752_s15 + $0x228] sm:$0xff] }
 0x503   :  { %v2327_v1 = vrot.slane %v2313_v38, %v4548_v6  ;;  %v2312_v39 = vcombine.low %v2290_v26, %v2297_v24  ;;  %v2490_v38 = vld [vmem:[%s6752_s15 + $0x2b0] sm:$0xff]  ;;  %v2491_v24 = vld [vmem:[%s6752_s15 + $0x2b8] sm:$0xff] }
 0x505   :  { %v2320_v43 = vrot.slane %v2312_v39, %v4548_v6  ;;  %v2523_v39 = vld [vmem:[%s6752_s15 + $0x3b8] sm:$0xff] }
 0x507   :  { %v2328_v44 = vcombine.low %v2320_v43, %v2327_v1  ;;  %v2522_v1 = vld [vmem:[%s6752_s15 + $0x3b0] sm:$0xff]  ;;  %v3789_v43 = vpack.c.bf16 %v2473_v54, %v2472_v40  ;;  %v2483_v54 = vld [vmem:[%s6752_s15 + $0x278] sm:$0xff] }
 0x509   :  { %v2330_v37 = vsub.f32 %v2222_v41, %v2328_v44  ;;  %v2474_v44 = vld [vmem:[%s6752_s15 + $0x230] sm:$0xff] }
 0x50b   :  { %v2347_v45 = vrot.slane %v2330_v37, %v4538_v21  ;;  %v2355_v47 = vrot.slane %v2330_v37, %v4967_v55  ;;  %v2343_v50 = vrot.slane %v2330_v37, %v4532_v19  ;;  %v2351_v48 = vrot.slane %v2330_v37, %v4961_v53  ;;  %v2469_v19 = vld [vmem:[%s6752_s15 + $0x208] sm:$0xff]  ;;  %v2500_v53 = vld [vmem:[%s6752_s15 + $0x300] sm:$0xff] }
 0x50c   :  { %v2363_v6 = vrot.slane %v2330_v37, %v6461_v25  ;;  %v2371_v51 = vrot.slane %v2330_v37, %v6464_v36  ;;  %v2359_v52 = vrot.slane %v2330_v37, %v6455_v34  ;;  %v2367_v59 = vrot.slane %v2330_v37, %v6458_v27  ;;  %v2501_v25 = vld [vmem:[%s6752_s15 + $0x308] sm:$0xff]  ;;  %v2486_v27 = vld [vmem:[%s6752_s15 + $0x290] sm:$0xff]  ;;  %v2475_v37 = vld [vmem:[%s6752_s15 + $0x238] sm:$0xff] }
 0x50d   :  { %v2381_v61 = vadd.f32 %v2347_v45, %v2332_v32  ;;  %v2383_v21 = vadd.f32 %v2355_v47, %v2334_v62  ;;  %v2380_v35 = vadd.f32 %v2343_v50, %v2331_v5  ;;  %v2382_v55 = vadd.f32 %v2351_v48, %v2333_v7  ;;  %v2520_v32 = vld [vmem:[%s6752_s15 + $0x3a0] sm:$0xff]  ;;  %v2506_v50 = vld [vmem:[%s6752_s15 + $0x330] sm:$0xff]  ;;  %v2507_v48 = vld [vmem:[%s6752_s15 + $0x338] sm:$0xff] }
 0x50e   :  { %v2385_v36 = vadd.f32 %v2363_v6, %v2336_v42  ;;  %v2387_v34 = vadd.f32 %v2371_v51, %v2338_v17  ;;  %v6569_v3 = vadd.f32 %v2359_v52, %v2335_v57  ;;  %v6571_v63 = vadd.f32 %v2367_v59, %v2337_v46  ;;  %v2504_v57 = vld [vmem:[%s6752_s15 + $0x320] sm:$0xff]  ;;  %v2505_v46 = vld [vmem:[%s6752_s15 + $0x328] sm:$0xff] }
 0x50f   :  { %v2389_v9 = vmul.f32 0.2, %v2381_v61  ;;  %v2391_v2 = vmul.f32 0.2, %v2383_v21  ;;  %v2388_v0 = vmul.f32 0.2, %v2380_v35  ;;  %v3781_v10 = vpack.c.bf16 %v2469_v19, %v2468_v49 }
 0x510   :  { %v2390_v8 = vmul.f32 0.2, %v2382_v55  ;;  %v2393_v11 = vmul.f32 0.2, %v2385_v36  ;;  %v2395_v15 = vmul.f32 0.2, %v2387_v34  ;;  %v3813_v13 = vpack.c.bf16 %v2501_v25, %v2500_v53 }
 0x511   :  { %v2397_v23 = vmax.f32 %v2381_v61, %v2389_v9  ;;  %v2399_v30 = vmax.f32 %v2383_v21, %v2391_v2  ;;  %v2396_v12 = vmax.f32 %v2380_v35, %v2388_v0  ;;  %v3783_v29 = vpack.c.bf16 %v2487_v58, %v2486_v27  ;;  %v2492_v49 = vld [vmem:[%s6752_s15 + $0x2c0] sm:$0xff]  ;;  %v2493_v6 = vld [vmem:[%s6752_s15 + $0x2c8] sm:$0xff]  ;;  %v2526_v27 = vld [vmem:[%s6752_s15 + $0x3d0] sm:$0xff] }
 0x512   :  { %v2398_v17 = vmax.f32 %v2382_v55, %v2390_v8  ;;  %v2401_v62 = vmax.f32 %v2385_v36, %v2393_v11  ;;  %v2403_v5 = vmax.f32 %v2387_v34, %v2395_v15  ;;  %v3785_v7 = vpack.c.bf16 %v2471_v16, %v2470_v14  ;;  %v2524_v51 = vld [vmem:[%s6752_s15 + $0x3c0] sm:$0xff]  ;;  %v2525_v52 = vld [vmem:[%s6752_s15 + $0x3c8] sm:$0xff]  ;;  %v2494_v36 = vld [vmem:[%s6752_s15 + $0x2d0] sm:$0xff] }
 0x513   :  { %2603 = vmatprep.mubr.f32.mxu0 %v2397_v23  ;;  %2673 = vmatprep.mubr.f32.mxu1 %v2399_v30  ;;  %v3787_v42 = vpack.c.bf16 %v2489_v18, %v2488_v28  ;;  %v3819_v26 = vpack.c.bf16 %v2521_v33, %v2520_v32  ;;  %v3821_v41 = vpack.c.bf16 %v2505_v46, %v2504_v57  ;;  %v2476_v21 = vld [vmem:[%s6752_s15 + $0x240] sm:$0xff]  ;;  %v2477_v35 = vld [vmem:[%s6752_s15 + $0x248] sm:$0xff]  ;;  %v2495_v34 = vld [vmem:[%s6752_s15 + $0x2d8] sm:$0xff] }
 0x514   :  { %2604 = vmatmul.mubr.f32.vlgmr.msra.gmra.mrb[8].mxu0 %v2396_v12  ;;  %2674 = vmatmul.mubr.f32.vlgmr.msra.gmra.mrb[8].mxu1 %v2398_v17  ;;  %v3791_v45 = vpack.c.bf16 %v2491_v24, %v2490_v38  ;;  %v3823_v47 = vpack.c.bf16 %v2523_v39, %v2522_v1  ;;  %v3793_v59 = vpack.c.bf16 %v2475_v37, %v2474_v44  ;;  %v2508_v53 = vld [vmem:[%s6752_s15 + $0x340] sm:$0xff]  ;;  %v2509_v25 = vld [vmem:[%s6752_s15 + $0x348] sm:$0xff]  ;;  %v2527_v58 = vld [vmem:[%s6752_s15 + $0x3d8] sm:$0xff]  ;;  %v2392_v38 = vmul.f32 0.2, %v6569_v3 }
 0x515   :  { %3782 = vmatpush3.bf16.msra.mxu0 %v3781_v10  ;;  %3814 = vmatpush3.bf16.msra.mxu1 %v3813_v13  ;;  %v3825_v61 = vpack.c.bf16 %v2507_v48, %v2506_v50  ;;  %v3795_v55 = vpack.c.bf16 %v2493_v6, %v2492_v49  ;;  %v3827_v19 = vpack.c.bf16 %v2525_v52, %v2524_v51  ;;  %v2478_v9 = vld [vmem:[%s6752_s15 + $0x250] sm:$0xff]  ;;  %v2479_v2 = vld [vmem:[%s6752_s15 + $0x258] sm:$0xff]  ;;  %v2496_v15 = vld [vmem:[%s6752_s15 + $0x2e0] sm:$0xff]  ;;  %v2394_v24 = vmul.f32 0.2, %v6571_v63 }
 0x516   :  { %2743 = vmatprep.mubr.f32.mxu0 %v2401_v62  ;;  %2813 = vmatprep.mubr.f32.mxu1 %v2403_v5  ;;  %v3797_v60 = vpack.c.bf16 %v2477_v35, %v2476_v21  ;;  %v3829_v4 = vpack.c.bf16 %v2509_v25, %v2508_v53  ;;  %v3799_v0 = vpack.c.bf16 %v2495_v34, %v2494_v36  ;;  %v2510_v10 = vld [vmem:[%s6752_s15 + $0x350] sm:$0xff]  ;;  %v2511_v11 = vld [vmem:[%s6752_s15 + $0x358] sm:$0xff]  ;;  %v2497_v23 = vld [vmem:[%s6752_s15 + $0x2e8] sm:$0xff] }
 0x517   :  { %3784 = vmatprep.subr.bf16.mxu0 %v3783_v29  ;;  %3816 = vmatprep.subr.bf16.mxu1 %v3815_v31  ;;  %v3831_v8 = vpack.c.bf16 %v2527_v58, %v2526_v27  ;;  %v2528_v30 = vld [vmem:[%s6752_s15 + $0x3e0] sm:$0xff]  ;;  %v2529_v12 = vld [vmem:[%s6752_s15 + $0x3e8] sm:$0xff]  ;;  %v3801_v13 = vpack.c.bf16 %v2479_v2, %v2478_v9  ;;  %v3833_v14 = vpack.c.bf16 %v2511_v11, %v2510_v10  ;;  %v2498_v31 = vld [vmem:[%s6752_s15 + $0x2f0] sm:$0xff] }
 0x518   :  { %v2480_v16 = vld [vmem:[%s6752_s15 + $0x260] sm:$0xff]  ;;  %v2481_v17 = vld [vmem:[%s6752_s15 + $0x268] sm:$0xff]  ;;  %v3803_v20 = vpack.c.bf16 %v2497_v23, %v2496_v15  ;;  %v3835_v22 = vpack.c.bf16 %v2529_v12, %v2528_v30  ;;  %v2499_v18 = vld [vmem:[%s6752_s15 + $0x2f8] sm:$0xff]  ;;  %v2400_v1 = vmax.f32 %v6569_v3, %v2392_v38  ;;  %v2402_v39 = vmax.f32 %v6571_v63, %v2394_v24 }
 0x519   :  { %3786 = vmatpush3.bf16.msra.mxu0 %v3785_v7  ;;  %3818 = vmatpush3.bf16.msra.mxu1 %v3817_v56  ;;  %v2512_v28 = vld [vmem:[%s6752_s15 + $0x360] sm:$0xff]  ;;  %v2513_v29 = vld [vmem:[%s6752_s15 + $0x368] sm:$0xff]  ;;  %v2530_v32 = vld [vmem:[%s6752_s15 + $0x3f0] sm:$0xff]  ;;  %v3805_v62 = vpack.c.bf16 %v2481_v17, %v2480_v16  ;;  %v3807_v56 = vpack.c.bf16 %v2499_v18, %v2498_v31 }
 0x51a   :  { %3788 = vmatprep.subr.bf16.mxu0 %v3787_v42  ;;  %3820 = vmatprep.subr.bf16.mxu1 %v3819_v26  ;;  %v2531_v33 = vld [vmem:[%s6752_s15 + $0x3f8] sm:$0xff]  ;;  %v3837_v5 = vpack.c.bf16 %v2513_v29, %v2512_v28  ;;  %v2482_v7 = vld [vmem:[%s6752_s15 + $0x270] sm:$0xff]  ;;  %v2826_v44 = vld [vmem:[%s6755_s16] ss:$0 sm:$0xff] }
 0x51b   :  { %v3839_v40 = vpack.c.bf16 %v2531_v33, %v2530_v32  ;;  %v2514_v42 = vld [vmem:[%s6752_s15 + $0x370] sm:$0xff]  ;;  %v2515_v26 = vld [vmem:[%s6752_s15 + $0x378] sm:$0xff]  ;;  %v3809_v57 = vpack.c.bf16 %v2483_v54, %v2482_v7 }
 0x51c   :  { %v3841_v46 = vpack.c.bf16 %v2515_v26, %v2514_v42 }
 0x51d   :  { %3790 = vmatpush3.bf16.msra.mxu0 %v3789_v43  ;;  %3822 = vmatpush3.bf16.msra.mxu1 %v3821_v41 }
 0x51e   :  { %3792 = vmatprep.subr.bf16.mxu0 %v3791_v45  ;;  %3824 = vmatprep.subr.bf16.mxu1 %v3823_v47 }
 0x521   :  { %3794 = vmatpush3.bf16.msra.mxu0 %v3793_v59  ;;  %3826 = vmatpush3.bf16.msra.mxu1 %v3825_v61 }
 0x522   :  { %3796 = vmatprep.subr.bf16.mxu0 %v3795_v55  ;;  %3828 = vmatprep.subr.bf16.mxu1 %v3827_v19 }
 0x525   :  { %3798 = vmatpush3.bf16.msra.mxu0 %v3797_v60  ;;  %3830 = vmatpush3.bf16.msra.mxu1 %v3829_v4 }
 0x526   :  { %3800 = vmatprep.subr.bf16.mxu0 %v3799_v0  ;;  %3832 = vmatprep.subr.bf16.mxu1 %v3831_v8 }
 0x529   :  { %3802 = vmatpush3.bf16.msra.mxu0 %v3801_v13  ;;  %3834 = vmatpush3.bf16.msra.mxu1 %v3833_v14 }
 0x52a   :  { %3804 = vmatprep.subr.bf16.mxu0 %v3803_v20  ;;  %3836 = vmatprep.subr.bf16.mxu1 %v3835_v22 }
 0x52d   :  { %3806 = vmatpush3.bf16.msra.mxu0 %v3805_v62  ;;  %3838 = vmatpush3.bf16.msra.mxu1 %v3837_v5 }
 0x52e   :  { %3808 = vmatprep.subr.bf16.mxu0 %v3807_v56  ;;  %3840 = vmatprep.subr.bf16.mxu1 %v3839_v40 }
 0x531   :  { %3810 = vmatpush3.bf16.msra.mxu0 %v3809_v57  ;;  %3842 = vmatpush3.bf16.msra.mxu1 %v3841_v46 }
 0x534   :  { %2744 = vmatmul.mubr.f32.vlgmr.msra.gmra.mrb[10].mxu0 %v2400_v1  ;;  %2814 = vmatmul.mubr.f32.vlgmr.msra.gmra.mrb[10].mxu1 %v2402_v39 }
 0x5e7   :  { %v2876_v43 = vpop.f32.mrb[8].mxu0  ;;  %v2911_v41 = vpop.f32.mrb[8].mxu1 }
 0x5e8   :  { %v2877_v37 = vpop.f32.mrb[9].mxu0  ;;  %v2912_v45 = vpop.f32.mrb[9].mxu1 }
 0x5e9   :  { %v2878_v47 = vadd.f32 %v2877_v37, %v2876_v43  ;;  %v2913_v50 = vadd.f32 %v2912_v45, %v2911_v41 }
 0x5eb   :  { %v2606_v48 = vadd.f32 %v2878_v47, %v2826_v44 }
 0x5ed   :  { %v2676_v49 = vadd.f32 %v2913_v50, %v2606_v48 }
 0x607   :  { %v2946_v6 = vpop.f32.mrb[10].mxu0  ;;  %v2981_v51 = vpop.f32.mrb[10].mxu1 }
 0x608   :  { %v2947_v52 = vpop.f32.mrb[11].mxu0  ;;  %v2982_v3 = vpop.f32.mrb[11].mxu1 }
 0x609   :  { %v2948_v59 = vadd.f32 %v2947_v52, %v2946_v6  ;;  %v2983_v63 = vadd.f32 %v2982_v3, %v2981_v51 }
 0x60b   :  { %v2746_v61 = vadd.f32 %v2948_v59, %v2676_v49 }
 0x60d   :  { %v2816_v21 = vadd.f32 %v2983_v63, %v2746_v61 }
 0x60f   :  { %3891 = vtanh.f32 %v2816_v21 }
 0x619   :  { %v3892_v35 = vpop.eup %3891 }
 0x61a   :  { %2820 = vst [vmem:[%s6756_s17] sm:$0xff] %v3892_v35 }

</bundles_post_ra>
